<compile_context>
chip_gen: v7x
topology: tpu7x:2x2x1
jax: 0.10.0
libtpu: 0.0.40
codegen_flags: <defaults>
</compile_context>

<pallas_src>
import functools
import numpy as np
import jax
import jax.numpy as jnp
from jax import lax
from jax.experimental import pallas as pl
from jax.experimental.pallas import tpu as pltpu


def _bilinear_matrix(n_in, n_out):
    """1-D bilinear interpolation matrix, PyTorch Upsample(align_corners=True)."""
    m = np.zeros((n_out, n_in), np.float32)
    if n_out == 1:
        m[0, 0] = 1.0
        return m
    scale = (n_in - 1) / (n_out - 1)
    for i in range(n_out):
        src = i * scale
        i0 = min(int(np.floor(src)), n_in - 1)
        i1 = min(i0 + 1, n_in - 1)
        frac = src - i0
        m[i, i0] += 1.0 - frac
        m[i, i1] += frac
    return m


def _largest_divisor_leq(n, cap):
    best = 1
    for d in range(1, min(n, cap) + 1):
        if n % d == 0:
            best = d
    return best


def gate_att_kernel(scal_ref, g_ref, f_ref, w1_ref, w2_ref, uh_ref, uwT_ref,
                    fc1wT_ref, fc1b_ref, fc2wT_ref, fc2b_ref,
                    out_ref, pad_ref,
                    *, Nb, Cin, Cout, Hg, Wg, Hf, Wf):
    # ---- static offsets into the packed scalar (SMEM) parameter buffer ----
    O_B1 = 0            # conv_1 bias
    O_B2 = 1            # conv_2 bias
    O_BC = 2            # combined (3x3 + 5x5 + 7x7) bias
    O_WC = 3            # combined 7x7 weights, layout c*49 + ki*7 + kj

    g_all = g_ref[...]            # (Nb, Cin, Hg, Wg)
    f_all = f_ref[...]            # (Nb, Cout, Hf, Wf)

    # ---- conv_1 / conv_2: 1x1 convs, vectorized over batch + spatial ----
    g1 = jnp.sum(g_all * w1_ref[...], axis=1) + scal_ref[O_B1]   # (Nb, Hg, Wg)
    f1 = jnp.sum(f_all * w2_ref[...], axis=1) + scal_ref[O_B2]   # (Nb, Hf, Wf)

    # ---- bilinear upsample x2 (align_corners=True) as batched matmuls ----
    uh_b = jnp.broadcast_to(uh_ref[...][None], (Nb, Hf, Hg))
    uw_b = jnp.broadcast_to(uwT_ref[...][None], (Nb, Wg, Wf))
    g1u = jnp.einsum('nhp,npq->nhq', uh_b, g1,
                     preferred_element_type=jnp.float32)         # (Nb, Hf, Wg)
    g1u = jnp.einsum('nhq,nqw->nhw', g1u, uw_b,
                     preferred_element_type=jnp.float32)         # (Nb, Hf, Wf)

    # ---- zero-padded concat buffer (pad=3) for the single folded 7x7 conv ----
    pad_ref[...] = jnp.zeros_like(pad_ref)
    pad_ref[0, :, 3:3 + Hf, 3:3 + Wf] = g1u     # channel 0: upsampled g1
    pad_ref[1, :, 3:3 + Hf, 3:3 + Wf] = f1      # channel 1: f1

    # ---- folded multi-scale conv: one 7x7 over the 2-channel map ----
    acc = jnp.zeros((Nb, Hf, Wf), jnp.float32) + scal_ref[O_BC]
    for c in range(2):
        for ki in range(7):
            for kj in range(7):
                w = scal_ref[O_WC + c * 49 + ki * 7 + kj]
                acc = acc + w * pad_ref[c, :, ki:ki + Hf, kj:kj + Wf]
    sig_fg = jax.nn.sigmoid(acc)                                  # (Nb, Hf, Wf)

    # ---- global max pool over g, fc_1 -> relu -> fc_2 -> sigmoid (batched) ----
    gmax = jnp.max(jnp.max(g_all, axis=3), axis=2)                # (Nb, Cin)
    h = jnp.dot(gmax, fc1wT_ref[...],
                preferred_element_type=jnp.float32) + fc1b_ref[...]
    h = jnp.maximum(h, 0.0)
    g2 = jnp.dot(h, fc2wT_ref[...],
                 preferred_element_type=jnp.float32) + fc2b_ref[...]
    sig_g2 = jax.nn.sigmoid(g2)                                   # (Nb, Cout)

    # ---- gated output: channel gate * spatial gate, single block store ----
    out_val = jnp.stack(
        [jnp.stack([sig_g2[n:n + 1, c:c + 1] * sig_fg[n] for c in range(Cout)],
                   axis=0)
         for n in range(Nb)], axis=0)                             # (Nb, Cout, Hf, Wf)
    out_ref[...] = out_val.astype(out_ref.dtype)


def gate_att_forward(g, f, params, Uh, UwT):
    B, Cin, Hg, Wg = g.shape
    _, Cout, Hf, Wf = f.shape
    assert Hf == 2 * Hg and Wf == 2 * Wg

    Nb = _largest_divisor_leq(B, 8)      # batch elements per grid step
    grid = (B // Nb,)

    # ---- fold 3x3 + 5x5 + 7x7 into a single 7x7 kernel (host side) ----
    w3 = params['conv3_w'][0].astype(jnp.float32)   # (2, 3, 3)
    w5 = params['conv5_w'][0].astype(jnp.float32)   # (2, 5, 5)
    w7 = params['conv7_w'][0].astype(jnp.float32)   # (2, 7, 7)
    wc = (w7 + jnp.pad(w5, ((0, 0), (1, 1), (1, 1)))
             + jnp.pad(w3, ((0, 0), (2, 2), (2, 2))))             # (2, 7, 7)
    bc = (params['conv3_b'] + params['conv5_b'] + params['conv7_b'])

    scal = jnp.concatenate([
        params['conv1_b'].reshape(-1),
        params['conv2_b'].reshape(-1),
        bc.reshape(-1),
        wc.reshape(-1),
    ]).astype(jnp.float32)                                        # (3 + 98,)

    w1 = params['conv1_w'].reshape(1, Cin, 1, 1).astype(jnp.float32)
    w2 = params['conv2_w'].reshape(1, Cout, 1, 1).astype(jnp.float32)
    fc1wT = params['fc1_w'].T.astype(jnp.float32)                 # (Cin, Cout)
    fc1b = params['fc1_b'].reshape(1, Cout).astype(jnp.float32)
    fc2wT = params['fc2_w'].T.astype(jnp.float32)                 # (Cout, Cout)
    fc2b = params['fc2_b'].reshape(1, Cout).astype(jnp.float32)

    kernel = functools.partial(gate_att_kernel, Nb=Nb, Cin=Cin, Cout=Cout,
                               Hg=Hg, Wg=Wg, Hf=Hf, Wf=Wf)

    return pl.pallas_call(
        kernel,
        out_shape=jax.ShapeDtypeStruct((B, Cout, Hf, Wf), jnp.float32),
        grid=grid,
        in_specs=[
            pl.BlockSpec(memory_space=pltpu.MemorySpace.SMEM),            # packed scalars
            pl.BlockSpec((Nb, Cin, Hg, Wg), lambda b: (b, 0, 0, 0)),      # g
            pl.BlockSpec((Nb, Cout, Hf, Wf), lambda b: (b, 0, 0, 0)),     # f
            pl.BlockSpec((1, Cin, 1, 1), lambda b: (0, 0, 0, 0)),         # conv1_w
            pl.BlockSpec((1, Cout, 1, 1), lambda b: (0, 0, 0, 0)),        # conv2_w
            pl.BlockSpec((Hf, Hg), lambda b: (0, 0)),                     # Uh
            pl.BlockSpec((Wg, Wf), lambda b: (0, 0)),                     # Uw^T
            pl.BlockSpec((Cin, Cout), lambda b: (0, 0)),                  # fc1_w^T
            pl.BlockSpec((1, Cout), lambda b: (0, 0)),                    # fc1_b
            pl.BlockSpec((Cout, Cout), lambda b: (0, 0)),                 # fc2_w^T
            pl.BlockSpec((1, Cout), lambda b: (0, 0)),                    # fc2_b
        ],
        out_specs=pl.BlockSpec((Nb, Cout, Hf, Wf), lambda b: (b, 0, 0, 0)),
        scratch_shapes=[pltpu.VMEM((2, Nb, Hf + 6, Wf + 6), jnp.float32)],
        compiler_params=pltpu.CompilerParams(dimension_semantics=("parallel",)),
    )(scal, g, f, w1, w2, Uh, UwT, fc1wT, fc1b, fc2wT, fc2b)


def reference(g, f, p, Uh, UwT):
    """Pure-JAX reference of GateAttModule.forward (original, unfused weights)."""
    Cin, Cout = g.shape[1], f.shape[1]
    g1 = jnp.einsum('bchw,c->bhw', g, p['conv1_w'].reshape(Cin)) + p['conv1_b'][0]
    g1u = jnp.einsum('HP,bPQ,QW->bHW', Uh, g1, UwT)
    f1 = jnp.einsum('bchw,c->bhw', f, p['conv2_w'].reshape(Cout)) + p['conv2_b'][0]
    fg = jnp.stack([g1u, f1], axis=1)

    def conv(x, w, b, pad):
        y = lax.conv_general_dilated(x, w, (1, 1), [(pad, pad), (pad, pad)],
                                     dimension_numbers=('NCHW', 'OIHW', 'NCHW'))
        return y + b[0]

    s = jax.nn.sigmoid(conv(fg, p['conv3_w'], p['conv3_b'], 1)
                       + conv(fg, p['conv5_w'], p['conv5_b'], 2)
                       + conv(fg, p['conv7_w'], p['conv7_b'], 3))      # (B,1,Hf,Wf)
    gmax = jnp.max(g, axis=(2, 3))                                     # (B,Cin)
    h = jax.nn.relu(gmax @ p['fc1_w'].T + p['fc1_b'])
    g2 = jax.nn.sigmoid(h @ p['fc2_w'].T + p['fc2_b'])                 # (B,Cout)
    return g2[:, :, None, None] * s


if __name__ == "__main__":
    B, Cin, Cout = 2, 4, 8
    Hg = Wg = 8
    Hf, Wf = 2 * Hg, 2 * Wg

    key = jax.random.PRNGKey(0)
    ks = jax.random.split(key, 16)
    params = {
        'conv1_w': 0.3 * jax.random.normal(ks[0], (1, Cin, 1, 1), jnp.float32),
        'conv1_b': 0.1 * jax.random.normal(ks[1], (1,), jnp.float32),
        'conv2_w': 0.3 * jax.random.normal(ks[2], (1, Cout, 1, 1), jnp.float32),
        'conv2_b': 0.1 * jax.random.normal(ks[3], (1,), jnp.float32),
        'conv3_w': 0.3 * jax.random.normal(ks[4], (1, 2, 3, 3), jnp.float32),
        'conv3_b': 0.1 * jax.random.normal(ks[5], (1,), jnp.float32),
        'conv5_w': 0.2 * jax.random.normal(ks[6], (1, 2, 5, 5), jnp.float32),
        'conv5_b': 0.1 * jax.random.normal(ks[7], (1,), jnp.float32),
        'conv7_w': 0.1 * jax.random.normal(ks[8], (1, 2, 7, 7), jnp.float32),
        'conv7_b': 0.1 * jax.random.normal(ks[9], (1,), jnp.float32),
        'fc1_w': 0.3 * jax.random.normal(ks[10], (Cout, Cin), jnp.float32),
        'fc1_b': 0.1 * jax.random.normal(ks[11], (Cout,), jnp.float32),
        'fc2_w': 0.3 * jax.random.normal(ks[12], (Cout, Cout), jnp.float32),
        'fc2_b': 0.1 * jax.random.normal(ks[13], (Cout,), jnp.float32),
    }
    g = jax.random.normal(ks[14], (B, Cin, Hg, Wg), jnp.float32)
    f = jax.random.normal(ks[15], (B, Cout, Hf, Wf), jnp.float32)

    Uh = jnp.asarray(_bilinear_matrix(Hg, Hf))          # (Hf, Hg)
    UwT = jnp.asarray(_bilinear_matrix(Wg, Wf).T)       # (Wg, Wf)

    out = gate_att_forward(g, f, params, Uh, UwT)
    out = jax.block_until_ready(out)

    ref = jax.block_until_ready(reference(g, f, params, Uh, UwT))
    np.testing.assert_allclose(np.asarray(out), np.asarray(ref), rtol=1e-4, atol=1e-4)

    print("KERNEL_OK")
</pallas_src>

<mosaic_0001>
module attributes {stable_mosaic.version = 11 : i64} {
  func.func @gate_att_kernel(%arg0: i32, %arg1: memref<101xf32, #tpu.memory_space<smem>>, %arg2: memref<2x4x8x8xf32, #tpu.memory_space<vmem>>, %arg3: memref<2x8x16x16xf32, #tpu.memory_space<vmem>>, %arg4: memref<1x4x1x1xf32, #tpu.memory_space<vmem>>, %arg5: memref<1x8x1x1xf32, #tpu.memory_space<vmem>>, %arg6: memref<16x8xf32, #tpu.memory_space<vmem>>, %arg7: memref<8x16xf32, #tpu.memory_space<vmem>>, %arg8: memref<4x8xf32, #tpu.memory_space<vmem>>, %arg9: memref<1x8xf32, #tpu.memory_space<vmem>>, %arg10: memref<8x8xf32, #tpu.memory_space<vmem>>, %arg11: memref<1x8xf32, #tpu.memory_space<vmem>>, %arg12: memref<2x8x16x16xf32, #tpu.memory_space<vmem>>, %arg13: memref<2x2x22x22xf32, #tpu.memory_space<vmem>>) attributes {dimension_semantics = [#tpu.dimension_semantics<parallel>], iteration_bounds = array<i64: 1>, scalar_prefetch = 0 : i64, scratch_operands = 1 : i64, tpu.core_type = #tpu.core_type<tc>, window_params = [{transform_indices = @transform_0, window_bounds = array<i64: 101>}, {transform_indices = @transform_1, window_bounds = array<i64: 2, 4, 8, 8>}, {transform_indices = @transform_2, window_bounds = array<i64: 2, 8, 16, 16>}, {pipeline_mode = #tpu.pipeline_mode<synchronous>, transform_indices = @transform_3, window_bounds = array<i64: 1, 4, 1, 1>}, {pipeline_mode = #tpu.pipeline_mode<synchronous>, transform_indices = @transform_4, window_bounds = array<i64: 1, 8, 1, 1>}, {pipeline_mode = #tpu.pipeline_mode<synchronous>, transform_indices = @transform_5, window_bounds = array<i64: 16, 8>}, {pipeline_mode = #tpu.pipeline_mode<synchronous>, transform_indices = @transform_6, window_bounds = array<i64: 8, 16>}, {pipeline_mode = #tpu.pipeline_mode<synchronous>, transform_indices = @transform_7, window_bounds = array<i64: 4, 8>}, {pipeline_mode = #tpu.pipeline_mode<synchronous>, transform_indices = @transform_8, window_bounds = array<i64: 1, 8>}, {pipeline_mode = #tpu.pipeline_mode<synchronous>, transform_indices = @transform_9, window_bounds = array<i64: 8, 8>}, {pipeline_mode = #tpu.pipeline_mode<synchronous>, transform_indices = @transform_10, window_bounds = array<i64: 1, 8>}, {transform_indices = @transform_11, window_bounds = array<i64: 2, 8, 16, 16>}]} {
    %c0 = arith.constant 0 : index
    %c0_0 = arith.constant 0 : index
    %c0_1 = arith.constant 0 : index
    %c0_2 = arith.constant 0 : index
    %0 = vector.load %arg2[%c0, %c0_0, %c0_1, %c0_2] : memref<2x4x8x8xf32, #tpu.memory_space<vmem>>, vector<2x4x8x8xf32>
    %c0_3 = arith.constant 0 : index
    %c0_4 = arith.constant 0 : index
    %c0_5 = arith.constant 0 : index
    %c0_6 = arith.constant 0 : index
    %1 = vector.load %arg3[%c0_3, %c0_4, %c0_5, %c0_6] : memref<2x8x16x16xf32, #tpu.memory_space<vmem>>, vector<2x8x16x16xf32>
    %c0_7 = arith.constant 0 : index
    %c0_8 = arith.constant 0 : index
    %c0_9 = arith.constant 0 : index
    %c0_10 = arith.constant 0 : index
    %2 = vector.load %arg4[%c0_7, %c0_8, %c0_9, %c0_10] : memref<1x4x1x1xf32, #tpu.memory_space<vmem>>, vector<1x4x1x1xf32>
    %3 = vector.broadcast %2 : vector<1x4x1x1xf32> to vector<2x4x8x8xf32>
    %4 = arith.mulf %0, %3 : vector<2x4x8x8xf32>
    %cst = arith.constant dense<0.000000e+00> : vector<2x8x8xf32>
    %5 = vector.multi_reduction <add>, %4, %cst [1] : vector<2x4x8x8xf32> to vector<2x8x8xf32>
    %c0_11 = arith.constant 0 : index
    %6 = memref.load %arg1[%c0_11] : memref<101xf32, #tpu.memory_space<smem>>
    %7 = vector.broadcast %6 : f32 to vector<2x8x8xf32>
    %8 = arith.addf %5, %7 : vector<2x8x8xf32>
    %c0_12 = arith.constant 0 : index
    %c0_13 = arith.constant 0 : index
    %c0_14 = arith.constant 0 : index
    %c0_15 = arith.constant 0 : index
    %9 = vector.load %arg5[%c0_12, %c0_13, %c0_14, %c0_15] : memref<1x8x1x1xf32, #tpu.memory_space<vmem>>, vector<1x8x1x1xf32>
    %10 = vector.broadcast %9 : vector<1x8x1x1xf32> to vector<2x8x16x16xf32>
    %11 = arith.mulf %1, %10 : vector<2x8x16x16xf32>
    %cst_16 = arith.constant dense<0.000000e+00> : vector<2x16x16xf32>
    %12 = vector.multi_reduction <add>, %11, %cst_16 [1] : vector<2x8x16x16xf32> to vector<2x16x16xf32>
    %c1 = arith.constant 1 : index
    %13 = memref.load %arg1[%c1] : memref<101xf32, #tpu.memory_space<smem>>
    %14 = vector.broadcast %13 : f32 to vector<2x16x16xf32>
    %15 = arith.addf %12, %14 : vector<2x16x16xf32>
    %c0_17 = arith.constant 0 : index
    %c0_18 = arith.constant 0 : index
    %16 = vector.load %arg6[%c0_17, %c0_18] : memref<16x8xf32, #tpu.memory_space<vmem>>, vector<16x8xf32>
    %17 = vector.shape_cast %16 : vector<16x8xf32> to vector<1x16x8xf32>
    %18 = vector.shape_cast %17 : vector<1x16x8xf32> to vector<1x16x8xf32>
    %19 = vector.broadcast %18 : vector<1x16x8xf32> to vector<2x16x8xf32>
    %c0_19 = arith.constant 0 : index
    %c0_20 = arith.constant 0 : index
    %20 = vector.load %arg7[%c0_19, %c0_20] : memref<8x16xf32, #tpu.memory_space<vmem>>, vector<8x16xf32>
    %21 = vector.shape_cast %20 : vector<8x16xf32> to vector<1x8x16xf32>
    %22 = vector.shape_cast %21 : vector<1x8x16xf32> to vector<1x8x16xf32>
    %23 = vector.broadcast %22 : vector<1x8x16xf32> to vector<2x8x16xf32>
    "tpu.trace_start"() <{level = 10 : i32, message = "nhp,npq->nhq"}> : () -> ()
    %cst_21 = arith.constant dense<0.000000e+00> : vector<2x16x8xf32>
    %24 = tpu.matmul %19, %8, %cst_21 {dimension_numbers = #tpu.dot_dimension_numbers<[2], [1], [1], [2], [0, 0, 0, 1, 1, 2], [0], [0]>} : vector<2x16x8xf32>, vector<2x8x8xf32>, vector<2x16x8xf32> -> vector<2x16x8xf32>
    "tpu.trace_stop"() : () -> ()
    "tpu.trace_start"() <{level = 10 : i32, message = "nhq,nqw->nhw"}> : () -> ()
    %cst_22 = arith.constant dense<0.000000e+00> : vector<2x16x16xf32>
    %25 = tpu.matmul %24, %23, %cst_22 {dimension_numbers = #tpu.dot_dimension_numbers<[2], [1], [1], [2], [0, 0, 0, 1, 1, 2], [0], [0]>} : vector<2x16x8xf32>, vector<2x8x16xf32>, vector<2x16x16xf32> -> vector<2x16x16xf32>
    %cst_23 = arith.constant 0.000000e+00 : f32
    "tpu.trace_stop"() : () -> ()
    %26 = vector.broadcast %cst_23 : f32 to vector<2x2x22x22xf32>
    %c0_24 = arith.constant 0 : index
    %c0_25 = arith.constant 0 : index
    %c0_26 = arith.constant 0 : index
    %c0_27 = arith.constant 0 : index
    %27 = vector.load %arg13[%c0_24, %c0_25, %c0_26, %c0_27] : memref<2x2x22x22xf32, #tpu.memory_space<vmem>>, vector<2x2x22x22xf32>
    tpu.vector_store %arg13[%c0_24, %c0_25, %c0_26, %c0_27], %26 {strides = array<i32>} : memref<2x2x22x22xf32, #tpu.memory_space<vmem>>, vector<2x2x22x22xf32>,
    %c0_28 = arith.constant 0 : index
    %c0_29 = arith.constant 0 : index
    %c3 = arith.constant 3 : index
    %c3_30 = arith.constant 3 : index
    %28 = vector.load %arg13[%c0_28, %c0_29, %c3, %c3_30] : memref<2x2x22x22xf32, #tpu.memory_space<vmem>>, vector<1x2x16x16xf32>
    %29 = vector.shape_cast %28 : vector<1x2x16x16xf32> to vector<2x16x16xf32>
    %30 = vector.shape_cast %25 : vector<2x16x16xf32> to vector<1x2x16x16xf32>
    tpu.vector_store %arg13[%c0_28, %c0_29, %c3, %c3_30], %30 {strides = array<i32>} : memref<2x2x22x22xf32, #tpu.memory_space<vmem>>, vector<1x2x16x16xf32>,
    %c1_31 = arith.constant 1 : index
    %c0_32 = arith.constant 0 : index
    %c3_33 = arith.constant 3 : index
    %c3_34 = arith.constant 3 : index
    %31 = vector.load %arg13[%c1_31, %c0_32, %c3_33, %c3_34] : memref<2x2x22x22xf32, #tpu.memory_space<vmem>>, vector<1x2x16x16xf32>
    %32 = vector.shape_cast %31 : vector<1x2x16x16xf32> to vector<2x16x16xf32>
    %33 = vector.shape_cast %15 : vector<2x16x16xf32> to vector<1x2x16x16xf32>
    tpu.vector_store %arg13[%c1_31, %c0_32, %c3_33, %c3_34], %33 {strides = array<i32>} : memref<2x2x22x22xf32, #tpu.memory_space<vmem>>, vector<1x2x16x16xf32>,
    %cst_35 = arith.constant 0.000000e+00 : f32
    %34 = vector.broadcast %cst_35 : f32 to vector<2x16x16xf32>
    %c2 = arith.constant 2 : index
    %35 = memref.load %arg1[%c2] : memref<101xf32, #tpu.memory_space<smem>>
    %36 = vector.broadcast %35 : f32 to vector<2x16x16xf32>
    %37 = arith.addf %34, %36 : vector<2x16x16xf32>
    %c3_36 = arith.constant 3 : index
    %38 = memref.load %arg1[%c3_36] : memref<101xf32, #tpu.memory_space<smem>>
    %c0_37 = arith.constant 0 : index
    %c0_38 = arith.constant 0 : index
    %c0_39 = arith.constant 0 : index
    %c0_40 = arith.constant 0 : index
    %39 = vector.load %arg13[%c0_37, %c0_38, %c0_39, %c0_40] : memref<2x2x22x22xf32, #tpu.memory_space<vmem>>, vector<1x2x16x16xf32>
    %40 = vector.shape_cast %39 : vector<1x2x16x16xf32> to vector<2x16x16xf32>
    %41 = vector.broadcast %38 : f32 to vector<2x16x16xf32>
    %42 = arith.mulf %41, %40 : vector<2x16x16xf32>
    %43 = arith.addf %37, %42 : vector<2x16x16xf32>
    %c4 = arith.constant 4 : index
    %44 = memref.load %arg1[%c4] : memref<101xf32, #tpu.memory_space<smem>>
    %c0_41 = arith.constant 0 : index
    %c0_42 = arith.constant 0 : index
    %c0_43 = arith.constant 0 : index
    %c1_44 = arith.constant 1 : index
    %45 = vector.load %arg13[%c0_41, %c0_42, %c0_43, %c1_44] : memref<2x2x22x22xf32, #tpu.memory_space<vmem>>, vector<1x2x16x16xf32>
    %46 = vector.shape_cast %45 : vector<1x2x16x16xf32> to vector<2x16x16xf32>
    %47 = vector.broadcast %44 : f32 to vector<2x16x16xf32>
    %48 = arith.mulf %47, %46 : vector<2x16x16xf32>
    %49 = arith.addf %43, %48 : vector<2x16x16xf32>
    %c5 = arith.constant 5 : index
    %50 = memref.load %arg1[%c5] : memref<101xf32, #tpu.memory_space<smem>>
    %c0_45 = arith.constant 0 : index
    %c0_46 = arith.constant 0 : index
    %c0_47 = arith.constant 0 : index
    %c2_48 = arith.constant 2 : index
    %51 = vector.load %arg13[%c0_45, %c0_46, %c0_47, %c2_48] : memref<2x2x22x22xf32, #tpu.memory_space<vmem>>, vector<1x2x16x16xf32>
    %52 = vector.shape_cast %51 : vector<1x2x16x16xf32> to vector<2x16x16xf32>
    %53 = vector.broadcast %50 : f32 to vector<2x16x16xf32>
    %54 = arith.mulf %53, %52 : vector<2x16x16xf32>
    %55 = arith.addf %49, %54 : vector<2x16x16xf32>
    %c6 = arith.constant 6 : index
    %56 = memref.load %arg1[%c6] : memref<101xf32, #tpu.memory_space<smem>>
    %c0_49 = arith.constant 0 : index
    %c0_50 = arith.constant 0 : index
    %c0_51 = arith.constant 0 : index
    %c3_52 = arith.constant 3 : index
    %57 = vector.load %arg13[%c0_49, %c0_50, %c0_51, %c3_52] : memref<2x2x22x22xf32, #tpu.memory_space<vmem>>, vector<1x2x16x16xf32>
    %58 = vector.shape_cast %57 : vector<1x2x16x16xf32> to vector<2x16x16xf32>
    %59 = vector.broadcast %56 : f32 to vector<2x16x16xf32>
    %60 = arith.mulf %59, %58 : vector<2x16x16xf32>
    %61 = arith.addf %55, %60 : vector<2x16x16xf32>
    %c7 = arith.constant 7 : index
    %62 = memref.load %arg1[%c7] : memref<101xf32, #tpu.memory_space<smem>>
    %c0_53 = arith.constant 0 : index
    %c0_54 = arith.constant 0 : index
    %c0_55 = arith.constant 0 : index
    %c4_56 = arith.constant 4 : index
    %63 = vector.load %arg13[%c0_53, %c0_54, %c0_55, %c4_56] : memref<2x2x22x22xf32, #tpu.memory_space<vmem>>, vector<1x2x16x16xf32>
    %64 = vector.shape_cast %63 : vector<1x2x16x16xf32> to vector<2x16x16xf32>
    %65 = vector.broadcast %62 : f32 to vector<2x16x16xf32>
    %66 = arith.mulf %65, %64 : vector<2x16x16xf32>
    %67 = arith.addf %61, %66 : vector<2x16x16xf32>
    %c8 = arith.constant 8 : index
    %68 = memref.load %arg1[%c8] : memref<101xf32, #tpu.memory_space<smem>>
    %c0_57 = arith.constant 0 : index
    %c0_58 = arith.constant 0 : index
    %c0_59 = arith.constant 0 : index
    %c5_60 = arith.constant 5 : index
    %69 = vector.load %arg13[%c0_57, %c0_58, %c0_59, %c5_60] : memref<2x2x22x22xf32, #tpu.memory_space<vmem>>, vector<1x2x16x16xf32>
    %70 = vector.shape_cast %69 : vector<1x2x16x16xf32> to vector<2x16x16xf32>
    %71 = vector.broadcast %68 : f32 to vector<2x16x16xf32>
    %72 = arith.mulf %71, %70 : vector<2x16x16xf32>
    %73 = arith.addf %67, %72 : vector<2x16x16xf32>
    %c9 = arith.constant 9 : index
    %74 = memref.load %arg1[%c9] : memref<101xf32, #tpu.memory_space<smem>>
    %c0_61 = arith.constant 0 : index
    %c0_62 = arith.constant 0 : index
    %c0_63 = arith.constant 0 : index
    %c6_64 = arith.constant 6 : index
    %75 = vector.load %arg13[%c0_61, %c0_62, %c0_63, %c6_64] : memref<2x2x22x22xf32, #tpu.memory_space<vmem>>, vector<1x2x16x16xf32>
    %76 = vector.shape_cast %75 : vector<1x2x16x16xf32> to vector<2x16x16xf32>
    %77 = vector.broadcast %74 : f32 to vector<2x16x16xf32>
    %78 = arith.mulf %77, %76 : vector<2x16x16xf32>
    %79 = arith.addf %73, %78 : vector<2x16x16xf32>
    %c10 = arith.constant 10 : index
    %80 = memref.load %arg1[%c10] : memref<101xf32, #tpu.memory_space<smem>>
    %c0_65 = arith.constant 0 : index
    %c0_66 = arith.constant 0 : index
    %c1_67 = arith.constant 1 : index
    %c0_68 = arith.constant 0 : index
    %81 = vector.load %arg13[%c0_65, %c0_66, %c1_67, %c0_68] : memref<2x2x22x22xf32, #tpu.memory_space<vmem>>, vector<1x2x16x16xf32>
    %82 = vector.shape_cast %81 : vector<1x2x16x16xf32> to vector<2x16x16xf32>
    %83 = vector.broadcast %80 : f32 to vector<2x16x16xf32>
    %84 = arith.mulf %83, %82 : vector<2x16x16xf32>
    %85 = arith.addf %79, %84 : vector<2x16x16xf32>
    %c11 = arith.constant 11 : index
    %86 = memref.load %arg1[%c11] : memref<101xf32, #tpu.memory_space<smem>>
    %c0_69 = arith.constant 0 : index
    %c0_70 = arith.constant 0 : index
    %c1_71 = arith.constant 1 : index
    %c1_72 = arith.constant 1 : index
    %87 = vector.load %arg13[%c0_69, %c0_70, %c1_71, %c1_72] : memref<2x2x22x22xf32, #tpu.memory_space<vmem>>, vector<1x2x16x16xf32>
    %88 = vector.shape_cast %87 : vector<1x2x16x16xf32> to vector<2x16x16xf32>
    %89 = vector.broadcast %86 : f32 to vector<2x16x16xf32>
    %90 = arith.mulf %89, %88 : vector<2x16x16xf32>
    %91 = arith.addf %85, %90 : vector<2x16x16xf32>
    %c12 = arith.constant 12 : index
    %92 = memref.load %arg1[%c12] : memref<101xf32, #tpu.memory_space<smem>>
    %c0_73 = arith.constant 0 : index
    %c0_74 = arith.constant 0 : index
    %c1_75 = arith.constant 1 : index
    %c2_76 = arith.constant 2 : index
    %93 = vector.load %arg13[%c0_73, %c0_74, %c1_75, %c2_76] : memref<2x2x22x22xf32, #tpu.memory_space<vmem>>, vector<1x2x16x16xf32>
    %94 = vector.shape_cast %93 : vector<1x2x16x16xf32> to vector<2x16x16xf32>
    %95 = vector.broadcast %92 : f32 to vector<2x16x16xf32>
    %96 = arith.mulf %95, %94 : vector<2x16x16xf32>
    %97 = arith.addf %91, %96 : vector<2x16x16xf32>
    %c13 = arith.constant 13 : index
    %98 = memref.load %arg1[%c13] : memref<101xf32, #tpu.memory_space<smem>>
    %c0_77 = arith.constant 0 : index
    %c0_78 = arith.constant 0 : index
    %c1_79 = arith.constant 1 : index
    %c3_80 = arith.constant 3 : index
    %99 = vector.load %arg13[%c0_77, %c0_78, %c1_79, %c3_80] : memref<2x2x22x22xf32, #tpu.memory_space<vmem>>, vector<1x2x16x16xf32>
    %100 = vector.shape_cast %99 : vector<1x2x16x16xf32> to vector<2x16x16xf32>
    %101 = vector.broadcast %98 : f32 to vector<2x16x16xf32>
    %102 = arith.mulf %101, %100 : vector<2x16x16xf32>
    %103 = arith.addf %97, %102 : vector<2x16x16xf32>
    %c14 = arith.constant 14 : index
    %104 = memref.load %arg1[%c14] : memref<101xf32, #tpu.memory_space<smem>>
    %c0_81 = arith.constant 0 : index
    %c0_82 = arith.constant 0 : index
    %c1_83 = arith.constant 1 : index
    %c4_84 = arith.constant 4 : index
    %105 = vector.load %arg13[%c0_81, %c0_82, %c1_83, %c4_84] : memref<2x2x22x22xf32, #tpu.memory_space<vmem>>, vector<1x2x16x16xf32>
    %106 = vector.shape_cast %105 : vector<1x2x16x16xf32> to vector<2x16x16xf32>
    %107 = vector.broadcast %104 : f32 to vector<2x16x16xf32>
    %108 = arith.mulf %107, %106 : vector<2x16x16xf32>
    %109 = arith.addf %103, %108 : vector<2x16x16xf32>
    %c15 = arith.constant 15 : index
    %110 = memref.load %arg1[%c15] : memref<101xf32, #tpu.memory_space<smem>>
    %c0_85 = arith.constant 0 : index
    %c0_86 = arith.constant 0 : index
    %c1_87 = arith.constant 1 : index
    %c5_88 = arith.constant 5 : index
    %111 = vector.load %arg13[%c0_85, %c0_86, %c1_87, %c5_88] : memref<2x2x22x22xf32, #tpu.memory_space<vmem>>, vector<1x2x16x16xf32>
    %112 = vector.shape_cast %111 : vector<1x2x16x16xf32> to vector<2x16x16xf32>
    %113 = vector.broadcast %110 : f32 to vector<2x16x16xf32>
    %114 = arith.mulf %113, %112 : vector<2x16x16xf32>
    %115 = arith.addf %109, %114 : vector<2x16x16xf32>
    %c16 = arith.constant 16 : index
    %116 = memref.load %arg1[%c16] : memref<101xf32, #tpu.memory_space<smem>>
    %c0_89 = arith.constant 0 : index
    %c0_90 = arith.constant 0 : index
    %c1_91 = arith.constant 1 : index
    %c6_92 = arith.constant 6 : index
    %117 = vector.load %arg13[%c0_89, %c0_90, %c1_91, %c6_92] : memref<2x2x22x22xf32, #tpu.memory_space<vmem>>, vector<1x2x16x16xf32>
    %118 = vector.shape_cast %117 : vector<1x2x16x16xf32> to vector<2x16x16xf32>
    %119 = vector.broadcast %116 : f32 to vector<2x16x16xf32>
    %120 = arith.mulf %119, %118 : vector<2x16x16xf32>
    %121 = arith.addf %115, %120 : vector<2x16x16xf32>
    %c17 = arith.constant 17 : index
    %122 = memref.load %arg1[%c17] : memref<101xf32, #tpu.memory_space<smem>>
    %c0_93 = arith.constant 0 : index
    %c0_94 = arith.constant 0 : index
    %c2_95 = arith.constant 2 : index
    %c0_96 = arith.constant 0 : index
    %123 = vector.load %arg13[%c0_93, %c0_94, %c2_95, %c0_96] : memref<2x2x22x22xf32, #tpu.memory_space<vmem>>, vector<1x2x16x16xf32>
    %124 = vector.shape_cast %123 : vector<1x2x16x16xf32> to vector<2x16x16xf32>
    %125 = vector.broadcast %122 : f32 to vector<2x16x16xf32>
    %126 = arith.mulf %125, %124 : vector<2x16x16xf32>
    %127 = arith.addf %121, %126 : vector<2x16x16xf32>
    %c18 = arith.constant 18 : index
    %128 = memref.load %arg1[%c18] : memref<101xf32, #tpu.memory_space<smem>>
    %c0_97 = arith.constant 0 : index
    %c0_98 = arith.constant 0 : index
    %c2_99 = arith.constant 2 : index
    %c1_100 = arith.constant 1 : index
    %129 = vector.load %arg13[%c0_97, %c0_98, %c2_99, %c1_100] : memref<2x2x22x22xf32, #tpu.memory_space<vmem>>, vector<1x2x16x16xf32>
    %130 = vector.shape_cast %129 : vector<1x2x16x16xf32> to vector<2x16x16xf32>
    %131 = vector.broadcast %128 : f32 to vector<2x16x16xf32>
    %132 = arith.mulf %131, %130 : vector<2x16x16xf32>
    %133 = arith.addf %127, %132 : vector<2x16x16xf32>
    %c19 = arith.constant 19 : index
    %134 = memref.load %arg1[%c19] : memref<101xf32, #tpu.memory_space<smem>>
    %c0_101 = arith.constant 0 : index
    %c0_102 = arith.constant 0 : index
    %c2_103 = arith.constant 2 : index
    %c2_104 = arith.constant 2 : index
    %135 = vector.load %arg13[%c0_101, %c0_102, %c2_103, %c2_104] : memref<2x2x22x22xf32, #tpu.memory_space<vmem>>, vector<1x2x16x16xf32>
    %136 = vector.shape_cast %135 : vector<1x2x16x16xf32> to vector<2x16x16xf32>
    %137 = vector.broadcast %134 : f32 to vector<2x16x16xf32>
    %138 = arith.mulf %137, %136 : vector<2x16x16xf32>
    %139 = arith.addf %133, %138 : vector<2x16x16xf32>
    %c20 = arith.constant 20 : index
    %140 = memref.load %arg1[%c20] : memref<101xf32, #tpu.memory_space<smem>>
    %c0_105 = arith.constant 0 : index
    %c0_106 = arith.constant 0 : index
    %c2_107 = arith.constant 2 : index
    %c3_108 = arith.constant 3 : index
    %141 = vector.load %arg13[%c0_105, %c0_106, %c2_107, %c3_108] : memref<2x2x22x22xf32, #tpu.memory_space<vmem>>, vector<1x2x16x16xf32>
    %142 = vector.shape_cast %141 : vector<1x2x16x16xf32> to vector<2x16x16xf32>
    %143 = vector.broadcast %140 : f32 to vector<2x16x16xf32>
    %144 = arith.mulf %143, %142 : vector<2x16x16xf32>
    %145 = arith.addf %139, %144 : vector<2x16x16xf32>
    %c21 = arith.constant 21 : index
    %146 = memref.load %arg1[%c21] : memref<101xf32, #tpu.memory_space<smem>>
    %c0_109 = arith.constant 0 : index
    %c0_110 = arith.constant 0 : index
    %c2_111 = arith.constant 2 : index
    %c4_112 = arith.constant 4 : index
    %147 = vector.load %arg13[%c0_109, %c0_110, %c2_111, %c4_112] : memref<2x2x22x22xf32, #tpu.memory_space<vmem>>, vector<1x2x16x16xf32>
    %148 = vector.shape_cast %147 : vector<1x2x16x16xf32> to vector<2x16x16xf32>
    %149 = vector.broadcast %146 : f32 to vector<2x16x16xf32>
    %150 = arith.mulf %149, %148 : vector<2x16x16xf32>
    %151 = arith.addf %145, %150 : vector<2x16x16xf32>
    %c22 = arith.constant 22 : index
    %152 = memref.load %arg1[%c22] : memref<101xf32, #tpu.memory_space<smem>>
    %c0_113 = arith.constant 0 : index
    %c0_114 = arith.constant 0 : index
    %c2_115 = arith.constant 2 : index
    %c5_116 = arith.constant 5 : index
    %153 = vector.load %arg13[%c0_113, %c0_114, %c2_115, %c5_116] : memref<2x2x22x22xf32, #tpu.memory_space<vmem>>, vector<1x2x16x16xf32>
    %154 = vector.shape_cast %153 : vector<1x2x16x16xf32> to vector<2x16x16xf32>
    %155 = vector.broadcast %152 : f32 to vector<2x16x16xf32>
    %156 = arith.mulf %155, %154 : vector<2x16x16xf32>
    %157 = arith.addf %151, %156 : vector<2x16x16xf32>
    %c23 = arith.constant 23 : index
    %158 = memref.load %arg1[%c23] : memref<101xf32, #tpu.memory_space<smem>>
    %c0_117 = arith.constant 0 : index
    %c0_118 = arith.constant 0 : index
    %c2_119 = arith.constant 2 : index
    %c6_120 = arith.constant 6 : index
    %159 = vector.load %arg13[%c0_117, %c0_118, %c2_119, %c6_120] : memref<2x2x22x22xf32, #tpu.memory_space<vmem>>, vector<1x2x16x16xf32>
    %160 = vector.shape_cast %159 : vector<1x2x16x16xf32> to vector<2x16x16xf32>
    %161 = vector.broadcast %158 : f32 to vector<2x16x16xf32>
    %162 = arith.mulf %161, %160 : vector<2x16x16xf32>
    %163 = arith.addf %157, %162 : vector<2x16x16xf32>
    %c24 = arith.constant 24 : index
    %164 = memref.load %arg1[%c24] : memref<101xf32, #tpu.memory_space<smem>>
    %c0_121 = arith.constant 0 : index
    %c0_122 = arith.constant 0 : index
    %c3_123 = arith.constant 3 : index
    %c0_124 = arith.constant 0 : index
    %165 = vector.load %arg13[%c0_121, %c0_122, %c3_123, %c0_124] : memref<2x2x22x22xf32, #tpu.memory_space<vmem>>, vector<1x2x16x16xf32>
    %166 = vector.shape_cast %165 : vector<1x2x16x16xf32> to vector<2x16x16xf32>
    %167 = vector.broadcast %164 : f32 to vector<2x16x16xf32>
    %168 = arith.mulf %167, %166 : vector<2x16x16xf32>
    %169 = arith.addf %163, %168 : vector<2x16x16xf32>
    %c25 = arith.constant 25 : index
    %170 = memref.load %arg1[%c25] : memref<101xf32, #tpu.memory_space<smem>>
    %c0_125 = arith.constant 0 : index
    %c0_126 = arith.constant 0 : index
    %c3_127 = arith.constant 3 : index
    %c1_128 = arith.constant 1 : index
    %171 = vector.load %arg13[%c0_125, %c0_126, %c3_127, %c1_128] : memref<2x2x22x22xf32, #tpu.memory_space<vmem>>, vector<1x2x16x16xf32>
    %172 = vector.shape_cast %171 : vector<1x2x16x16xf32> to vector<2x16x16xf32>
    %173 = vector.broadcast %170 : f32 to vector<2x16x16xf32>
    %174 = arith.mulf %173, %172 : vector<2x16x16xf32>
    %175 = arith.addf %169, %174 : vector<2x16x16xf32>
    %c26 = arith.constant 26 : index
    %176 = memref.load %arg1[%c26] : memref<101xf32, #tpu.memory_space<smem>>
    %c0_129 = arith.constant 0 : index
    %c0_130 = arith.constant 0 : index
    %c3_131 = arith.constant 3 : index
    %c2_132 = arith.constant 2 : index
    %177 = vector.load %arg13[%c0_129, %c0_130, %c3_131, %c2_132] : memref<2x2x22x22xf32, #tpu.memory_space<vmem>>, vector<1x2x16x16xf32>
    %178 = vector.shape_cast %177 : vector<1x2x16x16xf32> to vector<2x16x16xf32>
    %179 = vector.broadcast %176 : f32 to vector<2x16x16xf32>
    %180 = arith.mulf %179, %178 : vector<2x16x16xf32>
    %181 = arith.addf %175, %180 : vector<2x16x16xf32>
    %c27 = arith.constant 27 : index
    %182 = memref.load %arg1[%c27] : memref<101xf32, #tpu.memory_space<smem>>
    %c0_133 = arith.constant 0 : index
    %c0_134 = arith.constant 0 : index
    %c3_135 = arith.constant 3 : index
    %c3_136 = arith.constant 3 : index
    %183 = vector.load %arg13[%c0_133, %c0_134, %c3_135, %c3_136] : memref<2x2x22x22xf32, #tpu.memory_space<vmem>>, vector<1x2x16x16xf32>
    %184 = vector.shape_cast %183 : vector<1x2x16x16xf32> to vector<2x16x16xf32>
    %185 = vector.broadcast %182 : f32 to vector<2x16x16xf32>
    %186 = arith.mulf %185, %184 : vector<2x16x16xf32>
    %187 = arith.addf %181, %186 : vector<2x16x16xf32>
    %c28 = arith.constant 28 : index
    %188 = memref.load %arg1[%c28] : memref<101xf32, #tpu.memory_space<smem>>
    %c0_137 = arith.constant 0 : index
    %c0_138 = arith.constant 0 : index
    %c3_139 = arith.constant 3 : index
    %c4_140 = arith.constant 4 : index
    %189 = vector.load %arg13[%c0_137, %c0_138, %c3_139, %c4_140] : memref<2x2x22x22xf32, #tpu.memory_space<vmem>>, vector<1x2x16x16xf32>
    %190 = vector.shape_cast %189 : vector<1x2x16x16xf32> to vector<2x16x16xf32>
    %191 = vector.broadcast %188 : f32 to vector<2x16x16xf32>
    %192 = arith.mulf %191, %190 : vector<2x16x16xf32>
    %193 = arith.addf %187, %192 : vector<2x16x16xf32>
    %c29 = arith.constant 29 : index
    %194 = memref.load %arg1[%c29] : memref<101xf32, #tpu.memory_space<smem>>
    %c0_141 = arith.constant 0 : index
    %c0_142 = arith.constant 0 : index
    %c3_143 = arith.constant 3 : index
    %c5_144 = arith.constant 5 : index
    %195 = vector.load %arg13[%c0_141, %c0_142, %c3_143, %c5_144] : memref<2x2x22x22xf32, #tpu.memory_space<vmem>>, vector<1x2x16x16xf32>
    %196 = vector.shape_cast %195 : vector<1x2x16x16xf32> to vector<2x16x16xf32>
    %197 = vector.broadcast %194 : f32 to vector<2x16x16xf32>
    %198 = arith.mulf %197, %196 : vector<2x16x16xf32>
    %199 = arith.addf %193, %198 : vector<2x16x16xf32>
    %c30 = arith.constant 30 : index
    %200 = memref.load %arg1[%c30] : memref<101xf32, #tpu.memory_space<smem>>
    %c0_145 = arith.constant 0 : index
    %c0_146 = arith.constant 0 : index
    %c3_147 = arith.constant 3 : index
    %c6_148 = arith.constant 6 : index
    %201 = vector.load %arg13[%c0_145, %c0_146, %c3_147, %c6_148] : memref<2x2x22x22xf32, #tpu.memory_space<vmem>>, vector<1x2x16x16xf32>
    %202 = vector.shape_cast %201 : vector<1x2x16x16xf32> to vector<2x16x16xf32>
    %203 = vector.broadcast %200 : f32 to vector<2x16x16xf32>
    %204 = arith.mulf %203, %202 : vector<2x16x16xf32>
    %205 = arith.addf %199, %204 : vector<2x16x16xf32>
    %c31 = arith.constant 31 : index
    %206 = memref.load %arg1[%c31] : memref<101xf32, #tpu.memory_space<smem>>
    %c0_149 = arith.constant 0 : index
    %c0_150 = arith.constant 0 : index
    %c4_151 = arith.constant 4 : index
    %c0_152 = arith.constant 0 : index
    %207 = vector.load %arg13[%c0_149, %c0_150, %c4_151, %c0_152] : memref<2x2x22x22xf32, #tpu.memory_space<vmem>>, vector<1x2x16x16xf32>
    %208 = vector.shape_cast %207 : vector<1x2x16x16xf32> to vector<2x16x16xf32>
    %209 = vector.broadcast %206 : f32 to vector<2x16x16xf32>
    %210 = arith.mulf %209, %208 : vector<2x16x16xf32>
    %211 = arith.addf %205, %210 : vector<2x16x16xf32>
    %c32 = arith.constant 32 : index
    %212 = memref.load %arg1[%c32] : memref<101xf32, #tpu.memory_space<smem>>
    %c0_153 = arith.constant 0 : index
    %c0_154 = arith.constant 0 : index
    %c4_155 = arith.constant 4 : index
    %c1_156 = arith.constant 1 : index
    %213 = vector.load %arg13[%c0_153, %c0_154, %c4_155, %c1_156] : memref<2x2x22x22xf32, #tpu.memory_space<vmem>>, vector<1x2x16x16xf32>
    %214 = vector.shape_cast %213 : vector<1x2x16x16xf32> to vector<2x16x16xf32>
    %215 = vector.broadcast %212 : f32 to vector<2x16x16xf32>
    %216 = arith.mulf %215, %214 : vector<2x16x16xf32>
    %217 = arith.addf %211, %216 : vector<2x16x16xf32>
    %c33 = arith.constant 33 : index
    %218 = memref.load %arg1[%c33] : memref<101xf32, #tpu.memory_space<smem>>
    %c0_157 = arith.constant 0 : index
    %c0_158 = arith.constant 0 : index
    %c4_159 = arith.constant 4 : index
    %c2_160 = arith.constant 2 : index
    %219 = vector.load %arg13[%c0_157, %c0_158, %c4_159, %c2_160] : memref<2x2x22x22xf32, #tpu.memory_space<vmem>>, vector<1x2x16x16xf32>
    %220 = vector.shape_cast %219 : vector<1x2x16x16xf32> to vector<2x16x16xf32>
    %221 = vector.broadcast %218 : f32 to vector<2x16x16xf32>
    %222 = arith.mulf %221, %220 : vector<2x16x16xf32>
    %223 = arith.addf %217, %222 : vector<2x16x16xf32>
    %c34 = arith.constant 34 : index
    %224 = memref.load %arg1[%c34] : memref<101xf32, #tpu.memory_space<smem>>
    %c0_161 = arith.constant 0 : index
    %c0_162 = arith.constant 0 : index
    %c4_163 = arith.constant 4 : index
    %c3_164 = arith.constant 3 : index
    %225 = vector.load %arg13[%c0_161, %c0_162, %c4_163, %c3_164] : memref<2x2x22x22xf32, #tpu.memory_space<vmem>>, vector<1x2x16x16xf32>
    %226 = vector.shape_cast %225 : vector<1x2x16x16xf32> to vector<2x16x16xf32>
    %227 = vector.broadcast %224 : f32 to vector<2x16x16xf32>
    %228 = arith.mulf %227, %226 : vector<2x16x16xf32>
    %229 = arith.addf %223, %228 : vector<2x16x16xf32>
    %c35 = arith.constant 35 : index
    %230 = memref.load %arg1[%c35] : memref<101xf32, #tpu.memory_space<smem>>
    %c0_165 = arith.constant 0 : index
    %c0_166 = arith.constant 0 : index
    %c4_167 = arith.constant 4 : index
    %c4_168 = arith.constant 4 : index
    %231 = vector.load %arg13[%c0_165, %c0_166, %c4_167, %c4_168] : memref<2x2x22x22xf32, #tpu.memory_space<vmem>>, vector<1x2x16x16xf32>
    %232 = vector.shape_cast %231 : vector<1x2x16x16xf32> to vector<2x16x16xf32>
    %233 = vector.broadcast %230 : f32 to vector<2x16x16xf32>
    %234 = arith.mulf %233, %232 : vector<2x16x16xf32>
    %235 = arith.addf %229, %234 : vector<2x16x16xf32>
    %c36 = arith.constant 36 : index
    %236 = memref.load %arg1[%c36] : memref<101xf32, #tpu.memory_space<smem>>
    %c0_169 = arith.constant 0 : index
    %c0_170 = arith.constant 0 : index
    %c4_171 = arith.constant 4 : index
    %c5_172 = arith.constant 5 : index
    %237 = vector.load %arg13[%c0_169, %c0_170, %c4_171, %c5_172] : memref<2x2x22x22xf32, #tpu.memory_space<vmem>>, vector<1x2x16x16xf32>
    %238 = vector.shape_cast %237 : vector<1x2x16x16xf32> to vector<2x16x16xf32>
    %239 = vector.broadcast %236 : f32 to vector<2x16x16xf32>
    %240 = arith.mulf %239, %238 : vector<2x16x16xf32>
    %241 = arith.addf %235, %240 : vector<2x16x16xf32>
    %c37 = arith.constant 37 : index
    %242 = memref.load %arg1[%c37] : memref<101xf32, #tpu.memory_space<smem>>
    %c0_173 = arith.constant 0 : index
    %c0_174 = arith.constant 0 : index
    %c4_175 = arith.constant 4 : index
    %c6_176 = arith.constant 6 : index
    %243 = vector.load %arg13[%c0_173, %c0_174, %c4_175, %c6_176] : memref<2x2x22x22xf32, #tpu.memory_space<vmem>>, vector<1x2x16x16xf32>
    %244 = vector.shape_cast %243 : vector<1x2x16x16xf32> to vector<2x16x16xf32>
    %245 = vector.broadcast %242 : f32 to vector<2x16x16xf32>
    %246 = arith.mulf %245, %244 : vector<2x16x16xf32>
    %247 = arith.addf %241, %246 : vector<2x16x16xf32>
    %c38 = arith.constant 38 : index
    %248 = memref.load %arg1[%c38] : memref<101xf32, #tpu.memory_space<smem>>
    %c0_177 = arith.constant 0 : index
    %c0_178 = arith.constant 0 : index
    %c5_179 = arith.constant 5 : index
    %c0_180 = arith.constant 0 : index
    %249 = vector.load %arg13[%c0_177, %c0_178, %c5_179, %c0_180] : memref<2x2x22x22xf32, #tpu.memory_space<vmem>>, vector<1x2x16x16xf32>
    %250 = vector.shape_cast %249 : vector<1x2x16x16xf32> to vector<2x16x16xf32>
    %251 = vector.broadcast %248 : f32 to vector<2x16x16xf32>
    %252 = arith.mulf %251, %250 : vector<2x16x16xf32>
    %253 = arith.addf %247, %252 : vector<2x16x16xf32>
    %c39 = arith.constant 39 : index
    %254 = memref.load %arg1[%c39] : memref<101xf32, #tpu.memory_space<smem>>
    %c0_181 = arith.constant 0 : index
    %c0_182 = arith.constant 0 : index
    %c5_183 = arith.constant 5 : index
    %c1_184 = arith.constant 1 : index
    %255 = vector.load %arg13[%c0_181, %c0_182, %c5_183, %c1_184] : memref<2x2x22x22xf32, #tpu.memory_space<vmem>>, vector<1x2x16x16xf32>
    %256 = vector.shape_cast %255 : vector<1x2x16x16xf32> to vector<2x16x16xf32>
    %257 = vector.broadcast %254 : f32 to vector<2x16x16xf32>
    %258 = arith.mulf %257, %256 : vector<2x16x16xf32>
    %259 = arith.addf %253, %258 : vector<2x16x16xf32>
    %c40 = arith.constant 40 : index
    %260 = memref.load %arg1[%c40] : memref<101xf32, #tpu.memory_space<smem>>
    %c0_185 = arith.constant 0 : index
    %c0_186 = arith.constant 0 : index
    %c5_187 = arith.constant 5 : index
    %c2_188 = arith.constant 2 : index
    %261 = vector.load %arg13[%c0_185, %c0_186, %c5_187, %c2_188] : memref<2x2x22x22xf32, #tpu.memory_space<vmem>>, vector<1x2x16x16xf32>
    %262 = vector.shape_cast %261 : vector<1x2x16x16xf32> to vector<2x16x16xf32>
    %263 = vector.broadcast %260 : f32 to vector<2x16x16xf32>
    %264 = arith.mulf %263, %262 : vector<2x16x16xf32>
    %265 = arith.addf %259, %264 : vector<2x16x16xf32>
    %c41 = arith.constant 41 : index
    %266 = memref.load %arg1[%c41] : memref<101xf32, #tpu.memory_space<smem>>
    %c0_189 = arith.constant 0 : index
    %c0_190 = arith.constant 0 : index
    %c5_191 = arith.constant 5 : index
    %c3_192 = arith.constant 3 : index
    %267 = vector.load %arg13[%c0_189, %c0_190, %c5_191, %c3_192] : memref<2x2x22x22xf32, #tpu.memory_space<vmem>>, vector<1x2x16x16xf32>
    %268 = vector.shape_cast %267 : vector<1x2x16x16xf32> to vector<2x16x16xf32>
    %269 = vector.broadcast %266 : f32 to vector<2x16x16xf32>
    %270 = arith.mulf %269, %268 : vector<2x16x16xf32>
    %271 = arith.addf %265, %270 : vector<2x16x16xf32>
    %c42 = arith.constant 42 : index
    %272 = memref.load %arg1[%c42] : memref<101xf32, #tpu.memory_space<smem>>
    %c0_193 = arith.constant 0 : index
    %c0_194 = arith.constant 0 : index
    %c5_195 = arith.constant 5 : index
    %c4_196 = arith.constant 4 : index
    %273 = vector.load %arg13[%c0_193, %c0_194, %c5_195, %c4_196] : memref<2x2x22x22xf32, #tpu.memory_space<vmem>>, vector<1x2x16x16xf32>
    %274 = vector.shape_cast %273 : vector<1x2x16x16xf32> to vector<2x16x16xf32>
    %275 = vector.broadcast %272 : f32 to vector<2x16x16xf32>
    %276 = arith.mulf %275, %274 : vector<2x16x16xf32>
    %277 = arith.addf %271, %276 : vector<2x16x16xf32>
    %c43 = arith.constant 43 : index
    %278 = memref.load %arg1[%c43] : memref<101xf32, #tpu.memory_space<smem>>
    %c0_197 = arith.constant 0 : index
    %c0_198 = arith.constant 0 : index
    %c5_199 = arith.constant 5 : index
    %c5_200 = arith.constant 5 : index
    %279 = vector.load %arg13[%c0_197, %c0_198, %c5_199, %c5_200] : memref<2x2x22x22xf32, #tpu.memory_space<vmem>>, vector<1x2x16x16xf32>
    %280 = vector.shape_cast %279 : vector<1x2x16x16xf32> to vector<2x16x16xf32>
    %281 = vector.broadcast %278 : f32 to vector<2x16x16xf32>
    %282 = arith.mulf %281, %280 : vector<2x16x16xf32>
    %283 = arith.addf %277, %282 : vector<2x16x16xf32>
    %c44 = arith.constant 44 : index
    %284 = memref.load %arg1[%c44] : memref<101xf32, #tpu.memory_space<smem>>
    %c0_201 = arith.constant 0 : index
    %c0_202 = arith.constant 0 : index
    %c5_203 = arith.constant 5 : index
    %c6_204 = arith.constant 6 : index
    %285 = vector.load %arg13[%c0_201, %c0_202, %c5_203, %c6_204] : memref<2x2x22x22xf32, #tpu.memory_space<vmem>>, vector<1x2x16x16xf32>
    %286 = vector.shape_cast %285 : vector<1x2x16x16xf32> to vector<2x16x16xf32>
    %287 = vector.broadcast %284 : f32 to vector<2x16x16xf32>
    %288 = arith.mulf %287, %286 : vector<2x16x16xf32>
    %289 = arith.addf %283, %288 : vector<2x16x16xf32>
    %c45 = arith.constant 45 : index
    %290 = memref.load %arg1[%c45] : memref<101xf32, #tpu.memory_space<smem>>
    %c0_205 = arith.constant 0 : index
    %c0_206 = arith.constant 0 : index
    %c6_207 = arith.constant 6 : index
    %c0_208 = arith.constant 0 : index
    %291 = vector.load %arg13[%c0_205, %c0_206, %c6_207, %c0_208] : memref<2x2x22x22xf32, #tpu.memory_space<vmem>>, vector<1x2x16x16xf32>
    %292 = vector.shape_cast %291 : vector<1x2x16x16xf32> to vector<2x16x16xf32>
    %293 = vector.broadcast %290 : f32 to vector<2x16x16xf32>
    %294 = arith.mulf %293, %292 : vector<2x16x16xf32>
    %295 = arith.addf %289, %294 : vector<2x16x16xf32>
    %c46 = arith.constant 46 : index
    %296 = memref.load %arg1[%c46] : memref<101xf32, #tpu.memory_space<smem>>
    %c0_209 = arith.constant 0 : index
    %c0_210 = arith.constant 0 : index
    %c6_211 = arith.constant 6 : index
    %c1_212 = arith.constant 1 : index
    %297 = vector.load %arg13[%c0_209, %c0_210, %c6_211, %c1_212] : memref<2x2x22x22xf32, #tpu.memory_space<vmem>>, vector<1x2x16x16xf32>
    %298 = vector.shape_cast %297 : vector<1x2x16x16xf32> to vector<2x16x16xf32>
    %299 = vector.broadcast %296 : f32 to vector<2x16x16xf32>
    %300 = arith.mulf %299, %298 : vector<2x16x16xf32>
    %301 = arith.addf %295, %300 : vector<2x16x16xf32>
    %c47 = arith.constant 47 : index
    %302 = memref.load %arg1[%c47] : memref<101xf32, #tpu.memory_space<smem>>
    %c0_213 = arith.constant 0 : index
    %c0_214 = arith.constant 0 : index
    %c6_215 = arith.constant 6 : index
    %c2_216 = arith.constant 2 : index
    %303 = vector.load %arg13[%c0_213, %c0_214, %c6_215, %c2_216] : memref<2x2x22x22xf32, #tpu.memory_space<vmem>>, vector<1x2x16x16xf32>
    %304 = vector.shape_cast %303 : vector<1x2x16x16xf32> to vector<2x16x16xf32>
    %305 = vector.broadcast %302 : f32 to vector<2x16x16xf32>
    %306 = arith.mulf %305, %304 : vector<2x16x16xf32>
    %307 = arith.addf %301, %306 : vector<2x16x16xf32>
    %c48 = arith.constant 48 : index
    %308 = memref.load %arg1[%c48] : memref<101xf32, #tpu.memory_space<smem>>
    %c0_217 = arith.constant 0 : index
    %c0_218 = arith.constant 0 : index
    %c6_219 = arith.constant 6 : index
    %c3_220 = arith.constant 3 : index
    %309 = vector.load %arg13[%c0_217, %c0_218, %c6_219, %c3_220] : memref<2x2x22x22xf32, #tpu.memory_space<vmem>>, vector<1x2x16x16xf32>
    %310 = vector.shape_cast %309 : vector<1x2x16x16xf32> to vector<2x16x16xf32>
    %311 = vector.broadcast %308 : f32 to vector<2x16x16xf32>
    %312 = arith.mulf %311, %310 : vector<2x16x16xf32>
    %313 = arith.addf %307, %312 : vector<2x16x16xf32>
    %c49 = arith.constant 49 : index
    %314 = memref.load %arg1[%c49] : memref<101xf32, #tpu.memory_space<smem>>
    %c0_221 = arith.constant 0 : index
    %c0_222 = arith.constant 0 : index
    %c6_223 = arith.constant 6 : index
    %c4_224 = arith.constant 4 : index
    %315 = vector.load %arg13[%c0_221, %c0_222, %c6_223, %c4_224] : memref<2x2x22x22xf32, #tpu.memory_space<vmem>>, vector<1x2x16x16xf32>
    %316 = vector.shape_cast %315 : vector<1x2x16x16xf32> to vector<2x16x16xf32>
    %317 = vector.broadcast %314 : f32 to vector<2x16x16xf32>
    %318 = arith.mulf %317, %316 : vector<2x16x16xf32>
    %319 = arith.addf %313, %318 : vector<2x16x16xf32>
    %c50 = arith.constant 50 : index
    %320 = memref.load %arg1[%c50] : memref<101xf32, #tpu.memory_space<smem>>
    %c0_225 = arith.constant 0 : index
    %c0_226 = arith.constant 0 : index
    %c6_227 = arith.constant 6 : index
    %c5_228 = arith.constant 5 : index
    %321 = vector.load %arg13[%c0_225, %c0_226, %c6_227, %c5_228] : memref<2x2x22x22xf32, #tpu.memory_space<vmem>>, vector<1x2x16x16xf32>
    %322 = vector.shape_cast %321 : vector<1x2x16x16xf32> to vector<2x16x16xf32>
    %323 = vector.broadcast %320 : f32 to vector<2x16x16xf32>
    %324 = arith.mulf %323, %322 : vector<2x16x16xf32>
    %325 = arith.addf %319, %324 : vector<2x16x16xf32>
    %c51 = arith.constant 51 : index
    %326 = memref.load %arg1[%c51] : memref<101xf32, #tpu.memory_space<smem>>
    %c0_229 = arith.constant 0 : index
    %c0_230 = arith.constant 0 : index
    %c6_231 = arith.constant 6 : index
    %c6_232 = arith.constant 6 : index
    %327 = vector.load %arg13[%c0_229, %c0_230, %c6_231, %c6_232] : memref<2x2x22x22xf32, #tpu.memory_space<vmem>>, vector<1x2x16x16xf32>
    %328 = vector.shape_cast %327 : vector<1x2x16x16xf32> to vector<2x16x16xf32>
    %329 = vector.broadcast %326 : f32 to vector<2x16x16xf32>
    %330 = arith.mulf %329, %328 : vector<2x16x16xf32>
    %331 = arith.addf %325, %330 : vector<2x16x16xf32>
    %c52 = arith.constant 52 : index
    %332 = memref.load %arg1[%c52] : memref<101xf32, #tpu.memory_space<smem>>
    %c1_233 = arith.constant 1 : index
    %c0_234 = arith.constant 0 : index
    %c0_235 = arith.constant 0 : index
    %c0_236 = arith.constant 0 : index
    %333 = vector.load %arg13[%c1_233, %c0_234, %c0_235, %c0_236] : memref<2x2x22x22xf32, #tpu.memory_space<vmem>>, vector<1x2x16x16xf32>
    %334 = vector.shape_cast %333 : vector<1x2x16x16xf32> to vector<2x16x16xf32>
    %335 = vector.broadcast %332 : f32 to vector<2x16x16xf32>
    %336 = arith.mulf %335, %334 : vector<2x16x16xf32>
    %337 = arith.addf %331, %336 : vector<2x16x16xf32>
    %c53 = arith.constant 53 : index
    %338 = memref.load %arg1[%c53] : memref<101xf32, #tpu.memory_space<smem>>
    %c1_237 = arith.constant 1 : index
    %c0_238 = arith.constant 0 : index
    %c0_239 = arith.constant 0 : index
    %c1_240 = arith.constant 1 : index
    %339 = vector.load %arg13[%c1_237, %c0_238, %c0_239, %c1_240] : memref<2x2x22x22xf32, #tpu.memory_space<vmem>>, vector<1x2x16x16xf32>
    %340 = vector.shape_cast %339 : vector<1x2x16x16xf32> to vector<2x16x16xf32>
    %341 = vector.broadcast %338 : f32 to vector<2x16x16xf32>
    %342 = arith.mulf %341, %340 : vector<2x16x16xf32>
    %343 = arith.addf %337, %342 : vector<2x16x16xf32>
    %c54 = arith.constant 54 : index
    %344 = memref.load %arg1[%c54] : memref<101xf32, #tpu.memory_space<smem>>
    %c1_241 = arith.constant 1 : index
    %c0_242 = arith.constant 0 : index
    %c0_243 = arith.constant 0 : index
    %c2_244 = arith.constant 2 : index
    %345 = vector.load %arg13[%c1_241, %c0_242, %c0_243, %c2_244] : memref<2x2x22x22xf32, #tpu.memory_space<vmem>>, vector<1x2x16x16xf32>
    %346 = vector.shape_cast %345 : vector<1x2x16x16xf32> to vector<2x16x16xf32>
    %347 = vector.broadcast %344 : f32 to vector<2x16x16xf32>
    %348 = arith.mulf %347, %346 : vector<2x16x16xf32>
    %349 = arith.addf %343, %348 : vector<2x16x16xf32>
    %c55 = arith.constant 55 : index
    %350 = memref.load %arg1[%c55] : memref<101xf32, #tpu.memory_space<smem>>
    %c1_245 = arith.constant 1 : index
    %c0_246 = arith.constant 0 : index
    %c0_247 = arith.constant 0 : index
    %c3_248 = arith.constant 3 : index
    %351 = vector.load %arg13[%c1_245, %c0_246, %c0_247, %c3_248] : memref<2x2x22x22xf32, #tpu.memory_space<vmem>>, vector<1x2x16x16xf32>
    %352 = vector.shape_cast %351 : vector<1x2x16x16xf32> to vector<2x16x16xf32>
    %353 = vector.broadcast %350 : f32 to vector<2x16x16xf32>
    %354 = arith.mulf %353, %352 : vector<2x16x16xf32>
    %355 = arith.addf %349, %354 : vector<2x16x16xf32>
    %c56 = arith.constant 56 : index
    %356 = memref.load %arg1[%c56] : memref<101xf32, #tpu.memory_space<smem>>
    %c1_249 = arith.constant 1 : index
    %c0_250 = arith.constant 0 : index
    %c0_251 = arith.constant 0 : index
    %c4_252 = arith.constant 4 : index
    %357 = vector.load %arg13[%c1_249, %c0_250, %c0_251, %c4_252] : memref<2x2x22x22xf32, #tpu.memory_space<vmem>>, vector<1x2x16x16xf32>
    %358 = vector.shape_cast %357 : vector<1x2x16x16xf32> to vector<2x16x16xf32>
    %359 = vector.broadcast %356 : f32 to vector<2x16x16xf32>
    %360 = arith.mulf %359, %358 : vector<2x16x16xf32>
    %361 = arith.addf %355, %360 : vector<2x16x16xf32>
    %c57 = arith.constant 57 : index
    %362 = memref.load %arg1[%c57] : memref<101xf32, #tpu.memory_space<smem>>
    %c1_253 = arith.constant 1 : index
    %c0_254 = arith.constant 0 : index
    %c0_255 = arith.constant 0 : index
    %c5_256 = arith.constant 5 : index
    %363 = vector.load %arg13[%c1_253, %c0_254, %c0_255, %c5_256] : memref<2x2x22x22xf32, #tpu.memory_space<vmem>>, vector<1x2x16x16xf32>
    %364 = vector.shape_cast %363 : vector<1x2x16x16xf32> to vector<2x16x16xf32>
    %365 = vector.broadcast %362 : f32 to vector<2x16x16xf32>
    %366 = arith.mulf %365, %364 : vector<2x16x16xf32>
    %367 = arith.addf %361, %366 : vector<2x16x16xf32>
    %c58 = arith.constant 58 : index
    %368 = memref.load %arg1[%c58] : memref<101xf32, #tpu.memory_space<smem>>
    %c1_257 = arith.constant 1 : index
    %c0_258 = arith.constant 0 : index
    %c0_259 = arith.constant 0 : index
    %c6_260 = arith.constant 6 : index
    %369 = vector.load %arg13[%c1_257, %c0_258, %c0_259, %c6_260] : memref<2x2x22x22xf32, #tpu.memory_space<vmem>>, vector<1x2x16x16xf32>
    %370 = vector.shape_cast %369 : vector<1x2x16x16xf32> to vector<2x16x16xf32>
    %371 = vector.broadcast %368 : f32 to vector<2x16x16xf32>
    %372 = arith.mulf %371, %370 : vector<2x16x16xf32>
    %373 = arith.addf %367, %372 : vector<2x16x16xf32>
    %c59 = arith.constant 59 : index
    %374 = memref.load %arg1[%c59] : memref<101xf32, #tpu.memory_space<smem>>
    %c1_261 = arith.constant 1 : index
    %c0_262 = arith.constant 0 : index
    %c1_263 = arith.constant 1 : index
    %c0_264 = arith.constant 0 : index
    %375 = vector.load %arg13[%c1_261, %c0_262, %c1_263, %c0_264] : memref<2x2x22x22xf32, #tpu.memory_space<vmem>>, vector<1x2x16x16xf32>
    %376 = vector.shape_cast %375 : vector<1x2x16x16xf32> to vector<2x16x16xf32>
    %377 = vector.broadcast %374 : f32 to vector<2x16x16xf32>
    %378 = arith.mulf %377, %376 : vector<2x16x16xf32>
    %379 = arith.addf %373, %378 : vector<2x16x16xf32>
    %c60 = arith.constant 60 : index
    %380 = memref.load %arg1[%c60] : memref<101xf32, #tpu.memory_space<smem>>
    %c1_265 = arith.constant 1 : index
    %c0_266 = arith.constant 0 : index
    %c1_267 = arith.constant 1 : index
    %c1_268 = arith.constant 1 : index
    %381 = vector.load %arg13[%c1_265, %c0_266, %c1_267, %c1_268] : memref<2x2x22x22xf32, #tpu.memory_space<vmem>>, vector<1x2x16x16xf32>
    %382 = vector.shape_cast %381 : vector<1x2x16x16xf32> to vector<2x16x16xf32>
    %383 = vector.broadcast %380 : f32 to vector<2x16x16xf32>
    %384 = arith.mulf %383, %382 : vector<2x16x16xf32>
    %385 = arith.addf %379, %384 : vector<2x16x16xf32>
    %c61 = arith.constant 61 : index
    %386 = memref.load %arg1[%c61] : memref<101xf32, #tpu.memory_space<smem>>
    %c1_269 = arith.constant 1 : index
    %c0_270 = arith.constant 0 : index
    %c1_271 = arith.constant 1 : index
    %c2_272 = arith.constant 2 : index
    %387 = vector.load %arg13[%c1_269, %c0_270, %c1_271, %c2_272] : memref<2x2x22x22xf32, #tpu.memory_space<vmem>>, vector<1x2x16x16xf32>
    %388 = vector.shape_cast %387 : vector<1x2x16x16xf32> to vector<2x16x16xf32>
    %389 = vector.broadcast %386 : f32 to vector<2x16x16xf32>
    %390 = arith.mulf %389, %388 : vector<2x16x16xf32>
    %391 = arith.addf %385, %390 : vector<2x16x16xf32>
    %c62 = arith.constant 62 : index
    %392 = memref.load %arg1[%c62] : memref<101xf32, #tpu.memory_space<smem>>
    %c1_273 = arith.constant 1 : index
    %c0_274 = arith.constant 0 : index
    %c1_275 = arith.constant 1 : index
    %c3_276 = arith.constant 3 : index
    %393 = vector.load %arg13[%c1_273, %c0_274, %c1_275, %c3_276] : memref<2x2x22x22xf32, #tpu.memory_space<vmem>>, vector<1x2x16x16xf32>
    %394 = vector.shape_cast %393 : vector<1x2x16x16xf32> to vector<2x16x16xf32>
    %395 = vector.broadcast %392 : f32 to vector<2x16x16xf32>
    %396 = arith.mulf %395, %394 : vector<2x16x16xf32>
    %397 = arith.addf %391, %396 : vector<2x16x16xf32>
    %c63 = arith.constant 63 : index
    %398 = memref.load %arg1[%c63] : memref<101xf32, #tpu.memory_space<smem>>
    %c1_277 = arith.constant 1 : index
    %c0_278 = arith.constant 0 : index
    %c1_279 = arith.constant 1 : index
    %c4_280 = arith.constant 4 : index
    %399 = vector.load %arg13[%c1_277, %c0_278, %c1_279, %c4_280] : memref<2x2x22x22xf32, #tpu.memory_space<vmem>>, vector<1x2x16x16xf32>
    %400 = vector.shape_cast %399 : vector<1x2x16x16xf32> to vector<2x16x16xf32>
    %401 = vector.broadcast %398 : f32 to vector<2x16x16xf32>
    %402 = arith.mulf %401, %400 : vector<2x16x16xf32>
    %403 = arith.addf %397, %402 : vector<2x16x16xf32>
    %c64 = arith.constant 64 : index
    %404 = memref.load %arg1[%c64] : memref<101xf32, #tpu.memory_space<smem>>
    %c1_281 = arith.constant 1 : index
    %c0_282 = arith.constant 0 : index
    %c1_283 = arith.constant 1 : index
    %c5_284 = arith.constant 5 : index
    %405 = vector.load %arg13[%c1_281, %c0_282, %c1_283, %c5_284] : memref<2x2x22x22xf32, #tpu.memory_space<vmem>>, vector<1x2x16x16xf32>
    %406 = vector.shape_cast %405 : vector<1x2x16x16xf32> to vector<2x16x16xf32>
    %407 = vector.broadcast %404 : f32 to vector<2x16x16xf32>
    %408 = arith.mulf %407, %406 : vector<2x16x16xf32>
    %409 = arith.addf %403, %408 : vector<2x16x16xf32>
    %c65 = arith.constant 65 : index
    %410 = memref.load %arg1[%c65] : memref<101xf32, #tpu.memory_space<smem>>
    %c1_285 = arith.constant 1 : index
    %c0_286 = arith.constant 0 : index
    %c1_287 = arith.constant 1 : index
    %c6_288 = arith.constant 6 : index
    %411 = vector.load %arg13[%c1_285, %c0_286, %c1_287, %c6_288] : memref<2x2x22x22xf32, #tpu.memory_space<vmem>>, vector<1x2x16x16xf32>
    %412 = vector.shape_cast %411 : vector<1x2x16x16xf32> to vector<2x16x16xf32>
    %413 = vector.broadcast %410 : f32 to vector<2x16x16xf32>
    %414 = arith.mulf %413, %412 : vector<2x16x16xf32>
    %415 = arith.addf %409, %414 : vector<2x16x16xf32>
    %c66 = arith.constant 66 : index
    %416 = memref.load %arg1[%c66] : memref<101xf32, #tpu.memory_space<smem>>
    %c1_289 = arith.constant 1 : index
    %c0_290 = arith.constant 0 : index
    %c2_291 = arith.constant 2 : index
    %c0_292 = arith.constant 0 : index
    %417 = vector.load %arg13[%c1_289, %c0_290, %c2_291, %c0_292] : memref<2x2x22x22xf32, #tpu.memory_space<vmem>>, vector<1x2x16x16xf32>
    %418 = vector.shape_cast %417 : vector<1x2x16x16xf32> to vector<2x16x16xf32>
    %419 = vector.broadcast %416 : f32 to vector<2x16x16xf32>
    %420 = arith.mulf %419, %418 : vector<2x16x16xf32>
    %421 = arith.addf %415, %420 : vector<2x16x16xf32>
    %c67 = arith.constant 67 : index
    %422 = memref.load %arg1[%c67] : memref<101xf32, #tpu.memory_space<smem>>
    %c1_293 = arith.constant 1 : index
    %c0_294 = arith.constant 0 : index
    %c2_295 = arith.constant 2 : index
    %c1_296 = arith.constant 1 : index
    %423 = vector.load %arg13[%c1_293, %c0_294, %c2_295, %c1_296] : memref<2x2x22x22xf32, #tpu.memory_space<vmem>>, vector<1x2x16x16xf32>
    %424 = vector.shape_cast %423 : vector<1x2x16x16xf32> to vector<2x16x16xf32>
    %425 = vector.broadcast %422 : f32 to vector<2x16x16xf32>
    %426 = arith.mulf %425, %424 : vector<2x16x16xf32>
    %427 = arith.addf %421, %426 : vector<2x16x16xf32>
    %c68 = arith.constant 68 : index
    %428 = memref.load %arg1[%c68] : memref<101xf32, #tpu.memory_space<smem>>
    %c1_297 = arith.constant 1 : index
    %c0_298 = arith.constant 0 : index
    %c2_299 = arith.constant 2 : index
    %c2_300 = arith.constant 2 : index
    %429 = vector.load %arg13[%c1_297, %c0_298, %c2_299, %c2_300] : memref<2x2x22x22xf32, #tpu.memory_space<vmem>>, vector<1x2x16x16xf32>
    %430 = vector.shape_cast %429 : vector<1x2x16x16xf32> to vector<2x16x16xf32>
    %431 = vector.broadcast %428 : f32 to vector<2x16x16xf32>
    %432 = arith.mulf %431, %430 : vector<2x16x16xf32>
    %433 = arith.addf %427, %432 : vector<2x16x16xf32>
    %c69 = arith.constant 69 : index
    %434 = memref.load %arg1[%c69] : memref<101xf32, #tpu.memory_space<smem>>
    %c1_301 = arith.constant 1 : index
    %c0_302 = arith.constant 0 : index
    %c2_303 = arith.constant 2 : index
    %c3_304 = arith.constant 3 : index
    %435 = vector.load %arg13[%c1_301, %c0_302, %c2_303, %c3_304] : memref<2x2x22x22xf32, #tpu.memory_space<vmem>>, vector<1x2x16x16xf32>
    %436 = vector.shape_cast %435 : vector<1x2x16x16xf32> to vector<2x16x16xf32>
    %437 = vector.broadcast %434 : f32 to vector<2x16x16xf32>
    %438 = arith.mulf %437, %436 : vector<2x16x16xf32>
    %439 = arith.addf %433, %438 : vector<2x16x16xf32>
    %c70 = arith.constant 70 : index
    %440 = memref.load %arg1[%c70] : memref<101xf32, #tpu.memory_space<smem>>
    %c1_305 = arith.constant 1 : index
    %c0_306 = arith.constant 0 : index
    %c2_307 = arith.constant 2 : index
    %c4_308 = arith.constant 4 : index
    %441 = vector.load %arg13[%c1_305, %c0_306, %c2_307, %c4_308] : memref<2x2x22x22xf32, #tpu.memory_space<vmem>>, vector<1x2x16x16xf32>
    %442 = vector.shape_cast %441 : vector<1x2x16x16xf32> to vector<2x16x16xf32>
    %443 = vector.broadcast %440 : f32 to vector<2x16x16xf32>
    %444 = arith.mulf %443, %442 : vector<2x16x16xf32>
    %445 = arith.addf %439, %444 : vector<2x16x16xf32>
    %c71 = arith.constant 71 : index
    %446 = memref.load %arg1[%c71] : memref<101xf32, #tpu.memory_space<smem>>
    %c1_309 = arith.constant 1 : index
    %c0_310 = arith.constant 0 : index
    %c2_311 = arith.constant 2 : index
    %c5_312 = arith.constant 5 : index
    %447 = vector.load %arg13[%c1_309, %c0_310, %c2_311, %c5_312] : memref<2x2x22x22xf32, #tpu.memory_space<vmem>>, vector<1x2x16x16xf32>
    %448 = vector.shape_cast %447 : vector<1x2x16x16xf32> to vector<2x16x16xf32>
    %449 = vector.broadcast %446 : f32 to vector<2x16x16xf32>
    %450 = arith.mulf %449, %448 : vector<2x16x16xf32>
    %451 = arith.addf %445, %450 : vector<2x16x16xf32>
    %c72 = arith.constant 72 : index
    %452 = memref.load %arg1[%c72] : memref<101xf32, #tpu.memory_space<smem>>
    %c1_313 = arith.constant 1 : index
    %c0_314 = arith.constant 0 : index
    %c2_315 = arith.constant 2 : index
    %c6_316 = arith.constant 6 : index
    %453 = vector.load %arg13[%c1_313, %c0_314, %c2_315, %c6_316] : memref<2x2x22x22xf32, #tpu.memory_space<vmem>>, vector<1x2x16x16xf32>
    %454 = vector.shape_cast %453 : vector<1x2x16x16xf32> to vector<2x16x16xf32>
    %455 = vector.broadcast %452 : f32 to vector<2x16x16xf32>
    %456 = arith.mulf %455, %454 : vector<2x16x16xf32>
    %457 = arith.addf %451, %456 : vector<2x16x16xf32>
    %c73 = arith.constant 73 : index
    %458 = memref.load %arg1[%c73] : memref<101xf32, #tpu.memory_space<smem>>
    %c1_317 = arith.constant 1 : index
    %c0_318 = arith.constant 0 : index
    %c3_319 = arith.constant 3 : index
    %c0_320 = arith.constant 0 : index
    %459 = vector.load %arg13[%c1_317, %c0_318, %c3_319, %c0_320] : memref<2x2x22x22xf32, #tpu.memory_space<vmem>>, vector<1x2x16x16xf32>
    %460 = vector.shape_cast %459 : vector<1x2x16x16xf32> to vector<2x16x16xf32>
    %461 = vector.broadcast %458 : f32 to vector<2x16x16xf32>
    %462 = arith.mulf %461, %460 : vector<2x16x16xf32>
    %463 = arith.addf %457, %462 : vector<2x16x16xf32>
    %c74 = arith.constant 74 : index
    %464 = memref.load %arg1[%c74] : memref<101xf32, #tpu.memory_space<smem>>
    %c1_321 = arith.constant 1 : index
    %c0_322 = arith.constant 0 : index
    %c3_323 = arith.constant 3 : index
    %c1_324 = arith.constant 1 : index
    %465 = vector.load %arg13[%c1_321, %c0_322, %c3_323, %c1_324] : memref<2x2x22x22xf32, #tpu.memory_space<vmem>>, vector<1x2x16x16xf32>
    %466 = vector.shape_cast %465 : vector<1x2x16x16xf32> to vector<2x16x16xf32>
    %467 = vector.broadcast %464 : f32 to vector<2x16x16xf32>
    %468 = arith.mulf %467, %466 : vector<2x16x16xf32>
    %469 = arith.addf %463, %468 : vector<2x16x16xf32>
    %c75 = arith.constant 75 : index
    %470 = memref.load %arg1[%c75] : memref<101xf32, #tpu.memory_space<smem>>
    %c1_325 = arith.constant 1 : index
    %c0_326 = arith.constant 0 : index
    %c3_327 = arith.constant 3 : index
    %c2_328 = arith.constant 2 : index
    %471 = vector.load %arg13[%c1_325, %c0_326, %c3_327, %c2_328] : memref<2x2x22x22xf32, #tpu.memory_space<vmem>>, vector<1x2x16x16xf32>
    %472 = vector.shape_cast %471 : vector<1x2x16x16xf32> to vector<2x16x16xf32>
    %473 = vector.broadcast %470 : f32 to vector<2x16x16xf32>
    %474 = arith.mulf %473, %472 : vector<2x16x16xf32>
    %475 = arith.addf %469, %474 : vector<2x16x16xf32>
    %c76 = arith.constant 76 : index
    %476 = memref.load %arg1[%c76] : memref<101xf32, #tpu.memory_space<smem>>
    %c1_329 = arith.constant 1 : index
    %c0_330 = arith.constant 0 : index
    %c3_331 = arith.constant 3 : index
    %c3_332 = arith.constant 3 : index
    %477 = vector.load %arg13[%c1_329, %c0_330, %c3_331, %c3_332] : memref<2x2x22x22xf32, #tpu.memory_space<vmem>>, vector<1x2x16x16xf32>
    %478 = vector.shape_cast %477 : vector<1x2x16x16xf32> to vector<2x16x16xf32>
    %479 = vector.broadcast %476 : f32 to vector<2x16x16xf32>
    %480 = arith.mulf %479, %478 : vector<2x16x16xf32>
    %481 = arith.addf %475, %480 : vector<2x16x16xf32>
    %c77 = arith.constant 77 : index
    %482 = memref.load %arg1[%c77] : memref<101xf32, #tpu.memory_space<smem>>
    %c1_333 = arith.constant 1 : index
    %c0_334 = arith.constant 0 : index
    %c3_335 = arith.constant 3 : index
    %c4_336 = arith.constant 4 : index
    %483 = vector.load %arg13[%c1_333, %c0_334, %c3_335, %c4_336] : memref<2x2x22x22xf32, #tpu.memory_space<vmem>>, vector<1x2x16x16xf32>
    %484 = vector.shape_cast %483 : vector<1x2x16x16xf32> to vector<2x16x16xf32>
    %485 = vector.broadcast %482 : f32 to vector<2x16x16xf32>
    %486 = arith.mulf %485, %484 : vector<2x16x16xf32>
    %487 = arith.addf %481, %486 : vector<2x16x16xf32>
    %c78 = arith.constant 78 : index
    %488 = memref.load %arg1[%c78] : memref<101xf32, #tpu.memory_space<smem>>
    %c1_337 = arith.constant 1 : index
    %c0_338 = arith.constant 0 : index
    %c3_339 = arith.constant 3 : index
    %c5_340 = arith.constant 5 : index
    %489 = vector.load %arg13[%c1_337, %c0_338, %c3_339, %c5_340] : memref<2x2x22x22xf32, #tpu.memory_space<vmem>>, vector<1x2x16x16xf32>
    %490 = vector.shape_cast %489 : vector<1x2x16x16xf32> to vector<2x16x16xf32>
    %491 = vector.broadcast %488 : f32 to vector<2x16x16xf32>
    %492 = arith.mulf %491, %490 : vector<2x16x16xf32>
    %493 = arith.addf %487, %492 : vector<2x16x16xf32>
    %c79 = arith.constant 79 : index
    %494 = memref.load %arg1[%c79] : memref<101xf32, #tpu.memory_space<smem>>
    %c1_341 = arith.constant 1 : index
    %c0_342 = arith.constant 0 : index
    %c3_343 = arith.constant 3 : index
    %c6_344 = arith.constant 6 : index
    %495 = vector.load %arg13[%c1_341, %c0_342, %c3_343, %c6_344] : memref<2x2x22x22xf32, #tpu.memory_space<vmem>>, vector<1x2x16x16xf32>
    %496 = vector.shape_cast %495 : vector<1x2x16x16xf32> to vector<2x16x16xf32>
    %497 = vector.broadcast %494 : f32 to vector<2x16x16xf32>
    %498 = arith.mulf %497, %496 : vector<2x16x16xf32>
    %499 = arith.addf %493, %498 : vector<2x16x16xf32>
    %c80 = arith.constant 80 : index
    %500 = memref.load %arg1[%c80] : memref<101xf32, #tpu.memory_space<smem>>
    %c1_345 = arith.constant 1 : index
    %c0_346 = arith.constant 0 : index
    %c4_347 = arith.constant 4 : index
    %c0_348 = arith.constant 0 : index
    %501 = vector.load %arg13[%c1_345, %c0_346, %c4_347, %c0_348] : memref<2x2x22x22xf32, #tpu.memory_space<vmem>>, vector<1x2x16x16xf32>
    %502 = vector.shape_cast %501 : vector<1x2x16x16xf32> to vector<2x16x16xf32>
    %503 = vector.broadcast %500 : f32 to vector<2x16x16xf32>
    %504 = arith.mulf %503, %502 : vector<2x16x16xf32>
    %505 = arith.addf %499, %504 : vector<2x16x16xf32>
    %c81 = arith.constant 81 : index
    %506 = memref.load %arg1[%c81] : memref<101xf32, #tpu.memory_space<smem>>
    %c1_349 = arith.constant 1 : index
    %c0_350 = arith.constant 0 : index
    %c4_351 = arith.constant 4 : index
    %c1_352 = arith.constant 1 : index
    %507 = vector.load %arg13[%c1_349, %c0_350, %c4_351, %c1_352] : memref<2x2x22x22xf32, #tpu.memory_space<vmem>>, vector<1x2x16x16xf32>
    %508 = vector.shape_cast %507 : vector<1x2x16x16xf32> to vector<2x16x16xf32>
    %509 = vector.broadcast %506 : f32 to vector<2x16x16xf32>
    %510 = arith.mulf %509, %508 : vector<2x16x16xf32>
    %511 = arith.addf %505, %510 : vector<2x16x16xf32>
    %c82 = arith.constant 82 : index
    %512 = memref.load %arg1[%c82] : memref<101xf32, #tpu.memory_space<smem>>
    %c1_353 = arith.constant 1 : index
    %c0_354 = arith.constant 0 : index
    %c4_355 = arith.constant 4 : index
    %c2_356 = arith.constant 2 : index
    %513 = vector.load %arg13[%c1_353, %c0_354, %c4_355, %c2_356] : memref<2x2x22x22xf32, #tpu.memory_space<vmem>>, vector<1x2x16x16xf32>
    %514 = vector.shape_cast %513 : vector<1x2x16x16xf32> to vector<2x16x16xf32>
    %515 = vector.broadcast %512 : f32 to vector<2x16x16xf32>
    %516 = arith.mulf %515, %514 : vector<2x16x16xf32>
    %517 = arith.addf %511, %516 : vector<2x16x16xf32>
    %c83 = arith.constant 83 : index
    %518 = memref.load %arg1[%c83] : memref<101xf32, #tpu.memory_space<smem>>
    %c1_357 = arith.constant 1 : index
    %c0_358 = arith.constant 0 : index
    %c4_359 = arith.constant 4 : index
    %c3_360 = arith.constant 3 : index
    %519 = vector.load %arg13[%c1_357, %c0_358, %c4_359, %c3_360] : memref<2x2x22x22xf32, #tpu.memory_space<vmem>>, vector<1x2x16x16xf32>
    %520 = vector.shape_cast %519 : vector<1x2x16x16xf32> to vector<2x16x16xf32>
    %521 = vector.broadcast %518 : f32 to vector<2x16x16xf32>
    %522 = arith.mulf %521, %520 : vector<2x16x16xf32>
    %523 = arith.addf %517, %522 : vector<2x16x16xf32>
    %c84 = arith.constant 84 : index
    %524 = memref.load %arg1[%c84] : memref<101xf32, #tpu.memory_space<smem>>
    %c1_361 = arith.constant 1 : index
    %c0_362 = arith.constant 0 : index
    %c4_363 = arith.constant 4 : index
    %c4_364 = arith.constant 4 : index
    %525 = vector.load %arg13[%c1_361, %c0_362, %c4_363, %c4_364] : memref<2x2x22x22xf32, #tpu.memory_space<vmem>>, vector<1x2x16x16xf32>
    %526 = vector.shape_cast %525 : vector<1x2x16x16xf32> to vector<2x16x16xf32>
    %527 = vector.broadcast %524 : f32 to vector<2x16x16xf32>
    %528 = arith.mulf %527, %526 : vector<2x16x16xf32>
    %529 = arith.addf %523, %528 : vector<2x16x16xf32>
    %c85 = arith.constant 85 : index
    %530 = memref.load %arg1[%c85] : memref<101xf32, #tpu.memory_space<smem>>
    %c1_365 = arith.constant 1 : index
    %c0_366 = arith.constant 0 : index
    %c4_367 = arith.constant 4 : index
    %c5_368 = arith.constant 5 : index
    %531 = vector.load %arg13[%c1_365, %c0_366, %c4_367, %c5_368] : memref<2x2x22x22xf32, #tpu.memory_space<vmem>>, vector<1x2x16x16xf32>
    %532 = vector.shape_cast %531 : vector<1x2x16x16xf32> to vector<2x16x16xf32>
    %533 = vector.broadcast %530 : f32 to vector<2x16x16xf32>
    %534 = arith.mulf %533, %532 : vector<2x16x16xf32>
    %535 = arith.addf %529, %534 : vector<2x16x16xf32>
    %c86 = arith.constant 86 : index
    %536 = memref.load %arg1[%c86] : memref<101xf32, #tpu.memory_space<smem>>
    %c1_369 = arith.constant 1 : index
    %c0_370 = arith.constant 0 : index
    %c4_371 = arith.constant 4 : index
    %c6_372 = arith.constant 6 : index
    %537 = vector.load %arg13[%c1_369, %c0_370, %c4_371, %c6_372] : memref<2x2x22x22xf32, #tpu.memory_space<vmem>>, vector<1x2x16x16xf32>
    %538 = vector.shape_cast %537 : vector<1x2x16x16xf32> to vector<2x16x16xf32>
    %539 = vector.broadcast %536 : f32 to vector<2x16x16xf32>
    %540 = arith.mulf %539, %538 : vector<2x16x16xf32>
    %541 = arith.addf %535, %540 : vector<2x16x16xf32>
    %c87 = arith.constant 87 : index
    %542 = memref.load %arg1[%c87] : memref<101xf32, #tpu.memory_space<smem>>
    %c1_373 = arith.constant 1 : index
    %c0_374 = arith.constant 0 : index
    %c5_375 = arith.constant 5 : index
    %c0_376 = arith.constant 0 : index
    %543 = vector.load %arg13[%c1_373, %c0_374, %c5_375, %c0_376] : memref<2x2x22x22xf32, #tpu.memory_space<vmem>>, vector<1x2x16x16xf32>
    %544 = vector.shape_cast %543 : vector<1x2x16x16xf32> to vector<2x16x16xf32>
    %545 = vector.broadcast %542 : f32 to vector<2x16x16xf32>
    %546 = arith.mulf %545, %544 : vector<2x16x16xf32>
    %547 = arith.addf %541, %546 : vector<2x16x16xf32>
    %c88 = arith.constant 88 : index
    %548 = memref.load %arg1[%c88] : memref<101xf32, #tpu.memory_space<smem>>
    %c1_377 = arith.constant 1 : index
    %c0_378 = arith.constant 0 : index
    %c5_379 = arith.constant 5 : index
    %c1_380 = arith.constant 1 : index
    %549 = vector.load %arg13[%c1_377, %c0_378, %c5_379, %c1_380] : memref<2x2x22x22xf32, #tpu.memory_space<vmem>>, vector<1x2x16x16xf32>
    %550 = vector.shape_cast %549 : vector<1x2x16x16xf32> to vector<2x16x16xf32>
    %551 = vector.broadcast %548 : f32 to vector<2x16x16xf32>
    %552 = arith.mulf %551, %550 : vector<2x16x16xf32>
    %553 = arith.addf %547, %552 : vector<2x16x16xf32>
    %c89 = arith.constant 89 : index
    %554 = memref.load %arg1[%c89] : memref<101xf32, #tpu.memory_space<smem>>
    %c1_381 = arith.constant 1 : index
    %c0_382 = arith.constant 0 : index
    %c5_383 = arith.constant 5 : index
    %c2_384 = arith.constant 2 : index
    %555 = vector.load %arg13[%c1_381, %c0_382, %c5_383, %c2_384] : memref<2x2x22x22xf32, #tpu.memory_space<vmem>>, vector<1x2x16x16xf32>
    %556 = vector.shape_cast %555 : vector<1x2x16x16xf32> to vector<2x16x16xf32>
    %557 = vector.broadcast %554 : f32 to vector<2x16x16xf32>
    %558 = arith.mulf %557, %556 : vector<2x16x16xf32>
    %559 = arith.addf %553, %558 : vector<2x16x16xf32>
    %c90 = arith.constant 90 : index
    %560 = memref.load %arg1[%c90] : memref<101xf32, #tpu.memory_space<smem>>
    %c1_385 = arith.constant 1 : index
    %c0_386 = arith.constant 0 : index
    %c5_387 = arith.constant 5 : index
    %c3_388 = arith.constant 3 : index
    %561 = vector.load %arg13[%c1_385, %c0_386, %c5_387, %c3_388] : memref<2x2x22x22xf32, #tpu.memory_space<vmem>>, vector<1x2x16x16xf32>
    %562 = vector.shape_cast %561 : vector<1x2x16x16xf32> to vector<2x16x16xf32>
    %563 = vector.broadcast %560 : f32 to vector<2x16x16xf32>
    %564 = arith.mulf %563, %562 : vector<2x16x16xf32>
    %565 = arith.addf %559, %564 : vector<2x16x16xf32>
    %c91 = arith.constant 91 : index
    %566 = memref.load %arg1[%c91] : memref<101xf32, #tpu.memory_space<smem>>
    %c1_389 = arith.constant 1 : index
    %c0_390 = arith.constant 0 : index
    %c5_391 = arith.constant 5 : index
    %c4_392 = arith.constant 4 : index
    %567 = vector.load %arg13[%c1_389, %c0_390, %c5_391, %c4_392] : memref<2x2x22x22xf32, #tpu.memory_space<vmem>>, vector<1x2x16x16xf32>
    %568 = vector.shape_cast %567 : vector<1x2x16x16xf32> to vector<2x16x16xf32>
    %569 = vector.broadcast %566 : f32 to vector<2x16x16xf32>
    %570 = arith.mulf %569, %568 : vector<2x16x16xf32>
    %571 = arith.addf %565, %570 : vector<2x16x16xf32>
    %c92 = arith.constant 92 : index
    %572 = memref.load %arg1[%c92] : memref<101xf32, #tpu.memory_space<smem>>
    %c1_393 = arith.constant 1 : index
    %c0_394 = arith.constant 0 : index
    %c5_395 = arith.constant 5 : index
    %c5_396 = arith.constant 5 : index
    %573 = vector.load %arg13[%c1_393, %c0_394, %c5_395, %c5_396] : memref<2x2x22x22xf32, #tpu.memory_space<vmem>>, vector<1x2x16x16xf32>
    %574 = vector.shape_cast %573 : vector<1x2x16x16xf32> to vector<2x16x16xf32>
    %575 = vector.broadcast %572 : f32 to vector<2x16x16xf32>
    %576 = arith.mulf %575, %574 : vector<2x16x16xf32>
    %577 = arith.addf %571, %576 : vector<2x16x16xf32>
    %c93 = arith.constant 93 : index
    %578 = memref.load %arg1[%c93] : memref<101xf32, #tpu.memory_space<smem>>
    %c1_397 = arith.constant 1 : index
    %c0_398 = arith.constant 0 : index
    %c5_399 = arith.constant 5 : index
    %c6_400 = arith.constant 6 : index
    %579 = vector.load %arg13[%c1_397, %c0_398, %c5_399, %c6_400] : memref<2x2x22x22xf32, #tpu.memory_space<vmem>>, vector<1x2x16x16xf32>
    %580 = vector.shape_cast %579 : vector<1x2x16x16xf32> to vector<2x16x16xf32>
    %581 = vector.broadcast %578 : f32 to vector<2x16x16xf32>
    %582 = arith.mulf %581, %580 : vector<2x16x16xf32>
    %583 = arith.addf %577, %582 : vector<2x16x16xf32>
    %c94 = arith.constant 94 : index
    %584 = memref.load %arg1[%c94] : memref<101xf32, #tpu.memory_space<smem>>
    %c1_401 = arith.constant 1 : index
    %c0_402 = arith.constant 0 : index
    %c6_403 = arith.constant 6 : index
    %c0_404 = arith.constant 0 : index
    %585 = vector.load %arg13[%c1_401, %c0_402, %c6_403, %c0_404] : memref<2x2x22x22xf32, #tpu.memory_space<vmem>>, vector<1x2x16x16xf32>
    %586 = vector.shape_cast %585 : vector<1x2x16x16xf32> to vector<2x16x16xf32>
    %587 = vector.broadcast %584 : f32 to vector<2x16x16xf32>
    %588 = arith.mulf %587, %586 : vector<2x16x16xf32>
    %589 = arith.addf %583, %588 : vector<2x16x16xf32>
    %c95 = arith.constant 95 : index
    %590 = memref.load %arg1[%c95] : memref<101xf32, #tpu.memory_space<smem>>
    %c1_405 = arith.constant 1 : index
    %c0_406 = arith.constant 0 : index
    %c6_407 = arith.constant 6 : index
    %c1_408 = arith.constant 1 : index
    %591 = vector.load %arg13[%c1_405, %c0_406, %c6_407, %c1_408] : memref<2x2x22x22xf32, #tpu.memory_space<vmem>>, vector<1x2x16x16xf32>
    %592 = vector.shape_cast %591 : vector<1x2x16x16xf32> to vector<2x16x16xf32>
    %593 = vector.broadcast %590 : f32 to vector<2x16x16xf32>
    %594 = arith.mulf %593, %592 : vector<2x16x16xf32>
    %595 = arith.addf %589, %594 : vector<2x16x16xf32>
    %c96 = arith.constant 96 : index
    %596 = memref.load %arg1[%c96] : memref<101xf32, #tpu.memory_space<smem>>
    %c1_409 = arith.constant 1 : index
    %c0_410 = arith.constant 0 : index
    %c6_411 = arith.constant 6 : index
    %c2_412 = arith.constant 2 : index
    %597 = vector.load %arg13[%c1_409, %c0_410, %c6_411, %c2_412] : memref<2x2x22x22xf32, #tpu.memory_space<vmem>>, vector<1x2x16x16xf32>
    %598 = vector.shape_cast %597 : vector<1x2x16x16xf32> to vector<2x16x16xf32>
    %599 = vector.broadcast %596 : f32 to vector<2x16x16xf32>
    %600 = arith.mulf %599, %598 : vector<2x16x16xf32>
    %601 = arith.addf %595, %600 : vector<2x16x16xf32>
    %c97 = arith.constant 97 : index
    %602 = memref.load %arg1[%c97] : memref<101xf32, #tpu.memory_space<smem>>
    %c1_413 = arith.constant 1 : index
    %c0_414 = arith.constant 0 : index
    %c6_415 = arith.constant 6 : index
    %c3_416 = arith.constant 3 : index
    %603 = vector.load %arg13[%c1_413, %c0_414, %c6_415, %c3_416] : memref<2x2x22x22xf32, #tpu.memory_space<vmem>>, vector<1x2x16x16xf32>
    %604 = vector.shape_cast %603 : vector<1x2x16x16xf32> to vector<2x16x16xf32>
    %605 = vector.broadcast %602 : f32 to vector<2x16x16xf32>
    %606 = arith.mulf %605, %604 : vector<2x16x16xf32>
    %607 = arith.addf %601, %606 : vector<2x16x16xf32>
    %c98 = arith.constant 98 : index
    %608 = memref.load %arg1[%c98] : memref<101xf32, #tpu.memory_space<smem>>
    %c1_417 = arith.constant 1 : index
    %c0_418 = arith.constant 0 : index
    %c6_419 = arith.constant 6 : index
    %c4_420 = arith.constant 4 : index
    %609 = vector.load %arg13[%c1_417, %c0_418, %c6_419, %c4_420] : memref<2x2x22x22xf32, #tpu.memory_space<vmem>>, vector<1x2x16x16xf32>
    %610 = vector.shape_cast %609 : vector<1x2x16x16xf32> to vector<2x16x16xf32>
    %611 = vector.broadcast %608 : f32 to vector<2x16x16xf32>
    %612 = arith.mulf %611, %610 : vector<2x16x16xf32>
    %613 = arith.addf %607, %612 : vector<2x16x16xf32>
    %c99 = arith.constant 99 : index
    %614 = memref.load %arg1[%c99] : memref<101xf32, #tpu.memory_space<smem>>
    %c1_421 = arith.constant 1 : index
    %c0_422 = arith.constant 0 : index
    %c6_423 = arith.constant 6 : index
    %c5_424 = arith.constant 5 : index
    %615 = vector.load %arg13[%c1_421, %c0_422, %c6_423, %c5_424] : memref<2x2x22x22xf32, #tpu.memory_space<vmem>>, vector<1x2x16x16xf32>
    %616 = vector.shape_cast %615 : vector<1x2x16x16xf32> to vector<2x16x16xf32>
    %617 = vector.broadcast %614 : f32 to vector<2x16x16xf32>
    %618 = arith.mulf %617, %616 : vector<2x16x16xf32>
    %619 = arith.addf %613, %618 : vector<2x16x16xf32>
    %c100 = arith.constant 100 : index
    %620 = memref.load %arg1[%c100] : memref<101xf32, #tpu.memory_space<smem>>
    %c1_425 = arith.constant 1 : index
    %c0_426 = arith.constant 0 : index
    %c6_427 = arith.constant 6 : index
    %c6_428 = arith.constant 6 : index
    %621 = vector.load %arg13[%c1_425, %c0_426, %c6_427, %c6_428] : memref<2x2x22x22xf32, #tpu.memory_space<vmem>>, vector<1x2x16x16xf32>
    %622 = vector.shape_cast %621 : vector<1x2x16x16xf32> to vector<2x16x16xf32>
    %623 = vector.broadcast %620 : f32 to vector<2x16x16xf32>
    %624 = arith.mulf %623, %622 : vector<2x16x16xf32>
    %625 = arith.addf %619, %624 : vector<2x16x16xf32>
    %626 = arith.negf %625 : vector<2x16x16xf32>
    %627 = math.exp %626 : vector<2x16x16xf32>
    %cst_429 = arith.constant 1.000000e+00 : f32
    %628 = vector.broadcast %cst_429 : f32 to vector<2x16x16xf32>
    %629 = arith.addf %628, %627 : vector<2x16x16xf32>
    %630 = arith.divf %628, %629 : vector<2x16x16xf32>
    %cst_430 = arith.constant dense<0xFF800000> : vector<2x4x8xf32>
    %631 = vector.multi_reduction <maximumf>, %0, %cst_430 [3] : vector<2x4x8x8xf32> to vector<2x4x8xf32>
    %cst_431 = arith.constant dense<0xFF800000> : vector<2x4xf32>
    %632 = vector.multi_reduction <maximumf>, %631, %cst_431 [2] : vector<2x4x8xf32> to vector<2x4xf32>
    %c0_432 = arith.constant 0 : index
    %c0_433 = arith.constant 0 : index
    %633 = vector.load %arg8[%c0_432, %c0_433] : memref<4x8xf32, #tpu.memory_space<vmem>>, vector<4x8xf32>
    %cst_434 = arith.constant dense<0.000000e+00> : vector<2x8xf32>
    %634 = tpu.matmul %632, %633, %cst_434 {dimension_numbers = #tpu.dot_dimension_numbers<[1], [0], [0], [1], [0, 0, 1, 1], [], []>} : vector<2x4xf32>, vector<4x8xf32>, vector<2x8xf32> -> vector<2x8xf32>
    %c0_435 = arith.constant 0 : index
    %c0_436 = arith.constant 0 : index
    %635 = vector.load %arg9[%c0_435, %c0_436] : memref<1x8xf32, #tpu.memory_space<vmem>>, vector<1x8xf32>
    %636 = vector.broadcast %635 : vector<1x8xf32> to vector<2x8xf32>
    %637 = arith.addf %634, %636 : vector<2x8xf32>
    %cst_437 = arith.constant 0.000000e+00 : f32
    %638 = vector.broadcast %cst_437 : f32 to vector<2x8xf32>
    %639 = arith.maximumf %637, %638 : vector<2x8xf32>
    %c0_438 = arith.constant 0 : index
    %c0_439 = arith.constant 0 : index
    %640 = vector.load %arg10[%c0_438, %c0_439] : memref<8x8xf32, #tpu.memory_space<vmem>>, vector<8x8xf32>
    %cst_440 = arith.constant dense<0.000000e+00> : vector<2x8xf32>
    %641 = tpu.matmul %639, %640, %cst_440 {dimension_numbers = #tpu.dot_dimension_numbers<[1], [0], [0], [1], [0, 0, 1, 1], [], []>} : vector<2x8xf32>, vector<8x8xf32>, vector<2x8xf32> -> vector<2x8xf32>
    %c0_441 = arith.constant 0 : index
    %c0_442 = arith.constant 0 : index
    %642 = vector.load %arg11[%c0_441, %c0_442] : memref<1x8xf32, #tpu.memory_space<vmem>>, vector<1x8xf32>
    %643 = vector.broadcast %642 : vector<1x8xf32> to vector<2x8xf32>
    %644 = arith.addf %641, %643 : vector<2x8xf32>
    %645 = arith.negf %644 : vector<2x8xf32>
    %646 = math.exp %645 : vector<2x8xf32>
    %cst_443 = arith.constant 1.000000e+00 : f32
    %647 = vector.broadcast %cst_443 : f32 to vector<2x8xf32>
    %648 = arith.addf %647, %646 : vector<2x8xf32>
    %649 = arith.divf %647, %648 : vector<2x8xf32>
    %650 = vector.extract_strided_slice %649 {offsets = [0, 0], sizes = [1, 1], strides = [1, 1]} : vector<2x8xf32> to vector<1x1xf32>
    %651 = vector.extract_strided_slice %630 {offsets = [0, 0, 0], sizes = [1, 16, 16], strides = [1, 1, 1]} : vector<2x16x16xf32> to vector<1x16x16xf32>
    %652 = vector.shape_cast %651 : vector<1x16x16xf32> to vector<16x16xf32>
    %653 = vector.broadcast %650 : vector<1x1xf32> to vector<16x16xf32>
    %654 = arith.mulf %653, %652 : vector<16x16xf32>
    %655 = vector.extract_strided_slice %649 {offsets = [0, 1], sizes = [1, 1], strides = [1, 1]} : vector<2x8xf32> to vector<1x1xf32>
    %656 = vector.extract_strided_slice %630 {offsets = [0, 0, 0], sizes = [1, 16, 16], strides = [1, 1, 1]} : vector<2x16x16xf32> to vector<1x16x16xf32>
    %657 = vector.shape_cast %656 : vector<1x16x16xf32> to vector<16x16xf32>
    %658 = vector.broadcast %655 : vector<1x1xf32> to vector<16x16xf32>
    %659 = arith.mulf %658, %657 : vector<16x16xf32>
    %660 = vector.extract_strided_slice %649 {offsets = [0, 2], sizes = [1, 1], strides = [1, 1]} : vector<2x8xf32> to vector<1x1xf32>
    %661 = vector.extract_strided_slice %630 {offsets = [0, 0, 0], sizes = [1, 16, 16], strides = [1, 1, 1]} : vector<2x16x16xf32> to vector<1x16x16xf32>
    %662 = vector.shape_cast %661 : vector<1x16x16xf32> to vector<16x16xf32>
    %663 = vector.broadcast %660 : vector<1x1xf32> to vector<16x16xf32>
    %664 = arith.mulf %663, %662 : vector<16x16xf32>
    %665 = vector.extract_strided_slice %649 {offsets = [0, 3], sizes = [1, 1], strides = [1, 1]} : vector<2x8xf32> to vector<1x1xf32>
    %666 = vector.extract_strided_slice %630 {offsets = [0, 0, 0], sizes = [1, 16, 16], strides = [1, 1, 1]} : vector<2x16x16xf32> to vector<1x16x16xf32>
    %667 = vector.shape_cast %666 : vector<1x16x16xf32> to vector<16x16xf32>
    %668 = vector.broadcast %665 : vector<1x1xf32> to vector<16x16xf32>
    %669 = arith.mulf %668, %667 : vector<16x16xf32>
    %670 = vector.extract_strided_slice %649 {offsets = [0, 4], sizes = [1, 1], strides = [1, 1]} : vector<2x8xf32> to vector<1x1xf32>
    %671 = vector.extract_strided_slice %630 {offsets = [0, 0, 0], sizes = [1, 16, 16], strides = [1, 1, 1]} : vector<2x16x16xf32> to vector<1x16x16xf32>
    %672 = vector.shape_cast %671 : vector<1x16x16xf32> to vector<16x16xf32>
    %673 = vector.broadcast %670 : vector<1x1xf32> to vector<16x16xf32>
    %674 = arith.mulf %673, %672 : vector<16x16xf32>
    %675 = vector.extract_strided_slice %649 {offsets = [0, 5], sizes = [1, 1], strides = [1, 1]} : vector<2x8xf32> to vector<1x1xf32>
    %676 = vector.extract_strided_slice %630 {offsets = [0, 0, 0], sizes = [1, 16, 16], strides = [1, 1, 1]} : vector<2x16x16xf32> to vector<1x16x16xf32>
    %677 = vector.shape_cast %676 : vector<1x16x16xf32> to vector<16x16xf32>
    %678 = vector.broadcast %675 : vector<1x1xf32> to vector<16x16xf32>
    %679 = arith.mulf %678, %677 : vector<16x16xf32>
    %680 = vector.extract_strided_slice %649 {offsets = [0, 6], sizes = [1, 1], strides = [1, 1]} : vector<2x8xf32> to vector<1x1xf32>
    %681 = vector.extract_strided_slice %630 {offsets = [0, 0, 0], sizes = [1, 16, 16], strides = [1, 1, 1]} : vector<2x16x16xf32> to vector<1x16x16xf32>
    %682 = vector.shape_cast %681 : vector<1x16x16xf32> to vector<16x16xf32>
    %683 = vector.broadcast %680 : vector<1x1xf32> to vector<16x16xf32>
    %684 = arith.mulf %683, %682 : vector<16x16xf32>
    %685 = vector.extract_strided_slice %649 {offsets = [0, 7], sizes = [1, 1], strides = [1, 1]} : vector<2x8xf32> to vector<1x1xf32>
    %686 = vector.extract_strided_slice %630 {offsets = [0, 0, 0], sizes = [1, 16, 16], strides = [1, 1, 1]} : vector<2x16x16xf32> to vector<1x16x16xf32>
    %687 = vector.shape_cast %686 : vector<1x16x16xf32> to vector<16x16xf32>
    %688 = vector.broadcast %685 : vector<1x1xf32> to vector<16x16xf32>
    %689 = arith.mulf %688, %687 : vector<16x16xf32>
    %690 = vector.shape_cast %654 : vector<16x16xf32> to vector<1x16x16xf32>
    %691 = vector.shape_cast %659 : vector<16x16xf32> to vector<1x16x16xf32>
    %692 = vector.shape_cast %664 : vector<16x16xf32> to vector<1x16x16xf32>
    %693 = vector.shape_cast %669 : vector<16x16xf32> to vector<1x16x16xf32>
    %694 = vector.shape_cast %674 : vector<16x16xf32> to vector<1x16x16xf32>
    %695 = vector.shape_cast %679 : vector<16x16xf32> to vector<1x16x16xf32>
    %696 = vector.shape_cast %684 : vector<16x16xf32> to vector<1x16x16xf32>
    %697 = vector.shape_cast %689 : vector<16x16xf32> to vector<1x16x16xf32>
    %698 = tpu.concatenate %690, %691, %692, %693, %694, %695, %696, %697 in 0 : vector<1x16x16xf32>, vector<1x16x16xf32>, vector<1x16x16xf32>, vector<1x16x16xf32>, vector<1x16x16xf32>, vector<1x16x16xf32>, vector<1x16x16xf32>, vector<1x16x16xf32> -> vector<8x16x16xf32>
    %699 = vector.extract_strided_slice %649 {offsets = [1, 0], sizes = [1, 1], strides = [1, 1]} : vector<2x8xf32> to vector<1x1xf32>
    %700 = vector.extract_strided_slice %630 {offsets = [1, 0, 0], sizes = [1, 16, 16], strides = [1, 1, 1]} : vector<2x16x16xf32> to vector<1x16x16xf32>
    %701 = vector.shape_cast %700 : vector<1x16x16xf32> to vector<16x16xf32>
    %702 = vector.broadcast %699 : vector<1x1xf32> to vector<16x16xf32>
    %703 = arith.mulf %702, %701 : vector<16x16xf32>
    %704 = vector.extract_strided_slice %649 {offsets = [1, 1], sizes = [1, 1], strides = [1, 1]} : vector<2x8xf32> to vector<1x1xf32>
    %705 = vector.extract_strided_slice %630 {offsets = [1, 0, 0], sizes = [1, 16, 16], strides = [1, 1, 1]} : vector<2x16x16xf32> to vector<1x16x16xf32>
    %706 = vector.shape_cast %705 : vector<1x16x16xf32> to vector<16x16xf32>
    %707 = vector.broadcast %704 : vector<1x1xf32> to vector<16x16xf32>
    %708 = arith.mulf %707, %706 : vector<16x16xf32>
    %709 = vector.extract_strided_slice %649 {offsets = [1, 2], sizes = [1, 1], strides = [1, 1]} : vector<2x8xf32> to vector<1x1xf32>
    %710 = vector.extract_strided_slice %630 {offsets = [1, 0, 0], sizes = [1, 16, 16], strides = [1, 1, 1]} : vector<2x16x16xf32> to vector<1x16x16xf32>
    %711 = vector.shape_cast %710 : vector<1x16x16xf32> to vector<16x16xf32>
    %712 = vector.broadcast %709 : vector<1x1xf32> to vector<16x16xf32>
    %713 = arith.mulf %712, %711 : vector<16x16xf32>
    %714 = vector.extract_strided_slice %649 {offsets = [1, 3], sizes = [1, 1], strides = [1, 1]} : vector<2x8xf32> to vector<1x1xf32>
    %715 = vector.extract_strided_slice %630 {offsets = [1, 0, 0], sizes = [1, 16, 16], strides = [1, 1, 1]} : vector<2x16x16xf32> to vector<1x16x16xf32>
    %716 = vector.shape_cast %715 : vector<1x16x16xf32> to vector<16x16xf32>
    %717 = vector.broadcast %714 : vector<1x1xf32> to vector<16x16xf32>
    %718 = arith.mulf %717, %716 : vector<16x16xf32>
    %719 = vector.extract_strided_slice %649 {offsets = [1, 4], sizes = [1, 1], strides = [1, 1]} : vector<2x8xf32> to vector<1x1xf32>
    %720 = vector.extract_strided_slice %630 {offsets = [1, 0, 0], sizes = [1, 16, 16], strides = [1, 1, 1]} : vector<2x16x16xf32> to vector<1x16x16xf32>
    %721 = vector.shape_cast %720 : vector<1x16x16xf32> to vector<16x16xf32>
    %722 = vector.broadcast %719 : vector<1x1xf32> to vector<16x16xf32>
    %723 = arith.mulf %722, %721 : vector<16x16xf32>
    %724 = vector.extract_strided_slice %649 {offsets = [1, 5], sizes = [1, 1], strides = [1, 1]} : vector<2x8xf32> to vector<1x1xf32>
    %725 = vector.extract_strided_slice %630 {offsets = [1, 0, 0], sizes = [1, 16, 16], strides = [1, 1, 1]} : vector<2x16x16xf32> to vector<1x16x16xf32>
    %726 = vector.shape_cast %725 : vector<1x16x16xf32> to vector<16x16xf32>
    %727 = vector.broadcast %724 : vector<1x1xf32> to vector<16x16xf32>
    %728 = arith.mulf %727, %726 : vector<16x16xf32>
    %729 = vector.extract_strided_slice %649 {offsets = [1, 6], sizes = [1, 1], strides = [1, 1]} : vector<2x8xf32> to vector<1x1xf32>
    %730 = vector.extract_strided_slice %630 {offsets = [1, 0, 0], sizes = [1, 16, 16], strides = [1, 1, 1]} : vector<2x16x16xf32> to vector<1x16x16xf32>
    %731 = vector.shape_cast %730 : vector<1x16x16xf32> to vector<16x16xf32>
    %732 = vector.broadcast %729 : vector<1x1xf32> to vector<16x16xf32>
    %733 = arith.mulf %732, %731 : vector<16x16xf32>
    %734 = vector.extract_strided_slice %649 {offsets = [1, 7], sizes = [1, 1], strides = [1, 1]} : vector<2x8xf32> to vector<1x1xf32>
    %735 = vector.extract_strided_slice %630 {offsets = [1, 0, 0], sizes = [1, 16, 16], strides = [1, 1, 1]} : vector<2x16x16xf32> to vector<1x16x16xf32>
    %736 = vector.shape_cast %735 : vector<1x16x16xf32> to vector<16x16xf32>
    %737 = vector.broadcast %734 : vector<1x1xf32> to vector<16x16xf32>
    %738 = arith.mulf %737, %736 : vector<16x16xf32>
    %739 = vector.shape_cast %703 : vector<16x16xf32> to vector<1x16x16xf32>
    %740 = vector.shape_cast %708 : vector<16x16xf32> to vector<1x16x16xf32>
    %741 = vector.shape_cast %713 : vector<16x16xf32> to vector<1x16x16xf32>
    %742 = vector.shape_cast %718 : vector<16x16xf32> to vector<1x16x16xf32>
    %743 = vector.shape_cast %723 : vector<16x16xf32> to vector<1x16x16xf32>
    %744 = vector.shape_cast %728 : vector<16x16xf32> to vector<1x16x16xf32>
    %745 = vector.shape_cast %733 : vector<16x16xf32> to vector<1x16x16xf32>
    %746 = vector.shape_cast %738 : vector<16x16xf32> to vector<1x16x16xf32>
    %747 = tpu.concatenate %739, %740, %741, %742, %743, %744, %745, %746 in 0 : vector<1x16x16xf32>, vector<1x16x16xf32>, vector<1x16x16xf32>, vector<1x16x16xf32>, vector<1x16x16xf32>, vector<1x16x16xf32>, vector<1x16x16xf32>, vector<1x16x16xf32> -> vector<8x16x16xf32>
    %748 = vector.shape_cast %698 : vector<8x16x16xf32> to vector<1x8x16x16xf32>
    %749 = vector.shape_cast %747 : vector<8x16x16xf32> to vector<1x8x16x16xf32>
    %750 = tpu.concatenate %748, %749 in 0 : vector<1x8x16x16xf32>, vector<1x8x16x16xf32> -> vector<2x8x16x16xf32>
    %c0_444 = arith.constant 0 : index
    %c0_445 = arith.constant 0 : index
    %c0_446 = arith.constant 0 : index
    %c0_447 = arith.constant 0 : index
    %751 = vector.load %arg12[%c0_444, %c0_445, %c0_446, %c0_447] : memref<2x8x16x16xf32, #tpu.memory_space<vmem>>, vector<2x8x16x16xf32>
    tpu.vector_store %arg12[%c0_444, %c0_445, %c0_446, %c0_447], %750 {strides = array<i32>} : memref<2x8x16x16xf32, #tpu.memory_space<vmem>>, vector<2x8x16x16xf32>,
    return
  }
  func.func @transform_0(%arg0: i32) -> i32 {
    %c0_i32 = arith.constant 0 : i32
    %c0_i32_0 = arith.constant 0 : i32
    return %c0_i32 : i32
  }
  func.func @transform_1(%arg0: i32) -> (i32, i32, i32, i32) {
    %c0_i32 = arith.constant 0 : i32
    %c0_i32_0 = arith.constant 0 : i32
    %c0_i32_1 = arith.constant 0 : i32
    %c0_i32_2 = arith.constant 0 : i32
    return %arg0, %c0_i32, %c0_i32_0, %c0_i32_1 : i32, i32, i32, i32
  }
  func.func @transform_2(%arg0: i32) -> (i32, i32, i32, i32) {
    %c0_i32 = arith.constant 0 : i32
    %c0_i32_0 = arith.constant 0 : i32
    %c0_i32_1 = arith.constant 0 : i32
    %c0_i32_2 = arith.constant 0 : i32
    return %arg0, %c0_i32, %c0_i32_0, %c0_i32_1 : i32, i32, i32, i32
  }
  func.func @transform_3(%arg0: i32) -> (i32, i32, i32, i32) {
    %c0_i32 = arith.constant 0 : i32
    %c0_i32_0 = arith.constant 0 : i32
    %c0_i32_1 = arith.constant 0 : i32
    %c0_i32_2 = arith.constant 0 : i32
    %c0_i32_3 = arith.constant 0 : i32
    return %c0_i32, %c0_i32_0, %c0_i32_1, %c0_i32_2 : i32, i32, i32, i32
  }
  func.func @transform_4(%arg0: i32) -> (i32, i32, i32, i32) {
    %c0_i32 = arith.constant 0 : i32
    %c0_i32_0 = arith.constant 0 : i32
    %c0_i32_1 = arith.constant 0 : i32
    %c0_i32_2 = arith.constant 0 : i32
    %c0_i32_3 = arith.constant 0 : i32
    return %c0_i32, %c0_i32_0, %c0_i32_1, %c0_i32_2 : i32, i32, i32, i32
  }
  func.func @transform_5(%arg0: i32) -> (i32, i32) {
    %c0_i32 = arith.constant 0 : i32
    %c0_i32_0 = arith.constant 0 : i32
    %c0_i32_1 = arith.constant 0 : i32
    return %c0_i32, %c0_i32_0 : i32, i32
  }
  func.func @transform_6(%arg0: i32) -> (i32, i32) {
    %c0_i32 = arith.constant 0 : i32
    %c0_i32_0 = arith.constant 0 : i32
    %c0_i32_1 = arith.constant 0 : i32
    return %c0_i32, %c0_i32_0 : i32, i32
  }
  func.func @transform_7(%arg0: i32) -> (i32, i32) {
    %c0_i32 = arith.constant 0 : i32
    %c0_i32_0 = arith.constant 0 : i32
    %c0_i32_1 = arith.constant 0 : i32
    return %c0_i32, %c0_i32_0 : i32, i32
  }
  func.func @transform_8(%arg0: i32) -> (i32, i32) {
    %c0_i32 = arith.constant 0 : i32
    %c0_i32_0 = arith.constant 0 : i32
    %c0_i32_1 = arith.constant 0 : i32
    return %c0_i32, %c0_i32_0 : i32, i32
  }
  func.func @transform_9(%arg0: i32) -> (i32, i32) {
    %c0_i32 = arith.constant 0 : i32
    %c0_i32_0 = arith.constant 0 : i32
    %c0_i32_1 = arith.constant 0 : i32
    return %c0_i32, %c0_i32_0 : i32, i32
  }
  func.func @transform_10(%arg0: i32) -> (i32, i32) {
    %c0_i32 = arith.constant 0 : i32
    %c0_i32_0 = arith.constant 0 : i32
    %c0_i32_1 = arith.constant 0 : i32
    return %c0_i32, %c0_i32_0 : i32, i32
  }
  func.func @transform_11(%arg0: i32) -> (i32, i32, i32, i32) {
    %c0_i32 = arith.constant 0 : i32
    %c0_i32_0 = arith.constant 0 : i32
    %c0_i32_1 = arith.constant 0 : i32
    %c0_i32_2 = arith.constant 0 : i32
    return %arg0, %c0_i32, %c0_i32_0, %c0_i32_1 : i32, i32, i32, i32
  }
}

</mosaic_0001>

<bundles_post_ra>
// kernel: tpu_custom_call.1
= control target key start
LH: loop header
LB: loop body
LE: loop exit
PB: predicated region body
PF: predicated region fallthrough
CT: control target
= control target key end

     0   :  { %16 = vsyncpa [#allocation6], 0  ;;  %s6487_s0 = inlined_call_operand.vmem [shape: f32[101], index: 0, kind: input, shape index: {}]   ;;  %s6488_s1 = inlined_call_operand.hbm [shape: f32[2,4,8,8], index: 1, kind: input, shape index: {}]   ;;  %s6489_s2 = inlined_call_operand.hbm [shape: f32[2,8,16,16], index: 2, kind: input, shape index: {}]   ;;  %s6490_s3 = inlined_call_operand.vmem [shape: f32[1,4,1,1], index: 3, kind: input, shape index: {}]   ;;  %s6491_s4 = inlined_call_operand.vmem [shape: f32[1,8,1,1], index: 4, kind: input, shape index: {}]   ;;  %s6492_s5 = inlined_call_operand.vmem [shape: f32[16,8], index: 5, kind: input, shape index: {}]   ;;  %s6493_s6 = inlined_call_operand.vmem [shape: f32[8,16], index: 6, kind: input, shape index: {}]   ;;  %s6494_s7 = inlined_call_operand.vmem [shape: f32[4,8], index: 7, kind: input, shape index: {}]   ;;  %s6495_s8 = inlined_call_operand.vmem [shape: f32[1,8], index: 8, kind: input, shape index: {}]   ;;  %s6496_s9 = inlined_call_operand.vmem [shape: f32[8,8], index: 9, kind: input, shape index: {}]   ;;  %s6497_s10 = inlined_call_operand.vmem [shape: f32[1,8], index: 10, kind: input, shape index: {}]   ;;  %s6498_s11 = inlined_call_operand.hbm [shape: f32[2,8,16,16], index: 11, kind: output, shape index: {}]  }
   0x1   :  { %17 = vsyncpa [#allocation4], 0 }
   0x2   :  { %18 = vsyncpa [#allocation9], 0 }
   0x3   :  { %19 = vsyncpa [#allocation5], 0  ;;  %s26_s19 = sshll.u32 %s6487_s0, 4  ;;  %s27_s19 = int_to_ptr.vmem [resolvable:$true] %s26_s19 }
   0x4   :  { %s3864_s20 = scalar_lea.vmem %s27_s19, 16  ;;  %p3869_p1 = scmp.lt.s32.totalorder %s27_s19, %s27_s19 }
   0x5   :  { %p3865_p0 = scmp.ne.s32.totalorder %s27_s19, %s3864_s20  ;;  %p3870_p2 = scmp.lt.s32.totalorder %s3864_s20, %s3864_s20 }
   0x7   :  { %p3871_p3 = por %p3870_p2, %p3869_p1 }
   0x9   :  { %p3872_p4 = pnand %p3871_p3, %p3865_p0 }
   0xb   :  { %3875 = shalt.err (!%p3872_p4)
}
   0xc   :  { %s3950_s21 = smov [#allocation3]   ;;  %s3951_s22 = smov [#allocation7]  }
   0xd   :  { %29 = dma.vmem_to_smem %s27_s19, 16, %s3950_s21, [#allocation6]  }
   0xe   :  { %s35_s23 = sshll.u32 %s3951_s22, 4  ;;  %s3876_s26 = scalar_lea.hbm %s6488_s1, 1024  ;;  %s36_s23 = int_to_ptr.vmem [resolvable:$true] %s35_s23 }
   0xf   :  { %p3877_p5 = scmp.ne.s32.totalorder %s6488_s1, %s3876_s26  ;;  %p3880_p6 = scmp.lt.u32.totalorder %s3876_s26, %s6488_s1 }
  0x11   :  { %p3882_p7 = pnand %p3880_p6, %p3877_p5 }
  0x13   :  { %3885 = shalt.err (!%p3882_p7)
}
  0x14   :  { %s3886_s30 = scalar_lea.vmem %s36_s23, 1024  ;;  %p3891_p9 = scmp.lt.s32.totalorder %s36_s23, %s36_s23 }
  0x15   :  { %p3887_p8 = scmp.ne.s32.totalorder %s36_s23, %s3886_s30  ;;  %p3892_p10 = scmp.lt.s32.totalorder %s3886_s30, %s3886_s30 }
  0x17   :  { %p3893_p11 = por %p3892_p10, %p3891_p9 }
  0x19   :  { %p3894_p12 = pnand %p3893_p11, %p3887_p8 }
  0x1b   :  { %3897 = shalt.err (!%p3894_p12)
}
  0x1c   :  { %s3952_s12 = smov 128   ;;  %s3953_s13 = smov 8  }
  0x1d   :  { %41 = dma.hbm_to_vmem [thread:$0]  %s6488_s1, 1024, %s36_s23, [#allocation4], %s3952_s12, %s3952_s12, %s3953_s13  }
  0x1e   :  { %s3954_s16 = smov [#allocation8]   ;;  %s3898_s20 = scalar_lea.hbm %s6489_s2, 4096 }
  0x1f   :  { %s47_s17 = sshll.u32 %s3954_s16, 4  ;;  %p3899_p13 = scmp.ne.s32.totalorder %s6489_s2, %s3898_s20  ;;  %s48_s17 = int_to_ptr.vmem [resolvable:$true] %s47_s17 }
  0x20   :  { %p3902_p0 = scmp.lt.u32.totalorder %s3898_s20, %s6489_s2 }
  0x22   :  { %p3904_p1 = pnand %p3902_p0, %p3899_p13 }
  0x24   :  { %3907 = shalt.err (!%p3904_p1)
}
  0x25   :  { %s3908_s26 = scalar_lea.vmem %s48_s17, 4096  ;;  %p3913_p3 = scmp.lt.s32.totalorder %s48_s17, %s48_s17 }
  0x26   :  { %p3909_p2 = scmp.ne.s32.totalorder %s48_s17, %s3908_s26  ;;  %p3914_p4 = scmp.lt.s32.totalorder %s3908_s26, %s3908_s26 }
  0x28   :  { %p3915_p5 = por %p3914_p4, %p3913_p3 }
  0x2a   :  { %p3916_p6 = pnand %p3915_p5, %p3909_p2 }
  0x2c   :  { %3919 = shalt.err (!%p3916_p6)
}
  0x2d   :  { %53 = dma.hbm_to_vmem [thread:$0]  %s6489_s2, 4096, %s48_s17, [#allocation9], %s3952_s12, %s3952_s12, %s3953_s13  }
  0x2e   :  { %3942 = dma.done.wait [#allocation6], 16  }
  0x2f   :  { %3943 = vsyncadd [#allocation6], 4294967280 }
  0x30   :  { %3944 = dma.done.wait [#allocation4], 1024  }
  0x31   :  { %3945 = vsyncadd [#allocation4], 4294966272 }
  0x32   :  { %3946 = dma.done.wait [#allocation9], 4096  }
  0x33   :  { %3947 = vsyncadd [#allocation9], 4294963200 }
  0x34   :  { %79 = sfence }
  0x35   :  { %v3581_v0 = vld [vmem:[%s6490_s3 + $0x2] ss:$0 sm:$0xff]  ;;  %v3579_v1 = vld [vmem:[%s6490_s3] ss:$0 sm:$0xff]  ;;  %v3955_v2 = vmov 0   ;;  %vm168_vm0 = vcmask 64512  }
  0x36   :  { %3805 = vset.pattern.permute.xlu1 %v3955_v2  ;;  %3804 = vset.pattern.permute.xlu0 %v3955_v2  ;;  %v3582_v3 = vld [vmem:[%s6490_s3 + $0x3] ss:$0 sm:$0xff]  ;;  %v3580_v4 = vld [vmem:[%s6490_s3 + $0x1] ss:$0 sm:$0xff]  ;;  %v3583_v6 = vld [vmem:[%s6491_s4] ss:$0 sm:$0xff] }
  0x37   :  { %153 = vperm.xlu1 %3805, %v3581_v0   ;;  %145 = vperm.xlu0 %3804, %v3579_v1   ;;  %v3584_v5 = vld [vmem:[%s6491_s4 + $0x1] ss:$0 sm:$0xff]  ;;  %v3586_v7 = vld [vmem:[%s6491_s4 + $0x3] ss:$0 sm:$0xff]  ;;  %v3585_v8 = vld [vmem:[%s6491_s4 + $0x2] ss:$0 sm:$0xff] }
  0x38   :  { %v3588_v9 = vld [vmem:[%s6491_s4 + $0x5] ss:$0 sm:$0xff]  ;;  %v3587_v10 = vld [vmem:[%s6491_s4 + $0x4] ss:$0 sm:$0xff]  ;;  %v3590_v11 = vld [vmem:[%s6491_s4 + $0x7] ss:$0 sm:$0xff] }
  0x39   :  { %v3589_v12 = vld [vmem:[%s6491_s4 + $0x6] ss:$0 sm:$0xff]  ;;  %v81_v17 = vld [vmem:[#allocation7 + $0x8] sm:$0xff]  ;;  %v82_v21 = vld [vmem:[#allocation7 + $0x10] sm:$0xff]  ;;  %vm687_vm1 = vcmask 179200   ;;  %vm690_vm2 = vcmask 177152  }
  0x3a   :  { %v366_v13 = vld [vmem:[%s6492_s5] sm:$0xff]  ;;  %v3153_v19 = vsel %vm168_vm0, %v81_v17, -inf  ;;  %v85_v20 = vld [vmem:[#allocation7 + $0x28] sm:$0xff]  ;;  %v3156_v23 = vsel %vm168_vm0, %v82_v21, -inf  ;;  %v86_v24 = vld [vmem:[#allocation7 + $0x30] sm:$0xff]  ;;  %v3956_v30 = vmov 0.0  }
  0x3b   :  { %157 = vperm.xlu1 %3805, %v3582_v3   ;;  %149 = vperm.xlu0 %3804, %v3580_v4   ;;  %v80_v14 = vld [vmem:[#allocation7] sm:$0xff]  ;;  %v3165_v22 = vsel %vm168_vm0, %v85_v20, -inf  ;;  %v83_v25 = vld [vmem:[#allocation7 + $0x18] sm:$0xff]  ;;  %v3168_v26 = vsel %vm168_vm0, %v86_v24, -inf  ;;  %696 = vst.msk [vmem:[#allocation2 + $0x38] sm:$0xff] %vm687_vm1, %v3956_v30  ;;  %688 = vst.msk [vmem:[#allocation2] sm:$0xff] %vm687_vm1, %v3956_v30 }
  0x3c   :  { %3727 = vmatprep.mubr.msk.f32.mxu0 %vm168_vm0, %v366_v13  ;;  %3732 = vmatprep.mubr.msk.f32.mxu1 %vm168_vm0, %v366_v13  ;;  %v3150_v15 = vsel %vm168_vm0, %v80_v14, -inf  ;;  %v84_v16 = vld [vmem:[#allocation7 + $0x20] sm:$0xff]  ;;  %v3159_v27 = vsel %vm168_vm0, %v83_v25, -inf  ;;  %v87_v28 = vld [vmem:[#allocation7 + $0x38] sm:$0xff]  ;;  %697 = vst.msk [vmem:[#allocation2 + $0x40] sm:$0x3f] %vm690_vm2, %v3956_v30 }
  0x3d   :  { %v3162_v18 = vsel %vm168_vm0, %v84_v16, -inf  ;;  %v3171_v29 = vsel %vm168_vm0, %v87_v28, -inf  ;;  %689 = vst.msk [vmem:[#allocation2 + $0x8] sm:$0xff] %vm687_vm1, %v3956_v30  ;;  %692 = vst.msk [vmem:[#allocation2 + $0x18] sm:$0xff] %vm687_vm1, %v3956_v30  ;;  %s4121_s4 = sld [smem:[#allocation3]]  ;;  %s3591_s30 = sld [smem:[#allocation3 + $0x1]] }
  0x3e   :  { %691 = vst.msk [vmem:[#allocation2 + $0x10] sm:$0x3f] %vm690_vm2, %v3956_v30  ;;  %694 = vst.msk [vmem:[#allocation2 + $0x28] sm:$0x3f] %vm690_vm2, %v3956_v30  ;;  %v90_v42 = vld [vmem:[#allocation8 + $0x10] sm:$0xff]  ;;  %v91_v43 = vld [vmem:[#allocation8 + $0x18] sm:$0xff] }
  0x3f   :  { %240 = vperm.xlu1 %3805, %v3584_v5   ;;  %236 = vperm.xlu0 %3804, %v3583_v6   ;;  %693 = vst.msk [vmem:[#allocation2 + $0x20] sm:$0xff] %vm687_vm1, %v3956_v30  ;;  %695 = vst.msk [vmem:[#allocation2 + $0x30] sm:$0xff] %vm687_vm1, %v3956_v30  ;;  %vm299_vm3 = vcmask 130048   ;;  %v106_v44 = vld [vmem:[#allocation8 + $0x90] sm:$0xff]  ;;  %v107_v45 = vld [vmem:[#allocation8 + $0x98] sm:$0xff]  ;;  %vm3216_vm4 = vcmask 1041409  }
  0x40   :  { %698 = vst.msk [vmem:[#allocation2 + $0x48] sm:$0xff] %vm687_vm1, %v3956_v30  ;;  %699 = vst.msk [vmem:[#allocation2 + $0x50] sm:$0xff] %vm687_vm1, %v3956_v30  ;;  %v88_v46 = vld [vmem:[#allocation8] sm:$0xff]  ;;  %v89_v53 = vld [vmem:[#allocation8 + $0x8] sm:$0xff]  ;;  %vm3218_vm5 = vcmask 1042434   ;;  %vm3220_vm6 = vcmask 1043459  }
  0x41   :  { %700 = vst.msk [vmem:[#allocation2 + $0x58] sm:$0x3f] %vm690_vm2, %v3956_v30  ;;  %v104_v54 = vld [vmem:[#allocation8 + $0x80] sm:$0xff]  ;;  %v105_v55 = vld [vmem:[#allocation8 + $0x88] sm:$0xff]  ;;  %v94_v6 = vld [vmem:[#allocation8 + $0x30] sm:$0xff]  ;;  %vm3227_vm7 = vcmask 60416  }
  0x42   :  { %vm717_vm8 = vcmask 154648   ;;  %s3651_s18 = sld [smem:[#allocation3 + $0x35]]  ;;  %s3958_s19 = smov 127   ;;  %vm3256_vm9 = vcmask 1043456   ;;  %vm3253_vm10 = vcmask 31744   ;;  %vm3964_vm11 = vmmov 0  }
  0x43   :  { %248 = vperm.xlu1 %3805, %v3586_v7   ;;  %244 = vperm.xlu0 %3804, %v3585_v8   ;;  %v184_v47 = vstv %s4121_s4  ;;  %v4124_v48 = vstv %s3591_s30  ;;  %s3653_s20 = sld [smem:[#allocation3 + $0x37]]  ;;  %s3959_s21 = smov 126  }
  0x44   :  { %s3654_s22 = sld [smem:[#allocation3 + $0x38]]  ;;  %s3960_s24 = smov 125  }
  0x45   :  { %s3681_s3 = sld [smem:[#allocation3 + $0x53]]  ;;  %s3655_s25 = sld [smem:[#allocation3 + $0x39]] }
  0x46   :  { %s3961_s26 = smov 124   ;;  %s3656_s1 = sld [smem:[#allocation3 + $0x3a]] }
  0x47   :  { %256 = vperm.xlu1 %3805, %v3588_v9   ;;  %252 = vperm.xlu0 %3804, %v3587_v10   ;;  %v95_v10 = vld [vmem:[#allocation8 + $0x38] sm:$0xff]  ;;  %s3962_s23 = smov 123   ;;  %s3658_s27 = sld [smem:[#allocation3 + $0x3c]] }
  0x48   :  { %s3963_s28 = smov 122   ;;  %s3659_s0 = sld [smem:[#allocation3 + $0x3d]] }
  0x49   :  { %s3660_s29 = sld [smem:[#allocation3 + $0x3e]]  ;;  %s3661_s2 = sld [smem:[#allocation3 + $0x3f]] }
  0x4a   :  { %s3662_s4 = sld [smem:[#allocation3 + $0x40]]  ;;  %s3663_s30 = sld [smem:[#allocation3 + $0x41]] }
  0x4b   :  { %264 = vperm.xlu1 %3805, %v3590_v11   ;;  %260 = vperm.xlu0 %3804, %v3589_v12   ;;  %v110_v11 = vld [vmem:[#allocation8 + $0xb0] sm:$0xff]  ;;  %v92_v12 = vld [vmem:[#allocation8 + $0x20] sm:$0xff]  ;;  %s3665_s16 = sld [smem:[#allocation3 + $0x43]]  ;;  %s3667_s17 = sld [smem:[#allocation3 + $0x45]] }
  0x4c   :  { %s3624_s15 = sld [smem:[#allocation3 + $0x1a]]  ;;  %s3613_s14 = sld [smem:[#allocation3 + $0xf]] }
  0x6a   :  { %3151 = vmax.xlane.f32.xlu0 %v3150_v15 }
  0x6e   :  { %3163 = vmax.xlane.f32.xlu0 %v3162_v18 }
  0x6f   :  { %3154 = vmax.xlane.f32.xlu1 %v3153_v19 }
  0x72   :  { %3166 = vmax.xlane.f32.xlu0 %v3165_v22  ;;  %v109_v22 = vld [vmem:[#allocation8 + $0xa8] sm:$0xff] }
  0x73   :  { %3157 = vmax.xlane.f32.xlu1 %v3156_v23 }
  0x76   :  { %3169 = vmax.xlane.f32.xlu0 %v3168_v26 }
  0x77   :  { %3160 = vmax.xlane.f32.xlu1 %v3159_v27  ;;  %v111_v27 = vld [vmem:[#allocation8 + $0xb8] sm:$0xff] }
  0x7a   :  { %3172 = vmax.xlane.f32.xlu0 %v3171_v29 }
  0xb6   :  { %v154_v31 = vpop.permute.xlu1 %153  ;;  %v146_v32 = vpop.permute.xlu0 %145 }
  0xb7   :  { %v162_v33 = vmul.f32 %v154_v31, %v82_v21  ;;  %v166_v34 = vmul.f32 %v154_v31, %v86_v24  ;;  %v160_v35 = vmul.f32 %v146_v32, %v80_v14  ;;  %v164_v36 = vmul.f32 %v146_v32, %v84_v16  ;;  %v108_v21 = vld [vmem:[#allocation8 + $0xa0] sm:$0xff] }
  0xb9   :  { %v4127_v49 = vsel %vm168_vm0, %v162_v33, 0.0  ;;  %v4130_v50 = vsel %vm168_vm0, %v166_v34, 0.0  ;;  %v169_v51 = vsel %vm168_vm0, %v160_v35, 0.0  ;;  %v176_v56 = vsel %vm168_vm0, %v164_v36, 0.0 }
  0xba   :  { %v158_v37 = vpop.permute.xlu1 %157  ;;  %v150_v38 = vpop.permute.xlu0 %149 }
  0xbb   :  { %v163_v39 = vmul.f32 %v158_v37, %v83_v25  ;;  %v161_v40 = vmul.f32 %v150_v38, %v81_v17  ;;  %v165_v41 = vmul.f32 %v150_v38, %v85_v20  ;;  %v167_v52 = vmul.f32 %v158_v37, %v87_v28  ;;  %v93_v20 = vld [vmem:[#allocation8 + $0x28] sm:$0xff]  ;;  %v98_v37 = vld [vmem:[#allocation8 + $0x50] sm:$0xff] }
  0xbd   :  { %v170_v57 = vsel %vm168_vm0, %v161_v40, 0.0  ;;  %v177_v58 = vsel %vm168_vm0, %v165_v41, 0.0  ;;  %v4137_v61 = vsel %vm168_vm0, %v163_v39, 0.0  ;;  %v4144_v13 = vsel %vm168_vm0, %v167_v52, 0.0 }
  0xbe   :  { %v241_v59 = vpop.permute.xlu1 %240  ;;  %v237_v60 = vpop.permute.xlu0 %236  ;;  %v4139_v7 = vadd.f32 %v170_v57, %v169_v51  ;;  %v4146_v14 = vadd.f32 %v177_v58, %v176_v56  ;;  %v113_v56 = vld [vmem:[#allocation8 + $0xc8] sm:$0xff] }
  0xbf   :  { %v269_v62 = vmul.f32 %v241_v59, %v90_v42  ;;  %v270_v63 = vmul.f32 %v241_v59, %v91_v43  ;;  %v285_v0 = vmul.f32 %v241_v59, %v106_v44  ;;  %v286_v1 = vmul.f32 %v241_v59, %v107_v45  ;;  %v99_v43 = vld [vmem:[#allocation8 + $0x58] sm:$0xff]  ;;  %v96_v44 = vld [vmem:[#allocation8 + $0x40] sm:$0xff]  ;;  %v97_v45 = vld [vmem:[#allocation8 + $0x48] sm:$0xff] }
  0xc0   :  { %v267_v2 = vmul.f32 %v237_v60, %v88_v46  ;;  %v268_v3 = vmul.f32 %v237_v60, %v89_v53  ;;  %v283_v4 = vmul.f32 %v237_v60, %v104_v54  ;;  %v284_v5 = vmul.f32 %v237_v60, %v105_v55  ;;  %v112_v55 = vld [vmem:[#allocation8 + $0xc0] sm:$0xff] }
  0xc1   :  { %v301_v8 = vsel %vm299_vm3, %v269_v62, 0.0  ;;  %v316_v9 = vsel %vm299_vm3, %v270_v63, 0.0  ;;  %v331_v15 = vsel %vm299_vm3, %v285_v0, 0.0  ;;  %v346_v23 = vsel %vm299_vm3, %v286_v1, 0.0  ;;  %v114_v62 = vld [vmem:[#allocation8 + $0xd0] sm:$0xff]  ;;  %v115_v63 = vld [vmem:[#allocation8 + $0xd8] sm:$0xff] }
  0xc2   :  { %v300_v16 = vsel %vm299_vm3, %v267_v2, 0.0  ;;  %v315_v17 = vsel %vm299_vm3, %v268_v3, 0.0  ;;  %v249_v18 = vpop.permute.xlu1 %248  ;;  %v245_v19 = vpop.permute.xlu0 %244  ;;  %v330_v25 = vsel %vm299_vm3, %v283_v4, 0.0  ;;  %v345_v26 = vsel %vm299_vm3, %v284_v5, 0.0 }
  0xc3   :  { %v302_v24 = vadd.f32 %v301_v8, %v300_v16  ;;  %v317_v28 = vadd.f32 %v316_v9, %v315_v17  ;;  %v273_v29 = vmul.f32 %v249_v18, %v94_v6  ;;  %v274_v31 = vmul.f32 %v249_v18, %v95_v10 }
  0xc4   :  { %v289_v32 = vmul.f32 %v249_v18, %v110_v11  ;;  %v271_v33 = vmul.f32 %v245_v19, %v92_v12  ;;  %v272_v34 = vmul.f32 %v245_v19, %v93_v20  ;;  %v287_v35 = vmul.f32 %v245_v19, %v108_v21 }
  0xc5   :  { %v288_v36 = vmul.f32 %v245_v19, %v109_v22  ;;  %v332_v38 = vadd.f32 %v331_v15, %v330_v25  ;;  %v347_v39 = vadd.f32 %v346_v23, %v345_v26  ;;  %v290_v40 = vmul.f32 %v249_v18, %v111_v27  ;;  %v100_v25 = vld [vmem:[#allocation8 + $0x60] sm:$0xff] }
  0xc6   :  { %v305_v41 = vsel %vm299_vm3, %v273_v29, 0.0  ;;  %v257_v42 = vpop.permute.xlu1 %256  ;;  %v303_v46 = vsel %vm299_vm3, %v271_v33, 0.0  ;;  %v318_v51 = vsel %vm299_vm3, %v272_v34, 0.0  ;;  %v333_v52 = vsel %vm299_vm3, %v287_v35, 0.0  ;;  %v253_v54 = vpop.permute.xlu0 %252  ;;  %v116_v33 = vld [vmem:[#allocation8 + $0xe0] sm:$0xff]  ;;  %v117_v34 = vld [vmem:[#allocation8 + $0xe8] sm:$0xff] }
  0xc7   :  { %v348_v53 = vsel %vm299_vm3, %v288_v36, 0.0  ;;  %v320_v57 = vsel %vm299_vm3, %v274_v31, 0.0  ;;  %v335_v58 = vsel %vm299_vm3, %v289_v32, 0.0  ;;  %v304_v59 = vadd.f32 %v303_v46, %v302_v24  ;;  %v103_v24 = vld [vmem:[#allocation8 + $0x78] sm:$0xff]  ;;  %v101_v32 = vld [vmem:[#allocation8 + $0x68] sm:$0xff] }
  0xc8   :  { %v319_v60 = vadd.f32 %v318_v51, %v317_v28  ;;  %v334_v0 = vadd.f32 %v333_v52, %v332_v38  ;;  %v349_v1 = vadd.f32 %v348_v53, %v347_v39  ;;  %v277_v2 = vmul.f32 %v257_v42, %v98_v37  ;;  %v102_v39 = vld [vmem:[#allocation8 + $0x70] sm:$0xff] }
  0xc9   :  { %v278_v3 = vmul.f32 %v257_v42, %v99_v43  ;;  %v275_v4 = vmul.f32 %v253_v54, %v96_v44  ;;  %v276_v5 = vmul.f32 %v253_v54, %v97_v45  ;;  %v291_v6 = vmul.f32 %v253_v54, %v112_v55 }
  0xca   :  { %v292_v8 = vmul.f32 %v253_v54, %v113_v56  ;;  %v350_v9 = vsel %vm299_vm3, %v290_v40, 0.0  ;;  %v293_v10 = vmul.f32 %v257_v42, %v114_v62  ;;  %v294_v11 = vmul.f32 %v257_v42, %v115_v63  ;;  %v265_v23 = vpop.permute.xlu1 %264  ;;  %v261_v31 = vpop.permute.xlu0 %260  ;;  %v367_v54 = vld [vmem:[%s6492_s5 + $0x8] sm:$0xff]  ;;  %s3957_s5 = smov 3  }
  0xcb   :  { %v309_v12 = vsel %vm299_vm3, %v277_v2, 0.0  ;;  %v306_v15 = vadd.f32 %v305_v41, %v304_v59  ;;  %v307_v16 = vsel %vm299_vm3, %v275_v4, 0.0  ;;  %v321_v17 = vadd.f32 %v320_v57, %v319_v60 }
  0xcc   :  { %v322_v18 = vsel %vm299_vm3, %v276_v5, 0.0  ;;  %v336_v19 = vadd.f32 %v335_v58, %v334_v0  ;;  %v337_v20 = vsel %vm299_vm3, %v291_v6, 0.0  ;;  %v351_v21 = vadd.f32 %v350_v9, %v349_v1 }
  0xcd   :  { %v352_v22 = vsel %vm299_vm3, %v292_v8, 0.0  ;;  %v324_v26 = vsel %vm299_vm3, %v278_v3, 0.0  ;;  %v323_v27 = vadd.f32 %v322_v18, %v321_v17  ;;  %v173_v28 = vadd.f32 %v4127_v49, %v4139_v7  ;;  %v119_v7 = vld [vmem:[#allocation8 + $0xf8] sm:$0xff] }
  0xce   :  { %v180_v29 = vadd.f32 %v4130_v50, %v4146_v14  ;;  %v339_v35 = vsel %vm299_vm3, %v293_v10, 0.0  ;;  %v354_v36 = vsel %vm299_vm3, %v294_v11, 0.0  ;;  %v308_v37 = vadd.f32 %v307_v16, %v306_v15  ;;  %v118_v14 = vld [vmem:[#allocation8 + $0xf0] sm:$0xff] }
  0xcf   :  { %v338_v38 = vadd.f32 %v337_v20, %v336_v19  ;;  %v353_v40 = vadd.f32 %v352_v22, %v351_v21  ;;  %v175_v41 = vadd.f32 %v4137_v61, %v173_v28  ;;  %v282_v50 = vmul.f32 %v265_v23, %v103_v24 }
  0xd0   :  { %v182_v49 = vadd.f32 %v4144_v13, %v180_v29  ;;  %v279_v42 = vmul.f32 %v261_v31, %v100_v25  ;;  %v280_v43 = vmul.f32 %v261_v31, %v101_v32  ;;  %v295_v44 = vmul.f32 %v261_v31, %v116_v33 }
  0xd1   :  { %v296_v45 = vmul.f32 %v261_v31, %v117_v34  ;;  %v185_v46 = vadd.f32 %v184_v47, %v175_v41  ;;  %v281_v52 = vmul.f32 %v265_v23, %v102_v39  ;;  %v325_v53 = vadd.f32 %v324_v26, %v323_v27 }
  0xd2   :  { %v186_v51 = vadd.f32 %v184_v47, %v182_v49  ;;  %v298_v61 = vmul.f32 %v265_v23, %v119_v7  ;;  %v326_v13 = vsel %vm299_vm3, %v280_v43, 0.0  ;;  %v310_v55 = vadd.f32 %v309_v12, %v308_v37 }
  0xd3   :  { %v311_v56 = vsel %vm299_vm3, %v279_v42, 0.0  ;;  %3725 = vmatprep.subr.mxu0 %v185_v46  ;;  %v297_v57 = vmul.f32 %v265_v23, %v118_v14  ;;  %v327_v58 = vadd.f32 %v326_v13, %v325_v53  ;;  %v355_v59 = vadd.f32 %v354_v36, %v353_v40  ;;  %v368_v14 = vld [vmem:[%s6493_s6] sm:$0xff]  ;;  %s3652_s6 = sld [smem:[#allocation3 + $0x36]] }
  0xd4   :  { %3730 = vmatprep.subr.mxu1 %v186_v51  ;;  %v356_v60 = vsel %vm299_vm3, %v296_v45, 0.0  ;;  %3726 = vmatpush3.msra.mxu0 %v185_v46  ;;  %v328_v47 = vsel %vm299_vm3, %v282_v50, 0.0  ;;  %v312_v62 = vadd.f32 %v311_v56, %v310_v55  ;;  %v340_v63 = vadd.f32 %v339_v35, %v338_v38 }
  0xd5   :  { %3731 = vmatpush3.msra.mxu1 %v186_v51  ;;  %v341_v0 = vsel %vm299_vm3, %v295_v44, 0.0  ;;  %3728 = vmatmul.mubr.msk.f32.vlgmr.msra.gmra.mrb[0].mxu0 %vm168_vm0, %v367_v54  ;;  %v329_v1 = vadd.f32 %v328_v47, %v327_v58  ;;  %v313_v2 = vsel %vm299_vm3, %v281_v52, 0.0  ;;  %v357_v3 = vadd.f32 %v356_v60, %v355_v59 }
  0xd6   :  { %3733 = vmatmul.mubr.msk.f32.vlgmr.msra.gmra.mrb[0].mxu1 %vm168_vm0, %v367_v54  ;;  %v314_v4 = vadd.f32 %v313_v2, %v312_v62  ;;  %v358_v5 = vsel %vm299_vm3, %v298_v61, 0.0  ;;  %v342_v6 = vadd.f32 %v341_v0, %v340_v63  ;;  %v343_v10 = vsel %vm299_vm3, %v297_v57, 0.0  ;;  %3735 = vmatprep.subr.mxu0 %v368_v14 }
  0xd7   :  { %v363_v8 = vadd.f32 %v4124_v48, %v329_v1  ;;  %v359_v9 = vadd.f32 %v358_v5, %v357_v3  ;;  %v3182_v17 = vlaneseq  ;;  %3740 = vmatprep.subr.mxu1 %v368_v14  ;;  %3736 = vmatpush3.msra.mxu0 %v368_v14  ;;  %v1951_v46 = vstv %s3651_s18  ;;  %s3668_s18 = sld [smem:[#allocation3 + $0x46]] }
  0xd8   :  { %v362_v11 = vadd.f32 %v4124_v48, %v314_v4  ;;  %v344_v12 = vadd.f32 %v343_v10, %v342_v6  ;;  %3741 = vmatpush3.msra.mxu1 %v368_v14  ;;  %3745 = vmatprep.subr.mxu0 %v3956_v30  ;;  %v2003_v62 = vstv %s3653_s20  ;;  %v2029_v3 = vstv %s3654_s22  ;;  %s3670_s20 = sld [smem:[#allocation3 + $0x48]]  ;;  %s3672_s22 = sld [smem:[#allocation3 + $0x4a]] }
  0xd9   :  { %728 = vrot.lane.b32.xlu1 %v363_v8, %s3957_s5  ;;  %v365_v15 = vadd.f32 %v4124_v48, %v359_v9  ;;  %v3183_v18 = vand.u32 127, %v3182_v17  ;;  %v3185_v19 = vshrl.u32 %v3182_v17, 7  ;;  %3750 = vmatprep.subr.mxu1 %v3956_v30  ;;  %v1977_v57 = vstv %s3652_s6  ;;  %s3669_s6 = sld [smem:[#allocation3 + $0x47]] }
  0xda   :  { %726 = vrot.lane.b32.xlu0 %v362_v11, %s3957_s5  ;;  %v364_v16 = vadd.f32 %v4124_v48, %v344_v12  ;;  %v4262_v9 = vstv %s3681_s3  ;;  %s3673_s3 = sld [smem:[#allocation3 + $0x4b]] }
  0xdb   :  { %v4201_v21 = vsub.s32 %v3183_v18, %v3185_v19 }
  0xdd   :  { %732 = vrot.lane.b32.xlu1 %v365_v15, %s3957_s5  ;;  %v2055_v15 = vstv %s3655_s25  ;;  %s3674_s25 = sld [smem:[#allocation3 + $0x4c]] }
  0xde   :  { %730 = vrot.lane.b32.xlu0 %v364_v16, %s3957_s5 }
  0xf7   :  { %v3152_v20 = vpop.xlane.xlu0 %3151 }
  0xf8   :  { %v3187_v24 = vrot.slane %v3152_v20, %v4201_v21 }
  0xfb   :  { %v3164_v22 = vpop.xlane.xlu0 %3163 }
  0xfc   :  { %v3155_v23 = vpop.xlane.xlu1 %3154  ;;  %v3203_v48 = vrot.slane %v3164_v22, %v4201_v21 }
  0xfd   :  { %v3191_v25 = vrot.slane %v3155_v23, %v4201_v21 }
  0xff   :  { %v3167_v26 = vpop.xlane.xlu0 %3166  ;;  %v3217_v31 = vsel %vm3216_vm4, %v3191_v25, %v3187_v24  ;;  %v2081_v24 = vstv %s3656_s1  ;;  %s3675_s1 = sld [smem:[#allocation3 + $0x4d]] }
 0x100   :  { %v3207_v27 = vrot.slane %v3167_v26, %v4201_v21  ;;  %v3158_v28 = vpop.xlane.xlu1 %3157 }
 0x101   :  { %v3195_v29 = vrot.slane %v3158_v28, %v4201_v21 }
 0x102   :  { %v3222_v36 = vsel %vm3216_vm4, %v3207_v27, %v3203_v48 }
 0x103   :  { %v3170_v32 = vpop.xlane.xlu0 %3169  ;;  %v3219_v35 = vsel %vm3218_vm5, %v3195_v29, %v3217_v31  ;;  %v2121_v29 = vstv %s3658_s27  ;;  %s3676_s27 = sld [smem:[#allocation3 + $0x4e]] }
 0x104   :  { %v3211_v33 = vrot.slane %v3170_v32, %v4201_v21  ;;  %v3161_v34 = vpop.xlane.xlu1 %3160 }
 0x105   :  { %v3199_v37 = vrot.slane %v3161_v34, %v4201_v21 }
 0x106   :  { %v3223_v40 = vsel %vm3218_vm5, %v3211_v33, %v3222_v36 }
 0x107   :  { %v3173_v38 = vpop.xlane.xlu0 %3172  ;;  %v3221_v39 = vsel %vm3220_vm6, %v3199_v37, %v3219_v35 }
 0x108   :  { %v3215_v41 = vrot.slane %v3173_v38, %v4201_v21  ;;  %v3228_v49 = vsel %vm3227_vm7, %v3221_v39, -inf  ;;  %v2147_v38 = vstv %s3659_s0  ;;  %s3677_s0 = sld [smem:[#allocation3 + $0x4f]] }
 0x109   :  { %3229 = vmax.xlane.f32.xlu0 %v3228_v49 }
 0x10a   :  { %v3224_v7 = vsel %vm3220_vm6, %v3215_v41, %v3223_v40 }
 0x10b   :  { %v3231_v50 = vsel %vm3227_vm7, %v3224_v7, -inf  ;;  %v2173_v7 = vstv %s3660_s29  ;;  %s3679_s29 = sld [smem:[#allocation3 + $0x51]] }
 0x10c   :  { %3232 = vmax.xlane.f32.xlu1 %v3231_v50 }
 0x14b   :  { %v729_v42 = vpop.permute.xlu1 %728 }
 0x14c   :  { %740 = vst.msk [vmem:[#allocation2 + $0x3b] sm:$0xff] %vm717_vm8, %v729_v42  ;;  %v727_v43 = vpop.permute.xlu0 %726 }
 0x14d   :  { %739 = vst.msk [vmem:[#allocation2 + $0x33] sm:$0xff] %vm717_vm8, %v727_v43 }
 0x14f   :  { %v733_v44 = vpop.permute.xlu1 %732 }
 0x150   :  { %742 = vst.msk [vmem:[#allocation2 + $0x53] sm:$0xff] %vm717_vm8, %v733_v44  ;;  %v731_v45 = vpop.permute.xlu0 %730  ;;  %v2199_v44 = vstv %s3661_s2  ;;  %s3680_s2 = sld [smem:[#allocation3 + $0x52]] }
 0x151   :  { %741 = vst.msk [vmem:[#allocation2 + $0x4b] sm:$0xff] %vm717_vm8, %v731_v45 }
 0x153   :  { %v4258_v6 = vld [vmem:[#allocation2 + $0x3c] sm:$0xff] }
 0x154   :  { %v4222_v51 = vld [vmem:[#allocation2 + $0x38] sm:$0xff]  ;;  %v4224_v52 = vld [vmem:[#allocation2 + $0x30] sm:$0xff]  ;;  %v4274_v17 = vmul.f32 %v4262_v9, %v4258_v6 }
 0x155   :  { %v1953_v53 = vmul.f32 %v1951_v46, %v4222_v51  ;;  %v1952_v54 = vmul.f32 %v1951_v46, %v4224_v52  ;;  %v1979_v58 = vmul.f32 %v1977_v57, %v4222_v51  ;;  %v1978_v59 = vmul.f32 %v1977_v57, %v4224_v52  ;;  %v4296_v28 = vld [vmem:[#allocation2 + $0x39] sm:$0xff]  ;;  %v4298_v31 = vld [vmem:[#allocation2 + $0x31] sm:$0xff] }
 0x156   :  { %v2005_v63 = vmul.f32 %v2003_v62, %v4222_v51  ;;  %v2004_v0 = vmul.f32 %v2003_v62, %v4224_v52  ;;  %v2031_v4 = vmul.f32 %v2029_v3, %v4222_v51  ;;  %v2030_v5 = vmul.f32 %v2029_v3, %v4224_v52  ;;  %6514 = vst [vmem:[#allocation16_spill] sm:$0xff] %v4274_v17 }
 0x157   :  { %1962 = vrot.lane.b32.xlu1 %v1953_v53, %s3958_s19  ;;  %1960 = vrot.lane.b32.xlu0 %v1952_v54, %s3958_s19  ;;  %v4264_v10 = vld [vmem:[#allocation2 + $0x54] sm:$0xff]  ;;  %v2057_v19 = vmul.f32 %v2055_v15, %v4222_v51  ;;  %v2056_v20 = vmul.f32 %v2055_v15, %v4224_v52  ;;  %v2083_v25 = vmul.f32 %v2081_v24, %v4222_v51  ;;  %v2225_v53 = vstv %s3662_s4  ;;  %s3632_s4 = sld [smem:[#allocation3 + $0x22]] }
 0x158   :  { %v4230_v61 = vld [vmem:[#allocation2 + $0x50] sm:$0xff]  ;;  %v4232_v13 = vld [vmem:[#allocation2 + $0x48] sm:$0xff]  ;;  %v4280_v18 = vmul.f32 %v4262_v9, %v4264_v10  ;;  %v2082_v26 = vmul.f32 %v2081_v24, %v4224_v52  ;;  %v2123_v32 = vmul.f32 %v2121_v29, %v4296_v28  ;;  %v2122_v33 = vmul.f32 %v2121_v29, %v4298_v31 }
 0x159   :  { %v1955_v55 = vmul.f32 %v1951_v46, %v4230_v61  ;;  %v1954_v56 = vmul.f32 %v1951_v46, %v4232_v13  ;;  %v1981_v60 = vmul.f32 %v1977_v57, %v4230_v61  ;;  %v1980_v47 = vmul.f32 %v1977_v57, %v4232_v13  ;;  %v4260_v8 = vld [vmem:[#allocation2 + $0x4c] sm:$0xff] }
 0x15a   :  { %v2007_v1 = vmul.f32 %v2003_v62, %v4230_v61  ;;  %v2006_v2 = vmul.f32 %v2003_v62, %v4232_v13  ;;  %v2033_v11 = vmul.f32 %v2029_v3, %v4230_v61  ;;  %v2032_v12 = vmul.f32 %v2029_v3, %v4232_v13  ;;  %6515 = vst [vmem:[#allocation17_spill] sm:$0xff] %v4280_v18  ;;  %v4304_v34 = vld [vmem:[#allocation2 + $0x51] sm:$0xff]  ;;  %v4306_v35 = vld [vmem:[#allocation2 + $0x49] sm:$0xff] }
 0x15b   :  { %1966 = vrot.lane.b32.xlu1 %v1955_v55, %s3958_s19  ;;  %1964 = vrot.lane.b32.xlu0 %v1954_v56, %s3958_s19  ;;  %v4270_v16 = vmul.f32 %v4262_v9, %v4260_v8  ;;  %v2059_v22 = vmul.f32 %v2055_v15, %v4230_v61  ;;  %v2058_v23 = vmul.f32 %v2055_v15, %v4232_v13  ;;  %v4366_v15 = vld [vmem:[#allocation2 + $0x32] sm:$0xff] }
 0x15c   :  { %v2085_v48 = vmul.f32 %v2081_v24, %v4230_v61  ;;  %v2084_v27 = vmul.f32 %v2081_v24, %v4232_v13  ;;  %v2125_v36 = vmul.f32 %v2121_v29, %v4304_v34  ;;  %v2124_v37 = vmul.f32 %v2121_v29, %v4306_v35 }
 0x15d   :  { %6513 = vst [vmem:[#allocation15_spill] sm:$0xff] %v4270_v16  ;;  %v2149_v39 = vmul.f32 %v2147_v38, %v4296_v28  ;;  %v2148_v40 = vmul.f32 %v2147_v38, %v4298_v31  ;;  %v2151_v41 = vmul.f32 %v2147_v38, %v4304_v34  ;;  %v2150_v49 = vmul.f32 %v2147_v38, %v4306_v35 }
 0x15e   :  { %v2175_v50 = vmul.f32 %v2173_v7, %v4296_v28  ;;  %v2174_v14 = vmul.f32 %v2173_v7, %v4298_v31  ;;  %v2177_v42 = vmul.f32 %v2173_v7, %v4304_v34  ;;  %v2176_v43 = vmul.f32 %v2173_v7, %v4306_v35 }
 0x15f   :  { %1988 = vrot.lane.b32.xlu1 %v1979_v58, %s3959_s21  ;;  %1986 = vrot.lane.b32.xlu0 %v1978_v59, %s3959_s21  ;;  %v2201_v45 = vmul.f32 %v2199_v44, %v4296_v28  ;;  %v2200_v46 = vmul.f32 %v2199_v44, %v4298_v31  ;;  %v2203_v51 = vmul.f32 %v2199_v44, %v4304_v34  ;;  %v2343_v29 = vstv %s3667_s17  ;;  %s3604_s17 = sld [smem:[#allocation3 + $0x6]] }
 0x160   :  { %v2202_v52 = vmul.f32 %v2199_v44, %v4306_v35  ;;  %v2227_v54 = vmul.f32 %v2225_v53, %v4296_v28  ;;  %v2226_v61 = vmul.f32 %v2225_v53, %v4298_v31  ;;  %v2229_v62 = vmul.f32 %v2225_v53, %v4304_v34 }
 0x163   :  { %1992 = vrot.lane.b32.xlu1 %v1981_v60, %s3959_s21  ;;  %1990 = vrot.lane.b32.xlu0 %v1980_v47, %s3959_s21 }
 0x167   :  { %2014 = vrot.lane.b32.xlu1 %v2005_v63, %s3960_s24  ;;  %2012 = vrot.lane.b32.xlu0 %v2004_v0, %s3960_s24  ;;  %v2228_v63 = vmul.f32 %v2225_v53, %v4306_v35  ;;  %v3234_v0 = vld [vmem:[%s6494_s7] sm:$0xf]  ;;  %s3666_s7 = sld [smem:[#allocation3 + $0x44]] }
 0x16b   :  { %2018 = vrot.lane.b32.xlu1 %v2007_v1, %s3960_s24  ;;  %2016 = vrot.lane.b32.xlu0 %v2006_v2, %s3960_s24 }
 0x16f   :  { %2040 = vrot.lane.b32.xlu1 %v2031_v4, %s3961_s26  ;;  %2038 = vrot.lane.b32.xlu0 %v2030_v5, %s3961_s26 }
 0x173   :  { %2044 = vrot.lane.b32.xlu1 %v2033_v11, %s3961_s26  ;;  %2042 = vrot.lane.b32.xlu0 %v2032_v12, %s3961_s26  ;;  %v4364_v11 = vld [vmem:[#allocation2 + $0x3a] sm:$0xff]  ;;  %v2291_v12 = vstv %s3665_s16  ;;  %s3603_s16 = sld [smem:[#allocation3 + $0x5]] }
 0x177   :  { %2066 = vrot.lane.b32.xlu1 %v2057_v19, %s3962_s23  ;;  %2064 = vrot.lane.b32.xlu0 %v2056_v20, %s3962_s23  ;;  %v2292_v19 = vmul.f32 %v2291_v12, %v4366_v15  ;;  %v4372_v20 = vld [vmem:[#allocation2 + $0x52] sm:$0xff] }
 0x17b   :  { %2070 = vrot.lane.b32.xlu1 %v2059_v22, %s3962_s23  ;;  %2068 = vrot.lane.b32.xlu0 %v2058_v23, %s3962_s23  ;;  %v4374_v22 = vld [vmem:[#allocation2 + $0x4a] sm:$0xff]  ;;  %v2295_v23 = vmul.f32 %v2291_v12, %v4372_v20 }
 0x17c   :  { %v2294_v24 = vmul.f32 %v2291_v12, %v4374_v22 }
 0x17f   :  { %2092 = vrot.lane.b32.xlu1 %v2083_v25, %s3963_s28  ;;  %2090 = vrot.lane.b32.xlu0 %v2082_v26, %s3963_s28  ;;  %v2317_v25 = vstv %s3666_s7  ;;  %s3625_s7 = sld [smem:[#allocation3 + $0x1b]] }
 0x180   :  { %v2319_v26 = vmul.f32 %v2317_v25, %v4364_v11 }
 0x183   :  { %2096 = vrot.lane.b32.xlu1 %v2085_v48, %s3963_s28  ;;  %2094 = vrot.lane.b32.xlu0 %v2084_v27, %s3963_s28  ;;  %v2318_v48 = vmul.f32 %v2317_v25, %v4366_v15  ;;  %v2321_v27 = vmul.f32 %v2317_v25, %v4372_v20 }
 0x187   :  { %2132 = vrot.lane.b32.xlu1 %v2123_v32, %s3958_s19  ;;  %2130 = vrot.lane.b32.xlu0 %v2122_v33, %s3958_s19  ;;  %v2344_v32 = vmul.f32 %v2343_v29, %v4366_v15 }
 0x18b   :  { %2136 = vrot.lane.b32.xlu1 %v2125_v36, %s3958_s19  ;;  %2134 = vrot.lane.b32.xlu0 %v2124_v37, %s3958_s19  ;;  %v2346_v36 = vmul.f32 %v2343_v29, %v4374_v22  ;;  %v2369_v37 = vstv %s3668_s18  ;;  %s3626_s18 = sld [smem:[#allocation3 + $0x1c]] }
 0x18f   :  { %2158 = vrot.lane.b32.xlu1 %v2149_v39, %s3959_s21  ;;  %2156 = vrot.lane.b32.xlu0 %v2148_v40, %s3959_s21  ;;  %v2371_v40 = vmul.f32 %v2369_v37, %v4364_v11 }
 0x193   :  { %2162 = vrot.lane.b32.xlu1 %v2151_v41, %s3959_s21  ;;  %2160 = vrot.lane.b32.xlu0 %v2150_v49, %s3959_s21  ;;  %v2370_v41 = vmul.f32 %v2369_v37, %v4366_v15 }
 0x196   :  { %v3230_v55 = vpop.xlane.xlu0 %3229 }
 0x197   :  { %2184 = vrot.lane.b32.xlu1 %v2175_v50, %s3960_s24  ;;  %2182 = vrot.lane.b32.xlu0 %v2174_v14, %s3960_s24  ;;  %v3247_v59 = vrot.slane %v3230_v55, %v4201_v21  ;;  %v2373_v50 = vmul.f32 %v2369_v37, %v4372_v20  ;;  %v2372_v14 = vmul.f32 %v2369_v37, %v4374_v22  ;;  %v2539_v37 = vstv %s3675_s1  ;;  %s3609_s1 = sld [smem:[#allocation3 + $0xb]] }
 0x199   :  { %v3233_v13 = vpop.xlane.xlu1 %3232 }
 0x19a   :  { %v3251_v58 = vrot.slane %v3233_v13, %v4201_v21  ;;  %v2251_v21 = vstv %s3663_s30  ;;  %s3612_s30 = sld [smem:[#allocation3 + $0xe]] }
 0x19b   :  { %2188 = vrot.lane.b32.xlu1 %v2177_v42, %s3960_s24  ;;  %2186 = vrot.lane.b32.xlu0 %v2176_v43, %s3960_s24  ;;  %v2253_v2 = vmul.f32 %v2251_v21, %v4296_v28  ;;  %v2252_v3 = vmul.f32 %v2251_v21, %v4298_v31  ;;  %v2255_v4 = vmul.f32 %v2251_v21, %v4304_v34  ;;  %v2395_v42 = vstv %s3669_s6  ;;  %s3605_s6 = sld [smem:[#allocation3 + $0x7]] }
 0x19c   :  { %v3252_v1 = vsel %vm3216_vm4, %v3251_v58, %v3247_v59  ;;  %v2254_v5 = vmul.f32 %v2251_v21, %v4306_v35  ;;  %v2320_v28 = vmul.f32 %v2317_v25, %v4374_v22  ;;  %v2345_v31 = vmul.f32 %v2343_v29, %v4364_v11 }
 0x19d   :  { %v2347_v35 = vmul.f32 %v2343_v29, %v4372_v20  ;;  %v2399_v53 = vmul.f32 %v2395_v42, %v4372_v20 }
 0x19f   :  { %2210 = vrot.lane.b32.xlu1 %v2201_v45, %s3961_s26  ;;  %2208 = vrot.lane.b32.xlu0 %v2200_v46, %s3961_s26  ;;  %v2397_v45 = vmul.f32 %v2395_v42, %v4364_v11  ;;  %v2396_v46 = vmul.f32 %v2395_v42, %v4366_v15 }
 0x1a3   :  { %2214 = vrot.lane.b32.xlu1 %v2203_v51, %s3961_s26  ;;  %2212 = vrot.lane.b32.xlu0 %v2202_v52, %s3961_s26 }
 0x1a7   :  { %2236 = vrot.lane.b32.xlu1 %v2227_v54, %s3962_s23  ;;  %2234 = vrot.lane.b32.xlu0 %v2226_v61, %s3962_s23  ;;  %v2398_v54 = vmul.f32 %v2395_v42, %v4374_v22  ;;  %v2421_v61 = vstv %s3670_s20  ;;  %s3606_s20 = sld [smem:[#allocation3 + $0x8]] }
 0x1a8   :  { %v3729_v56 = vpop.f32.mrb[0].mxu0 }
 0x1a9   :  { %v3734_v57 = vpop.f32.mrb[0].mxu1  ;;  %v441_v60 = vpop.f32.mrb[1].mxu0 }
 0x1aa   :  { %v516_v47 = vpop.f32.mrb[1].mxu1  ;;  %3737 = vmatprep.mubr.msk.f32.mxu0 %vm168_vm0, %v441_v60  ;;  %v2425_v60 = vmul.f32 %v2421_v61, %v4372_v20 }
 0x1ab   :  { %3742 = vmatprep.mubr.msk.f32.mxu1 %vm168_vm0, %v516_v47  ;;  %3738 = vmatmul.mubr.msk.f32.vlgmr.msra.gmra.mrb[2].mxu0 %vm168_vm0, %v3729_v56  ;;  %v2423_v56 = vmul.f32 %v2421_v61, %v4364_v11  ;;  %v2424_v47 = vmul.f32 %v2421_v61, %v4374_v22 }
 0x1ac   :  { %3743 = vmatmul.mubr.msk.f32.vlgmr.msra.gmra.mrb[2].mxu1 %vm168_vm0, %v3734_v57  ;;  %2240 = vrot.lane.b32.xlu1 %v2229_v62, %s3962_s23  ;;  %v2422_v57 = vmul.f32 %v2421_v61, %v4366_v15  ;;  %v4448_v62 = vld [vmem:[#allocation2 + $0x3b] sm:$0xff] }
 0x1ad   :  { %2238 = vrot.lane.b32.xlu0 %v2228_v63, %s3962_s23  ;;  %3746 = vmatpush3.msk.msra.mxu0 %vm3256_vm9, %v3234_v0  ;;  %v2461_v63 = vstv %s3672_s22  ;;  %v4450_v0 = vld [vmem:[#allocation2 + $0x33] sm:$0xff]  ;;  %s3627_s22 = sld [smem:[#allocation3 + $0x1d]] }
 0x1ae   :  { %3747 = vmatprep.mubr.msk.f32.mxu0 %vm3964_vm11, %v3956_v30  ;;  %3752 = vmatprep.mubr.msk.f32.mxu1 %vm3964_vm11, %v3956_v30  ;;  %v2293_v30 = vmul.f32 %v2291_v12, %v4364_v11 }
 0x1af   :  { %3748 = vmatmul.mubr.msk.f32.vlgmr.msra.gmra.mrb[4].mxu0 %vm3253_vm10, %v3252_v1 }
 0x1b0   :  { %2262 = vrot.lane.b32.xlu1 %v2253_v2, %s3963_s28  ;;  %v2463_v2 = vmul.f32 %v2461_v63, %v4448_v62 }
 0x1b1   :  { %2260 = vrot.lane.b32.xlu0 %v2252_v3, %s3963_s28  ;;  %v2462_v3 = vmul.f32 %v2461_v63, %v4450_v0 }
 0x1b4   :  { %2266 = vrot.lane.b32.xlu1 %v2255_v4, %s3963_s28  ;;  %v4460_v4 = vld [vmem:[#allocation2 + $0x53] sm:$0xff] }
 0x1b5   :  { %2264 = vrot.lane.b32.xlu0 %v2254_v5, %s3963_s28  ;;  %v4462_v5 = vld [vmem:[#allocation2 + $0x4b] sm:$0xff]  ;;  %v2465_v12 = vmul.f32 %v2461_v63, %v4460_v4  ;;  %v2543_v42 = vmul.f32 %v2539_v37, %v4460_v4 }
 0x1b6   :  { %v2464_v15 = vmul.f32 %v2461_v63, %v4462_v5 }
 0x1b8   :  { %2302 = vrot.lane.b32.xlu1 %v2293_v30, %s3958_s19 }
 0x1b9   :  { %2300 = vrot.lane.b32.xlu0 %v2292_v19, %s3958_s19  ;;  %v2487_v19 = vstv %s3673_s3  ;;  %s3607_s3 = sld [smem:[#allocation3 + $0x9]] }
 0x1ba   :  { %v2489_v22 = vmul.f32 %v2487_v19, %v4448_v62 }
 0x1bc   :  { %2306 = vrot.lane.b32.xlu1 %v2295_v23, %s3958_s19  ;;  %v2488_v23 = vmul.f32 %v2487_v19, %v4450_v0 }
 0x1bd   :  { %2304 = vrot.lane.b32.xlu0 %v2294_v24, %s3958_s19 }
 0x1c0   :  { %2328 = vrot.lane.b32.xlu1 %v2319_v26, %s3959_s21  ;;  %v2491_v26 = vmul.f32 %v2487_v19, %v4460_v4 }
 0x1c1   :  { %2326 = vrot.lane.b32.xlu0 %v2318_v48, %s3959_s21  ;;  %v2490_v48 = vmul.f32 %v2487_v19, %v4462_v5 }
 0x1c4   :  { %2332 = vrot.lane.b32.xlu1 %v2321_v27, %s3959_s21  ;;  %v2513_v27 = vstv %s3674_s25  ;;  %s3628_s25 = sld [smem:[#allocation3 + $0x1e]] }
 0x1c5   :  { %2330 = vrot.lane.b32.xlu0 %v2320_v28, %s3959_s21  ;;  %v2515_v28 = vmul.f32 %v2513_v27, %v4448_v62  ;;  %v2514_v29 = vmul.f32 %v2513_v27, %v4450_v0 }
 0x1c8   :  { %2354 = vrot.lane.b32.xlu1 %v2345_v31, %s3960_s24 }
 0x1c9   :  { %2352 = vrot.lane.b32.xlu0 %v2344_v32, %s3960_s24  ;;  %v4394_v33 = vpop.permute.xlu1 %1962  ;;  %v4396_v34 = vpop.permute.xlu0 %1960 }
 0x1ca   :  { %6516 = vst [vmem:[#allocation18_spill] sm:$0xff] %v4394_v33  ;;  %6517 = vst [vmem:[#allocation19_spill] sm:$0xff] %v4396_v34 }
 0x1cc   :  { %2358 = vrot.lane.b32.xlu1 %v2347_v35, %s3960_s24  ;;  %v2517_v35 = vmul.f32 %v2513_v27, %v4460_v4 }
 0x1cd   :  { %2356 = vrot.lane.b32.xlu0 %v2346_v36, %s3960_s24  ;;  %v4402_v38 = vpop.permute.xlu1 %1966  ;;  %v4404_v39 = vpop.permute.xlu0 %1964  ;;  %v2516_v36 = vmul.f32 %v2513_v27, %v4462_v5 }
 0x1ce   :  { %6518 = vst [vmem:[#allocation20_spill] sm:$0xff] %v4402_v38  ;;  %6519 = vst [vmem:[#allocation21_spill] sm:$0xff] %v4404_v39 }
 0x1d0   :  { %2380 = vrot.lane.b32.xlu1 %v2371_v40, %s3961_s26 }
 0x1d1   :  { %2378 = vrot.lane.b32.xlu0 %v2370_v41, %s3961_s26  ;;  %v4410_v49 = vpop.permute.xlu1 %1988  ;;  %v4412_v7 = vpop.permute.xlu0 %1986 }
 0x1d2   :  { %6520 = vst [vmem:[#allocation22_spill] sm:$0xff] %v4410_v49  ;;  %6521 = vst [vmem:[#allocation23_spill] sm:$0xff] %v4412_v7 }
 0x1d4   :  { %2384 = vrot.lane.b32.xlu1 %v2373_v50, %s3961_s26  ;;  %v2541_v50 = vmul.f32 %v2539_v37, %v4448_v62 }
 0x1d5   :  { %2382 = vrot.lane.b32.xlu0 %v2372_v14, %s3961_s26  ;;  %v4418_v43 = vpop.permute.xlu1 %1992  ;;  %v4420_v44 = vpop.permute.xlu0 %1990  ;;  %v2540_v14 = vmul.f32 %v2539_v37, %v4450_v0 }
 0x1d6   :  { %6522 = vst [vmem:[#allocation24_spill] sm:$0xff] %v4418_v43  ;;  %6523 = vst [vmem:[#allocation25_spill] sm:$0xff] %v4420_v44 }
 0x1d8   :  { %2406 = vrot.lane.b32.xlu1 %v2397_v45, %s3962_s23  ;;  %v2542_v45 = vmul.f32 %v2539_v37, %v4462_v5  ;;  %v3331_v37 = vld [vmem:[%s6496_s9] sm:$0xff]  ;;  %s3633_s9 = sld [smem:[#allocation3 + $0x23]] }
 0x1d9   :  { %2404 = vrot.lane.b32.xlu0 %v2396_v46, %s3962_s23  ;;  %v4426_v51 = vpop.permute.xlu1 %2014  ;;  %v4428_v52 = vpop.permute.xlu0 %2012  ;;  %3751 = vmatpush3.msra.mxu1 %v3331_v37 }
 0x1da   :  { %6524 = vst [vmem:[#allocation26_spill] sm:$0xff] %v4426_v51  ;;  %6525 = vst [vmem:[#allocation27_spill] sm:$0xff] %v4428_v52 }
 0x1dc   :  { %2410 = vrot.lane.b32.xlu1 %v2399_v53, %s3962_s23  ;;  %v2565_v53 = vstv %s3676_s27  ;;  %s3630_s27 = sld [smem:[#allocation3 + $0x20]] }
 0x1dd   :  { %2408 = vrot.lane.b32.xlu0 %v2398_v54, %s3962_s23  ;;  %v4434_v13 = vpop.permute.xlu1 %2018  ;;  %v4436_v55 = vpop.permute.xlu0 %2016  ;;  %v2567_v61 = vmul.f32 %v2565_v53, %v4448_v62  ;;  %v2568_v63 = vmul.f32 %v2565_v53, %v4462_v5 }
 0x1de   :  { %6526 = vst [vmem:[#allocation28_spill] sm:$0xff] %v4434_v13  ;;  %6527 = vst [vmem:[#allocation29_spill] sm:$0xff] %v4436_v55 }
 0x1e0   :  { %2432 = vrot.lane.b32.xlu1 %v2423_v56, %s3963_s28  ;;  %v2566_v56 = vmul.f32 %v2565_v53, %v4450_v0 }
 0x1e1   :  { %2430 = vrot.lane.b32.xlu0 %v2422_v57, %s3963_s28  ;;  %v4442_v58 = vpop.permute.xlu1 %2040  ;;  %v4444_v59 = vpop.permute.xlu0 %2038 }
 0x1e2   :  { %6528 = vst [vmem:[#allocation30_spill] sm:$0xff] %v4442_v58  ;;  %6529 = vst [vmem:[#allocation31_spill] sm:$0xff] %v4444_v59 }
 0x1e4   :  { %2436 = vrot.lane.b32.xlu1 %v2425_v60, %s3963_s28 }
 0x1e5   :  { %2434 = vrot.lane.b32.xlu0 %v2424_v47, %s3963_s28  ;;  %v4454_v21 = vpop.permute.xlu1 %2044  ;;  %v4456_v1 = vpop.permute.xlu0 %2042  ;;  %v2569_v47 = vmul.f32 %v2565_v53, %v4460_v4 }
 0x1e6   :  { %6530 = vst [vmem:[#allocation32_spill] sm:$0xff] %v4454_v21  ;;  %6531 = vst [vmem:[#allocation33_spill] sm:$0xff] %v4456_v1 }
 0x1e8   :  { %2472 = vrot.lane.b32.xlu1 %v2463_v2, %s3958_s19  ;;  %v2591_v2 = vstv %s3677_s0  ;;  %s3610_s0 = sld [smem:[#allocation3 + $0xc]] }
 0x1e9   :  { %2470 = vrot.lane.b32.xlu0 %v2462_v3, %s3958_s19  ;;  %v4466_v11 = vpop.permute.xlu0 %2064  ;;  %v4470_v30 = vpop.permute.xlu1 %2066  ;;  %v2593_v3 = vmul.f32 %v2591_v2, %v4448_v62 }
 0x1ea   :  { %6532 = vst [vmem:[#allocation34_spill] sm:$0xff] %v4466_v11  ;;  %6533 = vst [vmem:[#allocation35_spill] sm:$0xff] %v4470_v30 }
 0x1ec   :  { %2476 = vrot.lane.b32.xlu1 %v2465_v12, %s3958_s19  ;;  %v2592_v12 = vmul.f32 %v2591_v2, %v4450_v0 }
 0x1ed   :  { %2474 = vrot.lane.b32.xlu0 %v2464_v15, %s3958_s19  ;;  %v4474_v20 = vpop.permute.xlu0 %2068  ;;  %v4480_v24 = vpop.permute.xlu1 %2070 }
 0x1ee   :  { %6534 = vst [vmem:[#allocation36_spill] sm:$0xff] %v4474_v20  ;;  %6535 = vst [vmem:[#allocation37_spill] sm:$0xff] %v4480_v24 }
 0x1f0   :  { %2498 = vrot.lane.b32.xlu1 %v2489_v22, %s3959_s21  ;;  %v2595_v22 = vmul.f32 %v2591_v2, %v4460_v4 }
 0x1f1   :  { %2496 = vrot.lane.b32.xlu0 %v2488_v23, %s3959_s21  ;;  %v4482_v25 = vpop.permute.xlu0 %2090  ;;  %v4490_v31 = vpop.permute.xlu1 %2092  ;;  %v2594_v23 = vmul.f32 %v2591_v2, %v4462_v5 }
 0x1f2   :  { %6536 = vst [vmem:[#allocation38_spill] sm:$0xff] %v4482_v25  ;;  %6537 = vst [vmem:[#allocation39_spill] sm:$0xff] %v4490_v31 }
 0x1f4   :  { %2502 = vrot.lane.b32.xlu1 %v2491_v26, %s3959_s21  ;;  %v2631_v26 = vstv %s3679_s29  ;;  %s3631_s29 = sld [smem:[#allocation3 + $0x21]] }
 0x1f5   :  { %2500 = vrot.lane.b32.xlu0 %v2490_v48, %s3959_s21  ;;  %v4492_v32 = vpop.permute.xlu0 %2094  ;;  %v4500_v40 = vpop.permute.xlu1 %2096  ;;  %v2617_v48 = vld [vmem:[#allocation2 + $0x34] sm:$0xff]  ;;  %v2633_v27 = vmul.f32 %v2631_v26, %v4258_v6  ;;  %v2635_v4 = vmul.f32 %v2631_v26, %v4264_v10  ;;  %v2634_v5 = vmul.f32 %v2631_v26, %v4260_v8 }
 0x1f6   :  { %6538 = vst [vmem:[#allocation40_spill] sm:$0xff] %v4492_v32  ;;  %6539 = vst [vmem:[#allocation41_spill] sm:$0xff] %v4500_v40 }
 0x1f8   :  { %2524 = vrot.lane.b32.xlu1 %v2515_v28, %s3960_s24  ;;  %v2632_v28 = vmul.f32 %v2631_v26, %v2617_v48 }
 0x1f9   :  { %2522 = vrot.lane.b32.xlu0 %v2514_v29, %s3960_s24  ;;  %v4502_v41 = vpop.permute.xlu0 %2130  ;;  %v4510_v46 = vpop.permute.xlu1 %2132 }
 0x1fa   :  { %6540 = vst [vmem:[#allocation42_spill] sm:$0xff] %v4502_v41  ;;  %6541 = vst [vmem:[#allocation43_spill] sm:$0xff] %v4510_v46 }
 0x1fc   :  { %2528 = vrot.lane.b32.xlu1 %v2517_v35, %s3960_s24  ;;  %v2657_v35 = vstv %s3680_s2  ;;  %s3611_s2 = sld [smem:[#allocation3 + $0xd]] }
 0x1fd   :  { %2526 = vrot.lane.b32.xlu0 %v2516_v36, %s3960_s24  ;;  %v4512_v54 = vpop.permute.xlu0 %2134  ;;  %v4520_v57 = vpop.permute.xlu1 %2136  ;;  %v2661_v53 = vmul.f32 %v2657_v35, %v4264_v10 }
 0x1fe   :  { %6542 = vst [vmem:[#allocation44_spill] sm:$0xff] %v4512_v54  ;;  %6543 = vst [vmem:[#allocation45_spill] sm:$0xff] %v4520_v57 }
 0x200   :  { %2550 = vrot.lane.b32.xlu1 %v2541_v50, %s3961_s26  ;;  %v2659_v50 = vmul.f32 %v2657_v35, %v4258_v6 }
 0x201   :  { %2548 = vrot.lane.b32.xlu0 %v2540_v14, %s3961_s26  ;;  %v4522_v60 = vpop.permute.xlu0 %2156  ;;  %v4530_v15 = vpop.permute.xlu1 %2158  ;;  %v2658_v14 = vmul.f32 %v2657_v35, %v2617_v48 }
 0x202   :  { %6544 = vst [vmem:[#allocation46_spill] sm:$0xff] %v4522_v60  ;;  %6545 = vst [vmem:[#allocation47_spill] sm:$0xff] %v4530_v15 }
 0x204   :  { %2554 = vrot.lane.b32.xlu1 %v2543_v42, %s3961_s26 }
 0x205   :  { %2552 = vrot.lane.b32.xlu0 %v2542_v45, %s3961_s26  ;;  %v4532_v19 = vpop.permute.xlu0 %2160  ;;  %v4540_v62 = vpop.permute.xlu1 %2162 }
 0x206   :  { %6546 = vst [vmem:[#allocation48_spill] sm:$0xff] %v4532_v19  ;;  %6547 = vst [vmem:[#allocation49_spill] sm:$0xff] %v4540_v62 }
 0x208   :  { %2576 = vrot.lane.b32.xlu1 %v2567_v61, %s3962_s23  ;;  %v2660_v61 = vmul.f32 %v2657_v35, %v4260_v8 }
 0x209   :  { %2574 = vrot.lane.b32.xlu0 %v2566_v56, %s3962_s23  ;;  %v4542_v0 = vpop.permute.xlu0 %2182  ;;  %v4549_v29 = vpop.permute.xlu1 %2184  ;;  %v2684_v56 = vmul.f32 %v4262_v9, %v2617_v48 }
 0x20a   :  { %6548 = vst [vmem:[#allocation50_spill] sm:$0xff] %v4542_v0  ;;  %6549 = vst [vmem:[#allocation51_spill] sm:$0xff] %v4549_v29 }
 0x20c   :  { %2580 = vrot.lane.b32.xlu1 %v2569_v47, %s3962_s23 }
 0x20d   :  { %2578 = vrot.lane.b32.xlu0 %v2568_v63, %s3962_s23  ;;  %v4551_v36 = vpop.permute.xlu0 %2186  ;;  %v4561_v42 = vpop.permute.xlu1 %2188 }
 0x20e   :  { %6550 = vst [vmem:[#allocation52_spill] sm:$0xff] %v4551_v36  ;;  %6551 = vst [vmem:[#allocation53_spill] sm:$0xff] %v4561_v42  ;;  %v3706_v36 = vld [vmem:[%s6497_s10] ss:$0 sm:$0xff]  ;;  %s3639_s10 = sld [smem:[#allocation3 + $0x29]] }
 0x210   :  { %2602 = vrot.lane.b32.xlu1 %v2593_v3, %s3963_s28 }
 0x211   :  { %2600 = vrot.lane.b32.xlu0 %v2592_v12, %s3963_s28  ;;  %v4563_v45 = vpop.permute.xlu0 %2208  ;;  %v4570_v6 = vpop.permute.xlu1 %2210 }
 0x212   :  { %6552 = vst [vmem:[#allocation54_spill] sm:$0xff] %v4563_v45  ;;  %6553 = vst [vmem:[#allocation55_spill] sm:$0xff] %v4570_v6 }
 0x214   :  { %2606 = vrot.lane.b32.xlu1 %v2595_v22, %s3963_s28 }
 0x215   :  { %2604 = vrot.lane.b32.xlu0 %v2594_v23, %s3963_s28  ;;  %v4572_v47 = vpop.permute.xlu0 %2212  ;;  %v4575_v63 = vpop.permute.xlu1 %2214 }
 0x216   :  { %6554 = vst [vmem:[#allocation56_spill] sm:$0xff] %v4572_v47  ;;  %6555 = vst [vmem:[#allocation57_spill] sm:$0xff] %v4575_v63 }
 0x218   :  { %2642 = vrot.lane.b32.xlu1 %v2633_v27, %s3958_s19 }
 0x219   :  { %2640 = vrot.lane.b32.xlu0 %v2632_v28, %s3958_s19  ;;  %v4577_v2 = vpop.permute.xlu0 %2234  ;;  %v4579_v3 = vpop.permute.xlu1 %2236 }
 0x21a   :  { %6556 = vst [vmem:[#allocation58_spill] sm:$0xff] %v4577_v2  ;;  %6557 = vst [vmem:[#allocation59_spill] sm:$0xff] %v4579_v3 }
 0x21c   :  { %2646 = vrot.lane.b32.xlu1 %v2635_v4, %s3958_s19 }
 0x21d   :  { %2644 = vrot.lane.b32.xlu0 %v2634_v5, %s3958_s19 }
 0x21e   :  { %v4583_v8 = vpop.permute.xlu1 %2240 }
 0x21f   :  { %v4581_v10 = vpop.permute.xlu0 %2238  ;;  %6559 = vst [vmem:[#allocation61_spill] sm:$0xff] %v4583_v8 }
 0x220   :  { %2668 = vrot.lane.b32.xlu1 %v2659_v50, %s3959_s21  ;;  %6558 = vst [vmem:[#allocation60_spill] sm:$0xff] %v4581_v10 }
 0x221   :  { %2666 = vrot.lane.b32.xlu0 %v2658_v14, %s3959_s21 }
 0x222   :  { %v4587_v22 = vpop.permute.xlu1 %2262 }
 0x223   :  { %v4585_v12 = vpop.permute.xlu0 %2260  ;;  %6561 = vst [vmem:[#allocation63_spill] sm:$0xff] %v4587_v22 }
 0x224   :  { %2672 = vrot.lane.b32.xlu1 %v2661_v53, %s3959_s21  ;;  %6560 = vst [vmem:[#allocation62_spill] sm:$0xff] %v4585_v12 }
 0x225   :  { %2670 = vrot.lane.b32.xlu0 %v2660_v61, %s3959_s21 }
 0x226   :  { %v4591_v23 = vpop.permute.xlu1 %2266 }
 0x227   :  { %v4589_v9 = vpop.permute.xlu0 %2264  ;;  %6563 = vst [vmem:[#allocation65_spill] sm:$0xff] %v4591_v23 }
 0x228   :  { %6562 = vst [vmem:[#allocation64_spill] sm:$0xff] %v4589_v9 }
 0x229   :  { %2692 = vrot.lane.b32.xlu0 %v2684_v56, %s3960_s24 }
 0x22a   :  { %v4595_v48 = vpop.permute.xlu1 %2302 }
 0x22b   :  { %v4593_v26 = vpop.permute.xlu0 %2300  ;;  %6565 = vst [vmem:[#allocation67_spill] sm:$0xff] %v4595_v48 }
 0x22c   :  { %6564 = vst [vmem:[#allocation66_spill] sm:$0xff] %v4593_v26 }
 0x22e   :  { %v4599_v28 = vpop.permute.xlu1 %2306 }
 0x22f   :  { %v4597_v27 = vpop.permute.xlu0 %2304  ;;  %6567 = vst [vmem:[#allocation69_spill] sm:$0xff] %v4599_v28 }
 0x230   :  { %6566 = vst [vmem:[#allocation68_spill] sm:$0xff] %v4597_v27 }
 0x232   :  { %v4603_v5 = vpop.permute.xlu1 %2328 }
 0x233   :  { %v4601_v4 = vpop.permute.xlu0 %2326  ;;  %6569 = vst [vmem:[#allocation71_spill] sm:$0xff] %v4603_v5 }
 0x234   :  { %6568 = vst [vmem:[#allocation70_spill] sm:$0xff] %v4601_v4 }
 0x236   :  { %v4607_v37 = vpop.permute.xlu1 %2332 }
 0x237   :  { %v4605_v35 = vpop.permute.xlu0 %2330  ;;  %6571 = vst [vmem:[#allocation73_spill] sm:$0xff] %v4607_v37 }
 0x238   :  { %6570 = vst [vmem:[#allocation72_spill] sm:$0xff] %v4605_v35 }
 0x23a   :  { %v4611_v14 = vpop.permute.xlu1 %2354 }
 0x23b   :  { %v4609_v50 = vpop.permute.xlu0 %2352  ;;  %6573 = vst [vmem:[#allocation75_spill] sm:$0xff] %v4611_v14 }
 0x23c   :  { %6572 = vst [vmem:[#allocation74_spill] sm:$0xff] %v4609_v50 }
 0x23e   :  { %v4615_v61 = vpop.permute.xlu1 %2358 }
 0x23f   :  { %v4613_v53 = vpop.permute.xlu0 %2356  ;;  %6575 = vst [vmem:[#allocation77_spill] sm:$0xff] %v4615_v61 }
 0x240   :  { %6574 = vst [vmem:[#allocation76_spill] sm:$0xff] %v4613_v53  ;;  %v4869_v53 = vstv %s3631_s29  ;;  %s3642_s29 = sld [smem:[#allocation3 + $0x2c]] }
 0x242   :  { %v4619_v23 = vpop.permute.xlu1 %2380 }
 0x243   :  { %v4617_v56 = vpop.permute.xlu0 %2378  ;;  %6577 = vst [vmem:[#allocation79_spill] sm:$0xff] %v4619_v23  ;;  %v3703_v23 = vld [vmem:[%s6495_s8] ss:$0 sm:$0xff]  ;;  %s3623_s8 = sld [smem:[#allocation3 + $0x19]] }
 0x244   :  { %6576 = vst [vmem:[#allocation78_spill] sm:$0xff] %v4617_v56 }
 0x246   :  { %v4623_v48 = vpop.permute.xlu1 %2384  ;;  %v5063_v52 = vstv %s3642_s29  ;;  %s5822_s29 = sld [smem:[#allocation3 + $0x5d]] }
 0x247   :  { %v4621_v28 = vpop.permute.xlu0 %2382  ;;  %6579 = vst [vmem:[#allocation81_spill] sm:$0xff] %v4623_v48 }
 0x248   :  { %6578 = vst [vmem:[#allocation80_spill] sm:$0xff] %v4621_v28  ;;  %v4840_v28 = vstv %s3609_s1  ;;  %s3620_s1 = sld [smem:[#allocation3 + $0x16]] }
 0x24a   :  { %v4627_v8 = vpop.permute.xlu1 %2406 }
 0x24b   :  { %v4625_v5 = vpop.permute.xlu0 %2404  ;;  %6581 = vst [vmem:[#allocation83_spill] sm:$0xff] %v4627_v8 }
 0x24c   :  { %6580 = vst [vmem:[#allocation82_spill] sm:$0xff] %v4625_v5  ;;  %v4862_v5 = vstv %s3610_s0  ;;  %s3621_s0 = sld [smem:[#allocation3 + $0x17]] }
 0x24e   :  { %v4636_v42 = vpop.permute.xlu1 %2410  ;;  %v5025_v25 = vstv %s3620_s1  ;;  %s3689_s1 = sld [smem:[#allocation3 + $0x5b]] }
 0x24f   :  { %v4629_v37 = vpop.permute.xlu0 %2408  ;;  %6583 = vst [vmem:[#allocation85_spill] sm:$0xff] %v4636_v42 }
 0x250   :  { %6582 = vst [vmem:[#allocation84_spill] sm:$0xff] %v4629_v37 }
 0x252   :  { %v4642_v6 = vpop.permute.xlu1 %2432  ;;  %v5052_v59 = vstv %s3621_s0  ;;  %s3636_s0 = sld [smem:[#allocation3 + $0x26]] }
 0x253   :  { %v4638_v48 = vpop.permute.xlu0 %2430  ;;  %6585 = vst [vmem:[#allocation87_spill] sm:$0xff] %v4642_v6 }
 0x254   :  { %6584 = vst [vmem:[#allocation86_spill] sm:$0xff] %v4638_v48  ;;  %v4829_v48 = vstv %s3628_s25  ;;  %s3640_s25 = sld [smem:[#allocation3 + $0x2a]] }
 0x256   :  { %v4647_v57 = vpop.permute.xlu1 %2436 }
 0x257   :  { %6587 = vst [vmem:[#allocation89_spill] sm:$0xff] %v4647_v57 }
 0x25a   :  { %v4651_v42 = vpop.permute.xlu1 %2472  ;;  %v5012_v20 = vstv %s3640_s25  ;;  %s3629_s25 = sld [smem:[#allocation3 + $0x1f]] }
 0x25b   :  { %6589 = vst [vmem:[#allocation91_spill] sm:$0xff] %v4651_v42 }
 0x27e   :  { %v3739_v63 = vpop.f32.mrb[2].mxu0 }
 0x27f   :  { %v3744_v14 = vpop.f32.mrb[2].mxu1  ;;  %707 = vrot.lane.b32.xlu1 %v3739_v63, %s3957_s5  ;;  %v597_v22 = vpop.f32.mrb[3].mxu0 }
 0x280   :  { %v678_v61 = vpop.f32.mrb[3].mxu1  ;;  %705 = vrot.lane.b32.xlu0 %v597_v22, %s3957_s5  ;;  %v4645_v22 = vpop.permute.xlu0 %2434 }
 0x281   :  { %6586 = vst [vmem:[#allocation88_spill] sm:$0xff] %v4645_v22 }
 0x282   :  { %v3326_v3 = vpop.f32.mrb[4].mxu0 }
 0x283   :  { %711 = vrot.lane.b32.xlu1 %v3744_v14, %s3957_s5  ;;  %v3327_v8 = vadd.f32 %v3703_v23, %v3326_v3  ;;  %v3749_v62 = vpop.f32.mrb[5].mxu0  ;;  %v4655_v14 = vpop.permute.xlu1 %2476 }
 0x284   :  { %709 = vrot.lane.b32.xlu0 %v678_v61, %s3957_s5  ;;  %v4649_v29 = vpop.permute.xlu0 %2470  ;;  %6591 = vst [vmem:[#allocation93_spill] sm:$0xff] %v4655_v14  ;;  %s3602_s5 = sld [smem:[#allocation3 + $0x4]] }
 0x285   :  { %v3330_v63 = vmax.f32 %v3327_v8, 0.0  ;;  %6588 = vst [vmem:[#allocation90_spill] sm:$0xff] %v4649_v29 }
 0x287   :  { %3753 = vmatmul.mubr.msk.f32.vlgmr.msra.gmra.mrb[4].mxu1 %vm168_vm0, %v3330_v63  ;;  %v4659_v3 = vpop.permute.xlu1 %2498 }
 0x288   :  { %v4653_v15 = vpop.permute.xlu0 %2474  ;;  %6593 = vst [vmem:[#allocation95_spill] sm:$0xff] %v4659_v3 }
 0x289   :  { %6590 = vst [vmem:[#allocation92_spill] sm:$0xff] %v4653_v15  ;;  %v4811_v15 = vstv %s3607_s3  ;;  %s3619_s3 = sld [smem:[#allocation3 + $0x15]] }
 0x28b   :  { %v4663_v23 = vpop.permute.xlu1 %2502 }
 0x28c   :  { %v4657_v62 = vpop.permute.xlu0 %2496  ;;  %6595 = vst [vmem:[#allocation97_spill] sm:$0xff] %v4663_v23 }
 0x28d   :  { %6592 = vst [vmem:[#allocation94_spill] sm:$0xff] %v4657_v62 }
 0x28f   :  { %v4667_v63 = vpop.permute.xlu1 %2524 }
 0x290   :  { %v4661_v8 = vpop.permute.xlu0 %2500  ;;  %6597 = vst [vmem:[#allocation99_spill] sm:$0xff] %v4667_v63 }
 0x291   :  { %6594 = vst [vmem:[#allocation96_spill] sm:$0xff] %v4661_v8  ;;  %v4796_v8 = vstv %s3627_s22  ;;  %s3618_s22 = sld [smem:[#allocation3 + $0x14]] }
 0x293   :  { %v4671_v6 = vpop.permute.xlu1 %2528 }
 0x294   :  { %v4665_v61 = vpop.permute.xlu0 %2522  ;;  %6599 = vst [vmem:[#allocation101_spill] sm:$0xff] %v4671_v6 }
 0x295   :  { %6596 = vst [vmem:[#allocation98_spill] sm:$0xff] %v4665_v61 }
 0x297   :  { %v4675_v40 = vpop.permute.xlu1 %2550 }
 0x298   :  { %v4669_v57 = vpop.permute.xlu0 %2526  ;;  %6601 = vst [vmem:[#allocation103_spill] sm:$0xff] %v4675_v40 }
 0x299   :  { %6598 = vst [vmem:[#allocation100_spill] sm:$0xff] %v4669_v57 }
 0x29b   :  { %v4679_v46 = vpop.permute.xlu1 %2554 }
 0x29c   :  { %v4673_v42 = vpop.permute.xlu0 %2548  ;;  %6603 = vst [vmem:[#allocation105_spill] sm:$0xff] %v4679_v46 }
 0x29d   :  { %6600 = vst [vmem:[#allocation102_spill] sm:$0xff] %v4673_v42 }
 0x29f   :  { %v4683_v24 = vpop.permute.xlu1 %2576 }
 0x2a0   :  { %v4677_v14 = vpop.permute.xlu0 %2552  ;;  %6605 = vst [vmem:[#allocation107_spill] sm:$0xff] %v4683_v24 }
 0x2a1   :  { %6602 = vst [vmem:[#allocation104_spill] sm:$0xff] %v4677_v14  ;;  %v4772_v14 = vstv %s3626_s18  ;;  %s3638_s18 = sld [smem:[#allocation3 + $0x28]] }
 0x2a3   :  { %v4687_v21 = vpop.permute.xlu1 %2580 }
 0x2a4   :  { %v4681_v3 = vpop.permute.xlu0 %2574  ;;  %6607 = vst [vmem:[#allocation109_spill] sm:$0xff] %v4687_v21 }
 0x2a5   :  { %6604 = vst [vmem:[#allocation106_spill] sm:$0xff] %v4681_v3  ;;  %v4783_v3 = vstv %s3606_s20  ;;  %s5687_s20 = sld [smem:[#allocation3 + $0x58]] }
 0x2a7   :  { %v4691_v31 = vpop.permute.xlu1 %2602  ;;  %v4976_v32 = vstv %s3638_s18  ;;  %s3615_s18 = sld [smem:[#allocation3 + $0x11]] }
 0x2a8   :  { %v4685_v23 = vpop.permute.xlu0 %2578  ;;  %6609 = vst [vmem:[#allocation111_spill] sm:$0xff] %v4691_v31 }
 0x2a9   :  { %6606 = vst [vmem:[#allocation108_spill] sm:$0xff] %v4685_v23 }
 0x2ab   :  { %v4695_v13 = vpop.permute.xlu1 %2606 }
 0x2ac   :  { %v4689_v63 = vpop.permute.xlu0 %2600  ;;  %6611 = vst [vmem:[#allocation113_spill] sm:$0xff] %v4695_v13 }
 0x2ad   :  { %6608 = vst [vmem:[#allocation110_spill] sm:$0xff] %v4689_v63 }
 0x2af   :  { %v4699_v30 = vpop.permute.xlu1 %2642 }
 0x2b0   :  { %v4693_v6 = vpop.permute.xlu0 %2604  ;;  %6613 = vst [vmem:[#allocation115_spill] sm:$0xff] %v4699_v30 }
 0x2b1   :  { %6610 = vst [vmem:[#allocation112_spill] sm:$0xff] %v4693_v6  ;;  %v4757_v6 = vstv %s3625_s7  ;;  %s3637_s7 = sld [smem:[#allocation3 + $0x27]] }
 0x2b3   :  { %v4703_v43 = vpop.permute.xlu1 %2646 }
 0x2b4   :  { %v4697_v40 = vpop.permute.xlu0 %2640  ;;  %6615 = vst [vmem:[#allocation117_spill] sm:$0xff] %v4703_v43 }
 0x2b5   :  { %6612 = vst [vmem:[#allocation114_spill] sm:$0xff] %v4697_v40 }
 0x2b7   :  { %v4707_v58 = vpop.permute.xlu1 %2668 }
 0x2b8   :  { %v4701_v46 = vpop.permute.xlu0 %2644  ;;  %6617 = vst [vmem:[#allocation119_spill] sm:$0xff] %v4707_v58  ;;  %v4719_v58 = vstv %s3623_s8  ;;  %s3634_s8 = sld [smem:[#allocation3 + $0x24]] }
 0x2b9   :  { %6614 = vst [vmem:[#allocation116_spill] sm:$0xff] %v4701_v46  ;;  %v4741_v46 = vstv %s3624_s15  ;;  %s3635_s15 = sld [smem:[#allocation3 + $0x25]] }
 0x2bb   :  { %v4711_v38 = vpop.permute.xlu1 %2672 }
 0x2bc   :  { %v4705_v24 = vpop.permute.xlu0 %2666  ;;  %6619 = vst [vmem:[#allocation121_spill] sm:$0xff] %v4711_v38  ;;  %v4721_v38 = vstv %s3602_s5  ;;  %s3614_s5 = sld [smem:[#allocation3 + $0x10]] }
 0x2bd   :  { %6616 = vst [vmem:[#allocation118_spill] sm:$0xff] %v4705_v24  ;;  %v4744_v24 = vstv %s3603_s16  ;;  %s3616_s16 = sld [smem:[#allocation3 + $0x12]] }
 0x2c0   :  { %v4709_v21 = vpop.permute.xlu0 %2670 }
 0x2c1   :  { %6618 = vst [vmem:[#allocation120_spill] sm:$0xff] %v4709_v21 }
 0x2c3   :  { %v4944_v12 = vstv %s3616_s16  ;;  %s3682_s16 = sld [smem:[#allocation3 + $0x54]] }
 0x2c4   :  { %v4713_v31 = vpop.permute.xlu0 %2692 }
 0x2c5   :  { %6620 = vst [vmem:[#allocation122_spill] sm:$0xff] %v4713_v31 }
 0x2f1   :  { %v708_v13 = vpop.permute.xlu1 %707 }
 0x2f2   :  { %719 = vst.msk [vmem:[#allocation2 + $0xb] sm:$0xff] %vm717_vm8, %v708_v13  ;;  %v706_v30 = vpop.permute.xlu0 %705 }
 0x2f3   :  { %718 = vst.msk [vmem:[#allocation2 + $0x3] sm:$0xff] %vm717_vm8, %v706_v30 }
 0x2f5   :  { %v712_v51 = vpop.permute.xlu1 %711 }
 0x2f6   :  { %721 = vst.msk [vmem:[#allocation2 + $0x23] sm:$0xff] %vm717_vm8, %v712_v51  ;;  %v710_v43 = vpop.permute.xlu0 %709 }
 0x2f7   :  { %720 = vst.msk [vmem:[#allocation2 + $0x1b] sm:$0xff] %vm717_vm8, %v710_v43 }
 0x2f9   :  { %v4723_v49 = vld [vmem:[#allocation2 + $0xb] sm:$0xff] }
 0x2fa   :  { %v4725_v33 = vld [vmem:[#allocation2] sm:$0xff]  ;;  %v1273_v13 = vmul.f32 %v4719_v58, %v4723_v49  ;;  %v1377_v29 = vmul.f32 %v4796_v8, %v4723_v49 }
 0x2fb   :  { %v762_v30 = vmul.f32 %v4721_v38, %v4725_v33  ;;  %v866_v42 = vmul.f32 %v4783_v3, %v4725_v33  ;;  %v5076_v34 = vld [vmem:[#allocation2 + $0x3] sm:$0xff] }
 0x2fc   :  { %1282 = vrot.lane.b32.xlu1 %v1273_v13, %s3958_s19  ;;  %v1299_v13 = vmul.f32 %v4741_v46, %v4723_v49  ;;  %6631 = vst [vmem:[#allocation133_spill] sm:$0xff] %v5076_v34  ;;  %v1298_v18 = vmul.f32 %v4741_v46, %v5076_v34 }
 0x2fd   :  { %770 = vrot.lane.b32.xlu0 %v762_v30, %s3958_s19  ;;  %v4733_v43 = vld [vmem:[#allocation2 + $0x23] sm:$0xff]  ;;  %v788_v30 = vmul.f32 %v4744_v24, %v4725_v33 }
 0x2fe   :  { %v4735_v51 = vld [vmem:[#allocation2 + $0x18] sm:$0xff]  ;;  %v1275_v21 = vmul.f32 %v4719_v58, %v4733_v43  ;;  %v1301_v40 = vmul.f32 %v4741_v46, %v4733_v43  ;;  %v750_v23 = vld [vmem:[#allocation2 + $0x20] sm:$0xff] }
 0x2ff   :  { %v764_v31 = vmul.f32 %v4721_v38, %v4735_v51  ;;  %v4787_v57 = vmul.f32 %v4721_v38, %v750_v23  ;;  %v4814_v62 = vmul.f32 %v4783_v3, %v750_v23  ;;  %v4819_v22 = vmul.f32 %v4811_v15, %v750_v23  ;;  %v4966_v19 = vld [vmem:[#allocation2 + $0x25] sm:$0xff] }
 0x300   :  { %1286 = vrot.lane.b32.xlu1 %v1275_v21, %s3958_s19  ;;  %v790_v21 = vmul.f32 %v4744_v24, %v4735_v51  ;;  %v868_v37 = vmul.f32 %v4783_v3, %v4735_v51 }
 0x301   :  { %774 = vrot.lane.b32.xlu0 %v764_v31, %s3958_s19  ;;  %v4760_v31 = vstv %s3604_s17  ;;  %s3617_s17 = sld [smem:[#allocation3 + $0x13]] }
 0x302   :  { %v817_v63 = vmul.f32 %v4760_v31, %v750_v23 }
 0x304   :  { %1308 = vrot.lane.b32.xlu1 %v1299_v13, %s3959_s21  ;;  %v1325_v13 = vmul.f32 %v4757_v6, %v4723_v49 }
 0x305   :  { %796 = vrot.lane.b32.xlu0 %v788_v30, %s3959_s21  ;;  %v814_v30 = vmul.f32 %v4760_v31, %v4725_v33 }
 0x308   :  { %1312 = vrot.lane.b32.xlu1 %v1301_v40, %s3959_s21  ;;  %v1327_v40 = vmul.f32 %v4757_v6, %v4733_v43 }
 0x309   :  { %800 = vrot.lane.b32.xlu0 %v790_v21, %s3959_s21  ;;  %v1351_v21 = vmul.f32 %v4772_v14, %v4723_v49 }
 0x30c   :  { %1334 = vrot.lane.b32.xlu1 %v1325_v13, %s3960_s24  ;;  %v4778_v13 = vstv %s3605_s6  ;;  %s5638_s6 = sld [smem:[#allocation3 + $0x56]] }
 0x30d   :  { %822 = vrot.lane.b32.xlu0 %v814_v30, %s3960_s24  ;;  %v842_v30 = vmul.f32 %v4778_v13, %v4735_v51  ;;  %v4808_v61 = vmul.f32 %v4778_v13, %v750_v23 }
 0x310   :  { %1338 = vrot.lane.b32.xlu1 %v1327_v40, %s3960_s24  ;;  %v4792_v40 = vmul.f32 %v4744_v24, %v750_v23  ;;  %v1403_v23 = vmul.f32 %v4829_v48, %v4723_v49  ;;  %v4849_v49 = vstv %s3630_s27  ;;  %s3641_s27 = sld [smem:[#allocation3 + $0x2b]] }
 0x311   :  { %828 = vrot.lane.b32.xlu0 %v817_v63, %s3960_s24  ;;  %v1353_v63 = vmul.f32 %v4772_v14, %v4733_v43 }
 0x314   :  { %1360 = vrot.lane.b32.xlu1 %v1351_v21, %s3961_s26  ;;  %v4800_v21 = vmul.f32 %v4760_v31, %v4735_v51 }
 0x315   :  { %852 = vrot.lane.b32.xlu0 %v842_v30, %s3961_s26  ;;  %v4804_v30 = vmul.f32 %v4778_v13, %v4725_v33 }
 0x318   :  { %1364 = vrot.lane.b32.xlu1 %v1353_v63, %s3961_s26  ;;  %v892_v63 = vmul.f32 %v4811_v15, %v4725_v33  ;;  %v1405_v33 = vmul.f32 %v4829_v48, %v4733_v43 }
 0x319   :  { %874 = vrot.lane.b32.xlu0 %v866_v42, %s3962_s23  ;;  %v1379_v42 = vmul.f32 %v4796_v8, %v4733_v43 }
 0x31c   :  { %1386 = vrot.lane.b32.xlu1 %v1377_v29, %s3962_s23  ;;  %v894_v29 = vmul.f32 %v4811_v15, %v4735_v51  ;;  %v4851_v51 = vld [vmem:[#allocation2 + $0x19] sm:$0xff] }
 0x31d   :  { %878 = vrot.lane.b32.xlu0 %v868_v37, %s3962_s23  ;;  %v4837_v37 = vld [vmem:[#allocation2 + $0x1] sm:$0xff]  ;;  %v934_v43 = vmul.f32 %v4840_v28, %v4851_v51  ;;  %v960_v56 = vmul.f32 %v4862_v5, %v4851_v51 }
 0x320   :  { %1390 = vrot.lane.b32.xlu1 %v1379_v42, %s3962_s23  ;;  %v932_v42 = vmul.f32 %v4840_v28, %v4837_v37 }
 0x321   :  { %900 = vrot.lane.b32.xlu0 %v892_v63, %s3963_s28  ;;  %v4847_v63 = vld [vmem:[#allocation2 + $0xc] sm:$0xff] }
 0x324   :  { %1412 = vrot.lane.b32.xlu1 %v1403_v23, %s3963_s28  ;;  %v1443_v23 = vmul.f32 %v4849_v49, %v4847_v63 }
 0x325   :  { %904 = vrot.lane.b32.xlu0 %v894_v29, %s3963_s28  ;;  %v4859_v29 = vld [vmem:[#allocation2 + $0x24] sm:$0xff] }
 0x326   :  { %v1471_v35 = vmul.f32 %v4869_v53, %v4859_v29 }
 0x328   :  { %1416 = vrot.lane.b32.xlu1 %v1405_v33, %s3963_s28  ;;  %v1445_v33 = vmul.f32 %v4849_v49, %v4859_v29 }
 0x329   :  { %940 = vrot.lane.b32.xlu0 %v932_v42, %s3958_s19  ;;  %v958_v42 = vmul.f32 %v4862_v5, %v4837_v37 }
 0x32c   :  { %1452 = vrot.lane.b32.xlu1 %v1443_v23, %s3958_s19  ;;  %v1469_v23 = vmul.f32 %v4869_v53, %v4847_v63 }
 0x32d   :  { %944 = vrot.lane.b32.xlu0 %v934_v43, %s3958_s19  ;;  %v4878_v43 = vstv %s3611_s2  ;;  %s3644_s2 = sld [smem:[#allocation3 + $0x2e]] }
 0x32e   :  { %v986_v50 = vmul.f32 %v4878_v43, %v4851_v51 }
 0x330   :  { %1456 = vrot.lane.b32.xlu1 %v1445_v33, %s3958_s19  ;;  %v984_v33 = vmul.f32 %v4878_v43, %v4837_v37 }
 0x331   :  { %966 = vrot.lane.b32.xlu0 %v958_v42, %s3959_s21  ;;  %v4885_v42 = vstv %s3632_s4  ;;  %s3645_s4 = sld [smem:[#allocation3 + $0x2f]] }
 0x332   :  { %v1497_v27 = vmul.f32 %v4885_v42, %v4859_v29 }
 0x334   :  { %1478 = vrot.lane.b32.xlu1 %v1469_v23, %s3959_s21  ;;  %v1495_v23 = vmul.f32 %v4885_v42, %v4847_v63 }
 0x335   :  { %970 = vrot.lane.b32.xlu0 %v960_v56, %s3959_s21  ;;  %v4894_v56 = vstv %s3612_s30  ;;  %s3646_s30 = sld [smem:[#allocation3 + $0x30]] }
 0x336   :  { %v1012_v4 = vmul.f32 %v4894_v56, %v4851_v51 }
 0x337   :  { %v5115_v17 = vstv %s3645_s4  ;;  %s5864_s4 = sld [smem:[#allocation3 + $0x5f]] }
 0x338   :  { %1482 = vrot.lane.b32.xlu1 %v1471_v35, %s3959_s21  ;;  %v1010_v35 = vmul.f32 %v4894_v56, %v4837_v37 }
 0x339   :  { %992 = vrot.lane.b32.xlu0 %v984_v33, %s3960_s24  ;;  %v4901_v33 = vstv %s3633_s9  ;;  %s3647_s9 = sld [smem:[#allocation3 + $0x31]] }
 0x33a   :  { %v1523_v9 = vmul.f32 %v4901_v33, %v4859_v29 }
 0x33c   :  { %1504 = vrot.lane.b32.xlu1 %v1495_v23, %s3960_s24  ;;  %v1521_v23 = vmul.f32 %v4901_v33, %v4847_v63 }
 0x33d   :  { %996 = vrot.lane.b32.xlu0 %v986_v50, %s3960_s24  ;;  %v4910_v50 = vstv %s3613_s14  ;;  %s3648_s14 = sld [smem:[#allocation3 + $0x32]] }
 0x33e   :  { %v1038_v26 = vmul.f32 %v4910_v50, %v4851_v51 }
 0x340   :  { %1508 = vrot.lane.b32.xlu1 %v1497_v27, %s3960_s24  ;;  %v1036_v27 = vmul.f32 %v4910_v50, %v4837_v37 }
 0x341   :  { %1018 = vrot.lane.b32.xlu0 %v1010_v35, %s3961_s26  ;;  %v4917_v35 = vstv %s3634_s8  ;;  %s3649_s8 = sld [smem:[#allocation3 + $0x33]] }
 0x342   :  { %v1549_v10 = vmul.f32 %v4917_v35, %v4859_v29 }
 0x344   :  { %1530 = vrot.lane.b32.xlu1 %v1521_v23, %s3961_s26  ;;  %v1547_v23 = vmul.f32 %v4917_v35, %v4847_v63 }
 0x345   :  { %1022 = vrot.lane.b32.xlu0 %v1012_v4, %s3961_s26  ;;  %v4926_v4 = vstv %s3614_s5  ;;  %s3601_s5 = sld [smem:[#allocation3 + $0x3]] }
 0x346   :  { %v1064_v47 = vmul.f32 %v4926_v4, %v4851_v51 }
 0x348   :  { %1534 = vrot.lane.b32.xlu1 %v1523_v9, %s3961_s26  ;;  %v1062_v9 = vmul.f32 %v4926_v4, %v4837_v37 }
 0x349   :  { %1044 = vrot.lane.b32.xlu0 %v1036_v27, %s3962_s23  ;;  %v4933_v27 = vstv %s3635_s15  ;;  %s3600_s15 = sld [smem:[#allocation3 + $0x2]] }
 0x34c   :  { %1556 = vrot.lane.b32.xlu1 %v1547_v23, %s3962_s23  ;;  %v1573_v23 = vmul.f32 %v4933_v27, %v4847_v63  ;;  %v4953_v63 = vstv %s3637_s7  ;;  %s3608_s7 = sld [smem:[#allocation3 + $0xa]] }
 0x34d   :  { %1048 = vrot.lane.b32.xlu0 %v1038_v26, %s3962_s23  ;;  %v4942_v26 = vld [vmem:[#allocation2 + $0x2] sm:$0xff] }
 0x34e   :  { %6621 = vst [vmem:[#allocation123_spill] sm:$0xff] %v4942_v26  ;;  %v1102_v37 = vmul.f32 %v4944_v12, %v4942_v26  ;;  %v1206_v11 = vmul.f32 %v5025_v25, %v4942_v26 }
 0x350   :  { %1560 = vrot.lane.b32.xlu1 %v1549_v10, %s3962_s23  ;;  %v1575_v10 = vmul.f32 %v4933_v27, %v4859_v29 }
 0x351   :  { %1070 = vrot.lane.b32.xlu0 %v1062_v9, %s3963_s28  ;;  %v4951_v9 = vld [vmem:[#allocation2 + $0xd] sm:$0xff] }
 0x354   :  { %1582 = vrot.lane.b32.xlu1 %v1573_v23, %s3963_s28  ;;  %v4956_v23 = vld [vmem:[#allocation2 + $0x1a] sm:$0xff] }
 0x355   :  { %1074 = vrot.lane.b32.xlu0 %v1064_v47, %s3963_s28  ;;  %6622 = vst [vmem:[#allocation124_spill] sm:$0xff] %v4956_v23  ;;  %v1613_v47 = vmul.f32 %v4953_v63, %v4951_v9  ;;  %v1104_v2 = vmul.f32 %v4944_v12, %v4956_v23  ;;  %v1208_v44 = vmul.f32 %v5025_v25, %v4956_v23 }
 0x356   :  { %v1234_v7 = vmul.f32 %v5052_v59, %v4956_v23 }
 0x358   :  { %1586 = vrot.lane.b32.xlu1 %v1575_v10, %s3963_s28  ;;  %v4969_v10 = vstv %s3617_s17  ;;  %s3683_s17 = sld [smem:[#allocation3 + $0x55]] }
 0x359   :  { %1110 = vrot.lane.b32.xlu0 %v1102_v37, %s3958_s19  ;;  %v1615_v37 = vmul.f32 %v4953_v63, %v4966_v19  ;;  %v1128_v60 = vmul.f32 %v4969_v10, %v4942_v26 }
 0x35a   :  { %v3408_v29 = vpop.f32.mrb[4].mxu1 }
 0x35b   :  { %v3409_v45 = vadd.f32 %v3706_v36, %v3408_v29  ;;  %v3754_v54 = vpop.f32.mrb[5].mxu1  ;;  %v1130_v36 = vmul.f32 %v4969_v10, %v4956_v23 }
 0x35c   :  { %1622 = vrot.lane.b32.xlu1 %v1613_v47, %s3958_s19  ;;  %v1639_v54 = vmul.f32 %v4976_v32, %v4951_v9 }
 0x35d   :  { %1114 = vrot.lane.b32.xlu0 %v1104_v2, %s3958_s19  ;;  %v3708_v0 = vmul.f32 -1.442695, %v3409_v45  ;;  %v4985_v45 = vstv %s3618_s22  ;;  %s3622_s22 = sld [smem:[#allocation3 + $0x18]] }
 0x35e   :  { %v1154_v2 = vmul.f32 %v4985_v45, %v4942_v26 }
 0x35f   :  { %3806 = vpow2.f32 %v3708_v0  ;;  %v1641_v0 = vmul.f32 %v4976_v32, %v4966_v19 }
 0x360   :  { %1626 = vrot.lane.b32.xlu1 %v1615_v37, %s3958_s19 }
 0x361   :  { %1136 = vrot.lane.b32.xlu0 %v1128_v60, %s3959_s21  ;;  %v4992_v60 = vstv %s3639_s10  ;;  %s3687_s10 = sld [smem:[#allocation3 + $0x59]] }
 0x362   :  { %v1665_v29 = vmul.f32 %v4992_v60, %v4951_v9 }
 0x364   :  { %1648 = vrot.lane.b32.xlu1 %v1639_v54, %s3959_s21  ;;  %v1156_v54 = vmul.f32 %v4985_v45, %v4956_v23 }
 0x365   :  { %1140 = vrot.lane.b32.xlu0 %v1130_v36, %s3959_s21  ;;  %v5001_v36 = vstv %s3619_s3  ;;  %s3688_s3 = sld [smem:[#allocation3 + $0x5a]] }
 0x366   :  { %v1182_v1 = vmul.f32 %v5001_v36, %v4956_v23  ;;  %v5103_v23 = vld [vmem:[#allocation2 + $0x26] sm:$0xff] }
 0x368   :  { %1652 = vrot.lane.b32.xlu1 %v1641_v0, %s3959_s21  ;;  %v1667_v0 = vmul.f32 %v4992_v60, %v4966_v19 }
 0x369   :  { %v3807_v47 = vpop.eup %3806  ;;  %1162 = vrot.lane.b32.xlu0 %v1154_v2, %s3960_s24 }
 0x36a   :  { %v3415_v37 = vadd.f32 1.0, %v3807_v47  ;;  %v1180_v47 = vmul.f32 %v5001_v36, %v4942_v26 }
 0x36c   :  { %1674 = vrot.lane.b32.xlu1 %v1665_v29, %s3960_s24  ;;  %3808 = vrcp.f32 %v3415_v37  ;;  %v1691_v37 = vmul.f32 %v5012_v20, %v4951_v9 }
 0x36d   :  { %1166 = vrot.lane.b32.xlu0 %v1156_v54, %s3960_s24 }
 0x36e   :  { %v5004_v41 = vpop.permute.xlu1 %1282 }
 0x36f   :  { %6623 = vst [vmem:[#allocation125_spill] sm:$0xff] %v5004_v41  ;;  %v5008_v2 = vpop.permute.xlu0 %770  ;;  %v5038_v41 = vstv %s3641_s27  ;;  %s3690_s27 = sld [smem:[#allocation3 + $0x5c]] }
 0x370   :  { %1678 = vrot.lane.b32.xlu1 %v1667_v0, %s3960_s24 }
 0x371   :  { %1188 = vrot.lane.b32.xlu0 %v1180_v47, %s3961_s26 }
 0x372   :  { %v5016_v29 = vpop.permute.xlu1 %1286 }
 0x373   :  { %6624 = vst [vmem:[#allocation126_spill] sm:$0xff] %v5016_v29  ;;  %v5020_v54 = vpop.permute.xlu0 %774  ;;  %v1693_v29 = vmul.f32 %v5012_v20, %v4966_v19 }
 0x374   :  { %1700 = vrot.lane.b32.xlu1 %v1691_v37, %s3961_s26  ;;  %v1717_v37 = vmul.f32 %v5038_v41, %v4951_v9 }
 0x375   :  { %1192 = vrot.lane.b32.xlu0 %v1182_v1, %s3961_s26 }
 0x376   :  { %v5028_v0 = vpop.eup %3808  ;;  %v5030_v47 = vpop.permute.xlu1 %1308 }
 0x377   :  { %6625 = vst [vmem:[#allocation127_spill] sm:$0xff] %v5028_v0  ;;  %6626 = vst [vmem:[#allocation128_spill] sm:$0xff] %v5030_v47  ;;  %v5034_v55 = vpop.permute.xlu0 %796 }
 0x378   :  { %3755 = vpush %v5028_v0  ;;  %1704 = vrot.lane.b32.xlu1 %v1693_v29, %s3961_s26 }
 0x379   :  { %1214 = vrot.lane.b32.xlu0 %v1206_v11, %s3962_s23  ;;  %v1719_v11 = vmul.f32 %v5038_v41, %v4966_v19 }
 0x37a   :  { %v5043_v1 = vpop.permute.xlu1 %1312 }
 0x37b   :  { %6627 = vst [vmem:[#allocation129_spill] sm:$0xff] %v5043_v1  ;;  %v5047_v47 = vpop.permute.xlu0 %800  ;;  %v1232_v1 = vmul.f32 %v5052_v59, %v4942_v26 }
 0x37c   :  { %1726 = vrot.lane.b32.xlu1 %v1717_v37, %s3962_s23 }
 0x37d   :  { %1218 = vrot.lane.b32.xlu0 %v1208_v44, %s3962_s23  ;;  %v1743_v44 = vmul.f32 %v5063_v52, %v4951_v9  ;;  %v1272_v9 = vmul.f32 %v4719_v58, %v5076_v34 }
 0x37e   :  { %v5055_v39 = vpop.permute.xlu1 %1334 }
 0x37f   :  { %6628 = vst [vmem:[#allocation130_spill] sm:$0xff] %v5055_v39  ;;  %v5059_v29 = vpop.permute.xlu0 %822 }
 0x380   :  { %1730 = vrot.lane.b32.xlu1 %v1719_v11, %s3962_s23 }
 0x381   :  { %1240 = vrot.lane.b32.xlu0 %v1232_v1, %s3963_s28  ;;  %v1745_v1 = vmul.f32 %v5063_v52, %v4966_v19 }
 0x382   :  { %v5067_v37 = vpop.permute.xlu1 %1338 }
 0x383   :  { %6629 = vst [vmem:[#allocation131_spill] sm:$0xff] %v5067_v37  ;;  %v5071_v39 = vpop.permute.xlu0 %828  ;;  %v5087_v37 = vld [vmem:[#allocation2 + $0xe] sm:$0xff] }
 0x384   :  { %6630 = vst [vmem:[#allocation132_spill] sm:$0xff] %v5071_v39  ;;  %1752 = vrot.lane.b32.xlu1 %v1743_v44, %s3963_s28  ;;  %v5089_v39 = vstv %s3644_s2  ;;  %v5092_v44 = vld [vmem:[#allocation2 + $0x1b] sm:$0xff]  ;;  %s5846_s2 = sld [smem:[#allocation3 + $0x2d]] }
 0x385   :  { %1244 = vrot.lane.b32.xlu0 %v1234_v7, %s3963_s28  ;;  %6633 = vst [vmem:[#allocation135_spill] sm:$0xff] %v5092_v44  ;;  %v1783_v19 = vmul.f32 %v5089_v39, %v5087_v37  ;;  %v1274_v26 = vmul.f32 %v4719_v58, %v5092_v44 }
 0x386   :  { %v5079_v0 = vpop.permute.xlu1 %1360 }
 0x387   :  { %6632 = vst [vmem:[#allocation134_spill] sm:$0xff] %v5079_v0  ;;  %v5083_v11 = vpop.permute.xlu0 %852 }
 0x388   :  { %1756 = vrot.lane.b32.xlu1 %v1745_v1, %s3963_s28 }
 0x389   :  { %1280 = vrot.lane.b32.xlu0 %v1272_v9, %s3958_s19  ;;  %v1785_v9 = vmul.f32 %v5089_v39, %v5103_v23 }
 0x38a   :  { %v5095_v7 = vpop.permute.xlu1 %1364 }
 0x38b   :  { %6634 = vst [vmem:[#allocation136_spill] sm:$0xff] %v5095_v7  ;;  %v5099_v0 = vpop.permute.xlu0 %874 }
 0x38c   :  { %6635 = vst [vmem:[#allocation137_spill] sm:$0xff] %v5099_v0  ;;  %1792 = vrot.lane.b32.xlu1 %v1783_v19, %s3958_s19  ;;  %v5137_v0 = vstv %s3646_s30  ;;  %s3694_s30 = sld [smem:[#allocation3 + $0x60]] }
 0x38d   :  { %1284 = vrot.lane.b32.xlu0 %v1274_v26, %s3958_s19  ;;  %v1809_v26 = vmul.f32 %v5115_v17, %v5087_v37 }
 0x38e   :  { %v5107_v1 = vpop.permute.xlu1 %1386 }
 0x38f   :  { %6636 = vst [vmem:[#allocation138_spill] sm:$0xff] %v5107_v1  ;;  %v5111_v7 = vpop.permute.xlu0 %878  ;;  %v1300_v1 = vmul.f32 %v4741_v46, %v5092_v44 }
 0x390   :  { %1796 = vrot.lane.b32.xlu1 %v1785_v9, %s3958_s19  ;;  %v1811_v9 = vmul.f32 %v5115_v17, %v5103_v23 }
 0x391   :  { %1306 = vrot.lane.b32.xlu0 %v1298_v18, %s3959_s21 }
 0x392   :  { %v5119_v58 = vpop.permute.xlu1 %1390 }
 0x393   :  { %6637 = vst [vmem:[#allocation139_spill] sm:$0xff] %v5119_v58  ;;  %v5123_v19 = vpop.permute.xlu0 %900  ;;  %v1324_v58 = vmul.f32 %v4757_v6, %v5076_v34 }
 0x394   :  { %6638 = vst [vmem:[#allocation140_spill] sm:$0xff] %v5123_v19  ;;  %1818 = vrot.lane.b32.xlu1 %v1809_v26, %s3959_s21 }
 0x395   :  { %1310 = vrot.lane.b32.xlu0 %v1300_v1, %s3959_s21  ;;  %v1835_v1 = vmul.f32 %v5137_v0, %v5087_v37 }
 0x396   :  { %v5129_v16 = vpop.permute.xlu1 %1412 }
 0x397   :  { %6639 = vst [vmem:[#allocation141_spill] sm:$0xff] %v5129_v16  ;;  %v5133_v18 = vpop.permute.xlu0 %904  ;;  %v1326_v16 = vmul.f32 %v4757_v6, %v5092_v44 }
 0x398   :  { %6640 = vst [vmem:[#allocation142_spill] sm:$0xff] %v5133_v18  ;;  %1822 = vrot.lane.b32.xlu1 %v1811_v9, %s3959_s21  ;;  %v1837_v9 = vmul.f32 %v5137_v0, %v5103_v23  ;;  %v5159_v18 = vstv %s3647_s9  ;;  %s3695_s9 = sld [smem:[#allocation3 + $0x61]] }
 0x399   :  { %1332 = vrot.lane.b32.xlu0 %v1324_v58, %s3960_s24 }
 0x39a   :  { %v5141_v46 = vpop.permute.xlu1 %1416 }
 0x39b   :  { %6641 = vst [vmem:[#allocation143_spill] sm:$0xff] %v5141_v46  ;;  %v5145_v26 = vpop.permute.xlu0 %940  ;;  %v1350_v46 = vmul.f32 %v4772_v14, %v5076_v34 }
 0x39c   :  { %6642 = vst [vmem:[#allocation144_spill] sm:$0xff] %v5145_v26  ;;  %1844 = vrot.lane.b32.xlu1 %v1835_v1, %s3960_s24 }
 0x39d   :  { %1336 = vrot.lane.b32.xlu0 %v1326_v16, %s3960_s24  ;;  %v1861_v16 = vmul.f32 %v5159_v18, %v5087_v37 }
 0x39e   :  { %v5151_v19 = vpop.permute.xlu1 %1452 }
 0x39f   :  { %6643 = vst [vmem:[#allocation145_spill] sm:$0xff] %v5151_v19  ;;  %v5155_v58 = vpop.permute.xlu0 %944  ;;  %v1352_v19 = vmul.f32 %v4772_v14, %v5092_v44 }
 0x3a0   :  { %6644 = vst [vmem:[#allocation146_spill] sm:$0xff] %v5155_v58  ;;  %1848 = vrot.lane.b32.xlu1 %v1837_v9, %s3960_s24  ;;  %v1863_v9 = vmul.f32 %v5159_v18, %v5103_v23  ;;  %v5181_v58 = vstv %s3648_s14  ;;  %s3650_s14 = sld [smem:[#allocation3 + $0x34]] }
 0x3a1   :  { %1358 = vrot.lane.b32.xlu0 %v1350_v46, %s3961_s26 }
 0x3a2   :  { %v5163_v6 = vpop.permute.xlu1 %1456 }
 0x3a3   :  { %6645 = vst [vmem:[#allocation147_spill] sm:$0xff] %v5163_v6  ;;  %v5167_v1 = vpop.permute.xlu0 %966  ;;  %v1376_v6 = vmul.f32 %v4796_v8, %v5076_v34 }
 0x3a4   :  { %6646 = vst [vmem:[#allocation148_spill] sm:$0xff] %v5167_v1  ;;  %1870 = vrot.lane.b32.xlu1 %v1861_v16, %s3961_s26 }
 0x3a5   :  { %1362 = vrot.lane.b32.xlu0 %v1352_v19, %s3961_s26  ;;  %v1887_v19 = vmul.f32 %v5181_v58, %v5087_v37 }
 0x3a6   :  { %v5173_v26 = vpop.permute.xlu1 %1478 }
 0x3a7   :  { %6647 = vst [vmem:[#allocation149_spill] sm:$0xff] %v5173_v26  ;;  %v5177_v46 = vpop.permute.xlu0 %970  ;;  %v1378_v26 = vmul.f32 %v4796_v8, %v5092_v44 }
 0x3a8   :  { %6648 = vst [vmem:[#allocation150_spill] sm:$0xff] %v5177_v46  ;;  %1874 = vrot.lane.b32.xlu1 %v1863_v9, %s3961_s26  ;;  %v1889_v9 = vmul.f32 %v5181_v58, %v5103_v23  ;;  %v5203_v46 = vstv %s3649_s8  ;;  %s3965_s8 = smov 121  }
 0x3a9   :  { %1384 = vrot.lane.b32.xlu0 %v1376_v6, %s3962_s23 }
 0x3aa   :  { %v5185_v14 = vpop.permute.xlu1 %1482 }
 0x3ab   :  { %6649 = vst [vmem:[#allocation151_spill] sm:$0xff] %v5185_v14  ;;  %v5189_v16 = vpop.permute.xlu0 %992  ;;  %v1402_v14 = vmul.f32 %v4829_v48, %v5076_v34 }
 0x3ac   :  { %6650 = vst [vmem:[#allocation152_spill] sm:$0xff] %v5189_v16  ;;  %1896 = vrot.lane.b32.xlu1 %v1887_v19, %s3962_s23  ;;  %v5216_v16 = vld [vmem:[#allocation2 + $0x4] sm:$0xff] }
 0x3ad   :  { %1388 = vrot.lane.b32.xlu0 %v1378_v26, %s3962_s23  ;;  %v1913_v26 = vmul.f32 %v5203_v46, %v5087_v37  ;;  %6653 = vst [vmem:[#allocation155_spill] sm:$0xff] %v5216_v16  ;;  %v1442_v37 = vmul.f32 %v4849_v49, %v5216_v16 }
 0x3ae   :  { %v5195_v1 = vpop.permute.xlu1 %1504 }
 0x3af   :  { %6651 = vst [vmem:[#allocation153_spill] sm:$0xff] %v5195_v1  ;;  %v5199_v6 = vpop.permute.xlu0 %996  ;;  %v1404_v1 = vmul.f32 %v4829_v48, %v5092_v44  ;;  %v5230_v48 = vld [vmem:[#allocation2 + $0x1c] sm:$0xff] }
 0x3b0   :  { %1900 = vrot.lane.b32.xlu1 %v1889_v9, %s3962_s23  ;;  %6655 = vst [vmem:[#allocation157_spill] sm:$0xff] %v5230_v48 }
 0x3b1   :  { %1410 = vrot.lane.b32.xlu0 %v1402_v14, %s3963_s28  ;;  %v1915_v14 = vmul.f32 %v5203_v46, %v5103_v23  ;;  %v1444_v23 = vmul.f32 %v4849_v49, %v5230_v48 }
 0x3b2   :  { %v5207_v8 = vpop.permute.xlu1 %1508 }
 0x3b3   :  { %6652 = vst [vmem:[#allocation154_spill] sm:$0xff] %v5207_v8  ;;  %v5211_v19 = vpop.permute.xlu0 %1018  ;;  %v5227_v8 = vld [vmem:[#allocation2 + $0x8] sm:$0xff] }
 0x3b4   :  { %1922 = vrot.lane.b32.xlu1 %v1913_v26, %s3963_s28  ;;  %v789_v49 = vmul.f32 %v4744_v24, %v5227_v8 }
 0x3b5   :  { %1414 = vrot.lane.b32.xlu0 %v1404_v1, %s3963_s28  ;;  %v763_v1 = vmul.f32 %v4721_v38, %v5227_v8 }
 0x3b6   :  { %v5219_v34 = vpop.permute.xlu1 %1530 }
 0x3b7   :  { %6654 = vst [vmem:[#allocation156_spill] sm:$0xff] %v5219_v34  ;;  %v5223_v9 = vpop.permute.xlu0 %1022 }
 0x3b8   :  { %1926 = vrot.lane.b32.xlu1 %v1915_v14, %s3963_s28 }
 0x3b9   :  { %1450 = vrot.lane.b32.xlu0 %v1442_v37, %s3958_s19  ;;  %v1468_v37 = vmul.f32 %v4869_v53, %v5216_v16 }
 0x3ba   :  { %v5233_v26 = vpop.permute.xlu1 %1534 }
 0x3bb   :  { %6656 = vst [vmem:[#allocation158_spill] sm:$0xff] %v5233_v26  ;;  %v5237_v34 = vpop.permute.xlu0 %1044 }
 0x3bc   :  { %772 = vrot.lane.b32.xlu1 %v763_v1, %s3958_s19 }
 0x3bd   :  { %1454 = vrot.lane.b32.xlu0 %v1444_v23, %s3958_s19  ;;  %v1470_v23 = vmul.f32 %v4869_v53, %v5230_v48  ;;  %v815_v53 = vmul.f32 %v4760_v31, %v5227_v8 }
 0x3be   :  { %v5243_v44 = vpop.permute.xlu1 %1556 }
 0x3bf   :  { %6657 = vst [vmem:[#allocation159_spill] sm:$0xff] %v5243_v44  ;;  %v5245_v14 = vpop.permute.xlu0 %1048 }
 0x3c0   :  { %776 = vrot.lane.b32.xlu1 %v4787_v57, %s3958_s19  ;;  %v1494_v57 = vmul.f32 %v4885_v42, %v5216_v16 }
 0x3c1   :  { %1476 = vrot.lane.b32.xlu0 %v1468_v37, %s3959_s21 }
 0x3c2   :  { %v5252_v38 = vpop.permute.xlu1 %1560 }
 0x3c3   :  { %6658 = vst [vmem:[#allocation160_spill] sm:$0xff] %v5252_v38  ;;  %v5256_v1 = vpop.permute.xlu0 %1070 }
 0x3c4   :  { %798 = vrot.lane.b32.xlu1 %v789_v49, %s3959_s21  ;;  %v1496_v49 = vmul.f32 %v4885_v42, %v5230_v48  ;;  %v1522_v42 = vmul.f32 %v4901_v33, %v5230_v48 }
 0x3c5   :  { %1480 = vrot.lane.b32.xlu0 %v1470_v23, %s3959_s21 }
 0x3c6   :  { %v5262_v26 = vpop.permute.xlu1 %1582 }
 0x3c7   :  { %6659 = vst [vmem:[#allocation161_spill] sm:$0xff] %v5262_v26  ;;  %v5264_v44 = vpop.permute.xlu0 %1074  ;;  %v5486_v26 = vld [vmem:[#allocation2 + $0xa] sm:$0xff] }
 0x3c8   :  { %802 = vrot.lane.b32.xlu1 %v4792_v40, %s3959_s21  ;;  %v1520_v40 = vmul.f32 %v4901_v33, %v5216_v16  ;;  %6686 = vst [vmem:[#allocation188_spill] sm:$0xff] %v5486_v26 }
 0x3c9   :  { %1502 = vrot.lane.b32.xlu0 %v1494_v57, %s3960_s24 }
 0x3ca   :  { %v5271_v24 = vpop.permute.xlu1 %1586 }
 0x3cb   :  { %6660 = vst [vmem:[#allocation162_spill] sm:$0xff] %v5271_v24  ;;  %v5275_v37 = vpop.permute.xlu0 %1110 }
 0x3cc   :  { %824 = vrot.lane.b32.xlu1 %v815_v53, %s3960_s24 }
 0x3cd   :  { %1506 = vrot.lane.b32.xlu0 %v1496_v49, %s3960_s24  ;;  %v841_v49 = vmul.f32 %v4778_v13, %v5227_v8 }
 0x3ce   :  { %v5281_v23 = vpop.permute.xlu1 %1622 }
 0x3cf   :  { %6661 = vst [vmem:[#allocation163_spill] sm:$0xff] %v5281_v23  ;;  %v5283_v38 = vpop.permute.xlu0 %1114 }
 0x3d0   :  { %826 = vrot.lane.b32.xlu1 %v4800_v21, %s3960_s24 }
 0x3d1   :  { %1528 = vrot.lane.b32.xlu0 %v1520_v40, %s3961_s26  ;;  %v1546_v40 = vmul.f32 %v4917_v35, %v5216_v16 }
 0x3d2   :  { %v5290_v31 = vpop.permute.xlu1 %1626 }
 0x3d3   :  { %6662 = vst [vmem:[#allocation164_spill] sm:$0xff] %v5290_v31  ;;  %v5292_v57 = vpop.permute.xlu0 %1136 }
 0x3d4   :  { %848 = vrot.lane.b32.xlu1 %v4804_v30, %s3961_s26  ;;  %v1548_v30 = vmul.f32 %v4917_v35, %v5230_v48 }
 0x3d5   :  { %1532 = vrot.lane.b32.xlu0 %v1522_v42, %s3961_s26  ;;  %v867_v42 = vmul.f32 %v4783_v3, %v5227_v8  ;;  %v5336_v3 = vld [vmem:[#allocation2 + $0x5] sm:$0xff] }
 0x3d6   :  { %v5299_v53 = vpop.permute.xlu1 %1648  ;;  %6667 = vst [vmem:[#allocation169_spill] sm:$0xff] %v5336_v3 }
 0x3d7   :  { %6663 = vst [vmem:[#allocation165_spill] sm:$0xff] %v5299_v53  ;;  %v5303_v21 = vpop.permute.xlu0 %1140  ;;  %v5370_v53 = vld [vmem:[#allocation2 + $0x21] sm:$0xff] }
 0x3d8   :  { %850 = vrot.lane.b32.xlu1 %v841_v49, %s3961_s26 }
 0x3d9   :  { %1554 = vrot.lane.b32.xlu0 %v1546_v40, %s3962_s23  ;;  %v1572_v40 = vmul.f32 %v4933_v27, %v5216_v16  ;;  %v3827_v16 = vld [vmem:[#allocation2] sm:$0xff] }
 0x3da   :  { %v5309_v33 = vpop.permute.xlu1 %1652 }
 0x3db   :  { %6664 = vst [vmem:[#allocation166_spill] sm:$0xff] %v5309_v33  ;;  %v5311_v31 = vpop.permute.xlu0 %1162 }
 0x3dc   :  { %854 = vrot.lane.b32.xlu1 %v4808_v61, %s3961_s26  ;;  %v1574_v61 = vmul.f32 %v4933_v27, %v5230_v48  ;;  %v5348_v27 = vld [vmem:[#allocation2 + $0x1d] sm:$0xff]  ;;  %v5574_v48 = vstv %s3600_s15  ;;  %s6015_s15 = sld [smem:[#allocation3 + $0x42]] }
 0x3dd   :  { %1558 = vrot.lane.b32.xlu0 %v1548_v30, %s3962_s23  ;;  %6669 = vst [vmem:[#allocation171_spill] sm:$0xff] %v5348_v27 }
 0x3de   :  { %v5318_v13 = vpop.permute.xlu1 %1674 }
 0x3df   :  { %6665 = vst [vmem:[#allocation167_spill] sm:$0xff] %v5318_v13  ;;  %v5322_v49 = vpop.permute.xlu0 %1166 }
 0x3e0   :  { %876 = vrot.lane.b32.xlu1 %v867_v42, %s3962_s23  ;;  %v893_v42 = vmul.f32 %v4811_v15, %v5227_v8 }
 0x3e1   :  { %1580 = vrot.lane.b32.xlu0 %v1572_v40, %s3963_s28 }
 0x3e2   :  { %v5328_v35 = vpop.permute.xlu1 %1678 }
 0x3e3   :  { %6666 = vst [vmem:[#allocation168_spill] sm:$0xff] %v5328_v35  ;;  %v5330_v33 = vpop.permute.xlu0 %1188  ;;  %v1612_v35 = vmul.f32 %v4953_v63, %v5336_v3 }
 0x3e4   :  { %880 = vrot.lane.b32.xlu1 %v4814_v62, %s3962_s23 }
 0x3e5   :  { %1584 = vrot.lane.b32.xlu0 %v1574_v61, %s3963_s28  ;;  %v1614_v61 = vmul.f32 %v4953_v63, %v5348_v27 }
 0x3e6   :  { %v5339_v30 = vpop.permute.xlu1 %1700 }
 0x3e7   :  { %6668 = vst [vmem:[#allocation170_spill] sm:$0xff] %v5339_v30  ;;  %v5343_v40 = vpop.permute.xlu0 %1192  ;;  %v5357_v30 = vld [vmem:[#allocation2 + $0x9] sm:$0xff] }
 0x3e8   :  { %902 = vrot.lane.b32.xlu1 %v893_v42, %s3963_s28  ;;  %v933_v42 = vmul.f32 %v4840_v28, %v5357_v30 }
 0x3e9   :  { %1620 = vrot.lane.b32.xlu0 %v1612_v35, %s3958_s19 }
 0x3ea   :  { %v5351_v62 = vpop.permute.xlu1 %1704 }
 0x3eb   :  { %6670 = vst [vmem:[#allocation172_spill] sm:$0xff] %v5351_v62  ;;  %v5353_v13 = vpop.permute.xlu0 %1214  ;;  %v1638_v62 = vmul.f32 %v4976_v32, %v5336_v3 }
 0x3ec   :  { %906 = vrot.lane.b32.xlu1 %v4819_v22, %s3963_s28  ;;  %v935_v22 = vmul.f32 %v4840_v28, %v5370_v53 }
 0x3ed   :  { %1624 = vrot.lane.b32.xlu0 %v1614_v61, %s3958_s19 }
 0x3ee   :  { %v5362_v15 = vpop.permute.xlu1 %1726 }
 0x3ef   :  { %6671 = vst [vmem:[#allocation173_spill] sm:$0xff] %v5362_v15  ;;  %v5366_v35 = vpop.permute.xlu0 %1218  ;;  %v1640_v15 = vmul.f32 %v4976_v32, %v5348_v27  ;;  %v961_v32 = vmul.f32 %v4862_v5, %v5370_v53 }
 0x3f0   :  { %942 = vrot.lane.b32.xlu1 %v933_v42, %s3958_s19  ;;  %v959_v42 = vmul.f32 %v4862_v5, %v5357_v30 }
 0x3f1   :  { %1646 = vrot.lane.b32.xlu0 %v1638_v62, %s3959_s21 }
 0x3f2   :  { %v5374_v63 = vpop.permute.xlu1 %1730 }
 0x3f3   :  { %6672 = vst [vmem:[#allocation174_spill] sm:$0xff] %v5374_v63  ;;  %v5378_v61 = vpop.permute.xlu0 %1240  ;;  %v1664_v63 = vmul.f32 %v4992_v60, %v5336_v3 }
 0x3f4   :  { %946 = vrot.lane.b32.xlu1 %v935_v22, %s3958_s19  ;;  %v1666_v22 = vmul.f32 %v4992_v60, %v5348_v27  ;;  %v987_v60 = vmul.f32 %v4878_v43, %v5370_v53 }
 0x3f5   :  { %1650 = vrot.lane.b32.xlu0 %v1640_v15, %s3959_s21 }
 0x3f6   :  { %v5384_v24 = vpop.permute.xlu1 %1752 }
 0x3f7   :  { %6673 = vst [vmem:[#allocation175_spill] sm:$0xff] %v5384_v24  ;;  %v5388_v62 = vpop.permute.xlu0 %1244 }
 0x3f8   :  { %968 = vrot.lane.b32.xlu1 %v959_v42, %s3959_s21  ;;  %v985_v42 = vmul.f32 %v4878_v43, %v5357_v30 }
 0x3f9   :  { %1672 = vrot.lane.b32.xlu0 %v1664_v63, %s3960_s24 }
 0x3fa   :  { %v5394_v28 = vpop.permute.xlu1 %1756 }
 0x3fb   :  { %6674 = vst [vmem:[#allocation176_spill] sm:$0xff] %v5394_v28  ;;  %v5398_v15 = vpop.permute.xlu0 %1280  ;;  %v1690_v28 = vmul.f32 %v5012_v20, %v5336_v3 }
 0x3fc   :  { %972 = vrot.lane.b32.xlu1 %v961_v32, %s3959_s21 }
 0x3fd   :  { %1676 = vrot.lane.b32.xlu0 %v1666_v22, %s3960_s24  ;;  %v1692_v22 = vmul.f32 %v5012_v20, %v5348_v27  ;;  %v1013_v20 = vmul.f32 %v4894_v56, %v5370_v53 }
 0x3fe   :  { %v5404_v24 = vpop.permute.xlu1 %1792 }
 0x3ff   :  { %6675 = vst [vmem:[#allocation177_spill] sm:$0xff] %v5404_v24  ;;  %v5408_v63 = vpop.permute.xlu0 %1284 }
 0x400   :  { %994 = vrot.lane.b32.xlu1 %v985_v42, %s3960_s24  ;;  %v1011_v42 = vmul.f32 %v4894_v56, %v5357_v30 }
 0x401   :  { %1698 = vrot.lane.b32.xlu0 %v1690_v28, %s3961_s26 }
 0x402   :  { %v5414_v5 = vpop.permute.xlu1 %1796 }
 0x403   :  { %6676 = vst [vmem:[#allocation178_spill] sm:$0xff] %v5414_v5  ;;  %v5418_v32 = vpop.permute.xlu0 %1306  ;;  %v1716_v5 = vmul.f32 %v5038_v41, %v5336_v3 }
 0x404   :  { %998 = vrot.lane.b32.xlu1 %v987_v60, %s3960_s24 }
 0x405   :  { %1702 = vrot.lane.b32.xlu0 %v1692_v22, %s3961_s26  ;;  %v1718_v22 = vmul.f32 %v5038_v41, %v5348_v27  ;;  %v1039_v41 = vmul.f32 %v4910_v50, %v5370_v53 }
 0x406   :  { %v5424_v24 = vpop.permute.xlu1 %1818 }
 0x407   :  { %6677 = vst [vmem:[#allocation179_spill] sm:$0xff] %v5424_v24  ;;  %v5428_v28 = vpop.permute.xlu0 %1310 }
 0x408   :  { %1020 = vrot.lane.b32.xlu1 %v1011_v42, %s3961_s26  ;;  %v1037_v42 = vmul.f32 %v4910_v50, %v5357_v30 }
 0x409   :  { %1724 = vrot.lane.b32.xlu0 %v1716_v5, %s3962_s23 }
 0x40a   :  { %v5434_v43 = vpop.permute.xlu1 %1822 }
 0x40b   :  { %6678 = vst [vmem:[#allocation180_spill] sm:$0xff] %v5434_v43  ;;  %v5438_v60 = vpop.permute.xlu0 %1332  ;;  %v1742_v43 = vmul.f32 %v5063_v52, %v5336_v3  ;;  %v5498_v3 = vld [vmem:[#allocation2 + $0x22] sm:$0xff] }
 0x40c   :  { %1024 = vrot.lane.b32.xlu1 %v1013_v20, %s3961_s26  ;;  %6688 = vst [vmem:[#allocation190_spill] sm:$0xff] %v5498_v3 }
 0x40d   :  { %1728 = vrot.lane.b32.xlu0 %v1718_v22, %s3962_s23  ;;  %v1744_v22 = vmul.f32 %v5063_v52, %v5348_v27 }
 0x40e   :  { %v5444_v24 = vpop.permute.xlu1 %1844 }
 0x40f   :  { %6679 = vst [vmem:[#allocation181_spill] sm:$0xff] %v5444_v24  ;;  %v5448_v5 = vpop.permute.xlu0 %1336  ;;  %v5463_v24 = vld [vmem:[#allocation2 + $0x6] sm:$0xff] }
 0x410   :  { %1046 = vrot.lane.b32.xlu1 %v1037_v42, %s3962_s23  ;;  %6681 = vst [vmem:[#allocation183_spill] sm:$0xff] %v5463_v24  ;;  %v1782_v50 = vmul.f32 %v5089_v39, %v5463_v24 }
 0x411   :  { %1750 = vrot.lane.b32.xlu0 %v1742_v43, %s3963_s28  ;;  %v1063_v43 = vmul.f32 %v4926_v4, %v5357_v30 }
 0x412   :  { %v5454_v56 = vpop.permute.xlu1 %1848 }
 0x413   :  { %6680 = vst [vmem:[#allocation182_spill] sm:$0xff] %v5454_v56  ;;  %v5458_v20 = vpop.permute.xlu0 %1358  ;;  %v5475_v56 = vld [vmem:[#allocation2 + $0x1e] sm:$0xff] }
 0x414   :  { %1050 = vrot.lane.b32.xlu1 %v1039_v41, %s3962_s23  ;;  %6683 = vst [vmem:[#allocation185_spill] sm:$0xff] %v5475_v56  ;;  %v1065_v41 = vmul.f32 %v4926_v4, %v5370_v53  ;;  %v1808_v4 = vmul.f32 %v5115_v17, %v5463_v24 }
 0x415   :  { %1754 = vrot.lane.b32.xlu0 %v1744_v22, %s3963_s28 }
 0x416   :  { %v5466_v23 = vpop.permute.xlu1 %1870 }
 0x417   :  { %6682 = vst [vmem:[#allocation184_spill] sm:$0xff] %v5466_v23  ;;  %v5470_v42 = vpop.permute.xlu0 %1362  ;;  %v1784_v23 = vmul.f32 %v5089_v39, %v5475_v56 }
 0x418   :  { %1072 = vrot.lane.b32.xlu1 %v1063_v43, %s3963_s28 }
 0x419   :  { %1790 = vrot.lane.b32.xlu0 %v1782_v50, %s3958_s19  ;;  %v1103_v50 = vmul.f32 %v4944_v12, %v5486_v26 }
 0x41a   :  { %v5478_v52 = vpop.permute.xlu1 %1874 }
 0x41b   :  { %6684 = vst [vmem:[#allocation186_spill] sm:$0xff] %v5478_v52  ;;  %v5482_v22 = vpop.permute.xlu0 %1384 }
 0x41c   :  { %6685 = vst [vmem:[#allocation187_spill] sm:$0xff] %v5482_v22  ;;  %1076 = vrot.lane.b32.xlu1 %v1065_v41, %s3963_s28  ;;  %v1888_v22 = vmul.f32 %v5181_v58, %v5475_v56 }
 0x41d   :  { %1794 = vrot.lane.b32.xlu0 %v1784_v23, %s3958_s19  ;;  %v1105_v23 = vmul.f32 %v4944_v12, %v5498_v3 }
 0x41e   :  { %v5490_v43 = vpop.permute.xlu1 %1896 }
 0x41f   :  { %6687 = vst [vmem:[#allocation189_spill] sm:$0xff] %v5490_v43  ;;  %v5494_v52 = vpop.permute.xlu0 %1388  ;;  %v1810_v43 = vmul.f32 %v5115_v17, %v5475_v56  ;;  %v1131_v17 = vmul.f32 %v4969_v10, %v5498_v3 }
 0x420   :  { %1112 = vrot.lane.b32.xlu1 %v1103_v50, %s3958_s19  ;;  %v1129_v50 = vmul.f32 %v4969_v10, %v5486_v26 }
 0x421   :  { %1816 = vrot.lane.b32.xlu0 %v1808_v4, %s3959_s21 }
 0x422   :  { %v5502_v39 = vpop.permute.xlu1 %1900 }
 0x423   :  { %6689 = vst [vmem:[#allocation191_spill] sm:$0xff] %v5502_v39  ;;  %v5506_v41 = vpop.permute.xlu0 %1410  ;;  %v1834_v39 = vmul.f32 %v5137_v0, %v5463_v24 }
 0x424   :  { %6690 = vst [vmem:[#allocation192_spill] sm:$0xff] %v5506_v41  ;;  %1116 = vrot.lane.b32.xlu1 %v1105_v23, %s3958_s19  ;;  %v1836_v23 = vmul.f32 %v5137_v0, %v5475_v56  ;;  %v1157_v0 = vmul.f32 %v4985_v45, %v5498_v3 }
 0x425   :  { %1820 = vrot.lane.b32.xlu0 %v1810_v43, %s3959_s21 }
 0x426   :  { %v5512_v27 = vpop.permute.xlu1 %1922 }
 0x427   :  { %6691 = vst [vmem:[#allocation193_spill] sm:$0xff] %v5512_v27  ;;  %v5516_v4 = vpop.permute.xlu0 %1414 }
 0x428   :  { %1138 = vrot.lane.b32.xlu1 %v1129_v50, %s3959_s21  ;;  %v1155_v50 = vmul.f32 %v4985_v45, %v5486_v26  ;;  %v1886_v45 = vmul.f32 %v5181_v58, %v5463_v24  ;;  %v1912_v58 = vmul.f32 %v5203_v46, %v5463_v24 }
 0x429   :  { %1842 = vrot.lane.b32.xlu0 %v1834_v39, %s3960_s24 }
 0x42a   :  { %v5522_v12 = vpop.permute.xlu1 %1926 }
 0x42b   :  { %6692 = vst [vmem:[#allocation194_spill] sm:$0xff] %v5522_v12  ;;  %v5526_v43 = vpop.permute.xlu0 %1450  ;;  %v1860_v12 = vmul.f32 %v5159_v18, %v5463_v24  ;;  %v1914_v24 = vmul.f32 %v5203_v46, %v5475_v56  ;;  %v5611_v46 = vstv %s3608_s7  ;;  %s6082_s7 = sld [smem:[#allocation3 + $0x49]] }
 0x42c   :  { %6693 = vst [vmem:[#allocation195_spill] sm:$0xff] %v5526_v43  ;;  %1142 = vrot.lane.b32.xlu1 %v1131_v17, %s3959_s21 }
 0x42d   :  { %1846 = vrot.lane.b32.xlu0 %v1836_v23, %s3960_s24  ;;  %v1862_v23 = vmul.f32 %v5159_v18, %v5475_v56  ;;  %v3826_v18 = vld [vmem:[#allocation2 + $0x18] sm:$0xff]  ;;  %v5636_v56 = vstv %s3683_s17 }
 0x42e   :  { %v5532_v27 = vpop.permute.xlu1 %772 }
 0x42f   :  { %v5536_v39 = vpop.permute.xlu0 %1454 }
 0x430   :  { %6694 = vst [vmem:[#allocation196_spill] sm:$0xff] %v5536_v39  ;;  %1164 = vrot.lane.b32.xlu1 %v1155_v50, %s3960_s24  ;;  %v5560_v39 = vstv %s3601_s5  ;;  %s5957_s5 = sld [smem:[#allocation3 + $0x3b]] }
 0x431   :  { %1868 = vrot.lane.b32.xlu0 %v1860_v12, %s3961_s26  ;;  %v1181_v12 = vmul.f32 %v5001_v36, %v5486_v26 }
 0x432   :  { %v5542_v10 = vpop.permute.xlu1 %776 }
 0x433   :  { %v5546_v17 = vpop.permute.xlu0 %1476 }
 0x434   :  { %6695 = vst [vmem:[#allocation197_spill] sm:$0xff] %v5546_v17  ;;  %1168 = vrot.lane.b32.xlu1 %v1157_v0, %s3960_s24  ;;  %v754_v17 = vmul.f32 %v3826_v18, %v5560_v39 }
 0x435   :  { %1872 = vrot.lane.b32.xlu0 %v1862_v23, %s3961_s26  ;;  %v1183_v23 = vmul.f32 %v5001_v36, %v5498_v3  ;;  %v1207_v36 = vmul.f32 %v5025_v25, %v5486_v26 }
 0x436   :  { %v5552_v43 = vpop.permute.xlu1 %798 }
 0x437   :  { %v5556_v50 = vpop.permute.xlu0 %1480 }
 0x438   :  { %6696 = vst [vmem:[#allocation198_spill] sm:$0xff] %v5556_v50  ;;  %1190 = vrot.lane.b32.xlu1 %v1181_v12, %s3961_s26  ;;  %v752_v50 = vmul.f32 %v3827_v16, %v5560_v39  ;;  %v758_v12 = vadd.f32 %v754_v17, %v5574_v48 }
 0x439   :  { %1894 = vrot.lane.b32.xlu0 %v1886_v45, %s3962_s23 }
 0x43a   :  { %v5565_v0 = vpop.permute.xlu1 %802  ;;  %v756_v16 = vadd.f32 %v752_v50, %v5574_v48  ;;  %v784_v18 = vadd.f32 %v5020_v54, %v758_v12  ;;  %v1209_v50 = vmul.f32 %v5025_v25, %v5498_v3  ;;  %v1233_v25 = vmul.f32 %v5052_v59, %v5486_v26  ;;  %v3831_v26 = vld [vmem:[#allocation2 + $0x4c] sm:$0xff] }
 0x43b   :  { %v5570_v41 = vpop.permute.xlu0 %1502 }
 0x43c   :  { %6697 = vst [vmem:[#allocation199_spill] sm:$0xff] %v5570_v41  ;;  %1194 = vrot.lane.b32.xlu1 %v1183_v23, %s3961_s26  ;;  %v810_v17 = vadd.f32 %v5047_v47, %v784_v18 }
 0x43d   :  { %1898 = vrot.lane.b32.xlu0 %v1888_v22, %s3962_s23  ;;  %v782_v22 = vadd.f32 %v5008_v2, %v756_v16 }
 0x43e   :  { %v5579_v45 = vpop.permute.xlu1 %824 }
 0x43f   :  { %v5585_v41 = vpop.permute.xlu0 %1506  ;;  %v808_v54 = vadd.f32 %v5034_v55, %v782_v22  ;;  %v6700_v22 = vld [vmem:[#allocation137_spill] sm:$0xff] }
 0x440   :  { %6698 = vst [vmem:[#allocation200_spill] sm:$0xff] %v5585_v41  ;;  %1216 = vrot.lane.b32.xlu1 %v1207_v36, %s3962_s23 }
 0x441   :  { %1920 = vrot.lane.b32.xlu0 %v1912_v58, %s3963_s28  ;;  %v834_v2 = vadd.f32 %v5059_v29, %v808_v54  ;;  %v5609_v58 = vstv %s3682_s16  ;;  %v924_v29 = vmul.f32 %v5611_v46, %v4851_v51  ;;  %v5622_v54 = vld [vmem:[#allocation2 + $0x34] sm:$0xff]  ;;  %v753_v51 = vmul.f32 %v5560_v39, %v5227_v8  ;;  %s6054_s16 = sld [smem:[#allocation3 + $0x64]] }
 0x442   :  { %v827_v23 = vpop.permute.xlu1 %826 }
 0x443   :  { %v836_v12 = vadd.f32 %v827_v23, %v810_v17  ;;  %v5596_v41 = vpop.permute.xlu0 %1528  ;;  %v6701_v23 = vld [vmem:[#allocation15_spill] sm:$0xff]  ;;  %v757_v8 = vadd.f32 %v753_v51, %v5574_v48 }
 0x444   :  { %1220 = vrot.lane.b32.xlu1 %v1209_v50, %s3962_s23  ;;  %v1235_v50 = vmul.f32 %v5052_v59, %v5498_v3  ;;  %v3830_v59 = vld [vmem:[#allocation2 + $0x20] sm:$0xff] }
 0x445   :  { %v862_v47 = vadd.f32 %v5083_v11, %v836_v12  ;;  %1924 = vrot.lane.b32.xlu0 %v1914_v24, %s3963_s28  ;;  %v6699_v11 = vld [vmem:[#allocation142_spill] sm:$0xff]  ;;  %v2710_v12 = vmul.f32 %v5622_v54, %v5609_v58 }
 0x446   :  { %v849_v36 = vpop.permute.xlu1 %848 }
 0x447   :  { %v888_v55 = vadd.f32 %v5111_v7, %v862_v47  ;;  %v860_v16 = vadd.f32 %v849_v36, %v834_v2  ;;  %v5607_v18 = vpop.permute.xlu0 %1532  ;;  %v3829_v2 = vld [vmem:[#allocation2 + $0x1] sm:$0xff] }
 0x448   :  { %1242 = vrot.lane.b32.xlu1 %v1233_v25, %s3963_s28  ;;  %v922_v47 = vmul.f32 %v3829_v2, %v5611_v46  ;;  %v6702_v25 = vld [vmem:[#allocation140_spill] sm:$0xff] }
 0x449   :  { %v914_v24 = vadd.f32 %v6699_v11, %v888_v55  ;;  %v886_v17 = vadd.f32 %v6700_v22, %v860_v16  ;;  %2696 = vrot.lane.b32.xlu0 %v6701_v23, %s3960_s24  ;;  %v755_v11 = vmul.f32 %v3830_v59, %v5560_v39  ;;  %v6703_v22 = vld [vmem:[#allocation146_spill] sm:$0xff]  ;;  %v2712_v39 = vmul.f32 %v3831_v26, %v5609_v58  ;;  %v6707_v59 = vld [vmem:[#allocation148_spill] sm:$0xff] }
 0x44a   :  { %v851_v7 = vpop.permute.xlu1 %850 }
 0x44b   :  { %v928_v36 = vadd.f32 %v924_v29, %v914_v24  ;;  %v912_v55 = vadd.f32 %v6702_v25, %v886_v17  ;;  %v5630_v16 = vpop.permute.xlu0 %1554  ;;  %v6704_v29 = vld [vmem:[#allocation150_spill] sm:$0xff]  ;;  %v6705_v17 = vld [vmem:[#allocation144_spill] sm:$0xff] }
 0x44c   :  { %1246 = vrot.lane.b32.xlu1 %v1235_v50, %s3963_s28 }
 0x44d   :  { %v954_v23 = vadd.f32 %v6703_v22, %v928_v36  ;;  %v926_v3 = vadd.f32 %v922_v47, %v912_v55  ;;  %2718 = vrot.lane.b32.xlu0 %v2710_v12, %s3961_s26  ;;  %v6706_v47 = vld [vmem:[#allocation16_spill] sm:$0xff]  ;;  %v783_v12 = vadd.f32 %v5532_v27, %v757_v8  ;;  %v759_v36 = vadd.f32 %v755_v11, %v5574_v48  ;;  %v6709_v11 = vld [vmem:[#allocation17_spill] sm:$0xff] }
 0x44e   :  { %v855_v2 = vpop.permute.xlu1 %854  ;;  %v6708_v27 = vld [vmem:[#allocation152_spill] sm:$0xff] }
 0x44f   :  { %v980_v24 = vadd.f32 %v6704_v29, %v954_v23  ;;  %v952_v25 = vadd.f32 %v6705_v17, %v926_v3  ;;  %v5643_v50 = vpop.permute.xlu0 %1558  ;;  %v2736_v3 = vmul.f32 %v5622_v54, %v5636_v56  ;;  %v785_v23 = vadd.f32 %v5542_v10, %v759_v36 }
 0x450   :  { %2694 = vrot.lane.b32.xlu1 %v6706_v47, %s3960_s24  ;;  %v809_v29 = vadd.f32 %v5552_v43, %v783_v12  ;;  %v5670_v43 = vld [vmem:[#allocation2 + $0x3c] sm:$0xff]  ;;  %v2738_v12 = vmul.f32 %v3831_v26, %v5636_v56  ;;  %v5676_v36 = vstv %s5638_s6 }
 0x451   :  { %v1006_v55 = vadd.f32 %v5199_v6, %v980_v24  ;;  %v978_v51 = vadd.f32 %v6707_v59, %v952_v25  ;;  %2722 = vrot.lane.b32.xlu0 %v2712_v39, %s3961_s26  ;;  %v5661_v6 = vstv %s3615_s18  ;;  %v811_v24 = vadd.f32 %v5565_v0, %v785_v23  ;;  %v6712_v23 = vld [vmem:[#allocation132_spill] sm:$0xff] }
 0x452   :  { %v877_v22 = vpop.permute.xlu1 %876  ;;  %v835_v25 = vadd.f32 %v5579_v45, %v809_v29  ;;  %v2711_v47 = vmul.f32 %v5670_v43, %v5609_v58 }
 0x453   :  { %v1032_v17 = vadd.f32 %v5223_v9, %v1006_v55  ;;  %v1004_v8 = vadd.f32 %v6708_v27, %v978_v51  ;;  %v5659_v48 = vpop.permute.xlu0 %1580  ;;  %v6710_v55 = vld [vmem:[#allocation124_spill] sm:$0xff]  ;;  %v6711_v51 = vld [vmem:[#allocation123_spill] sm:$0xff]  ;;  %v837_v29 = vadd.f32 %v6712_v23, %v811_v24 }
 0x454   :  { %2698 = vrot.lane.b32.xlu1 %v6709_v11, %s3960_s24  ;;  %v1094_v0 = vmul.f32 %v5661_v6, %v6710_v55  ;;  %v2762_v11 = vmul.f32 %v5622_v54, %v5676_v36 }
 0x455   :  { %v1058_v10 = vadd.f32 %v5245_v14, %v1032_v17  ;;  %v1030_v39 = vadd.f32 %v5211_v19, %v1004_v8  ;;  %2744 = vrot.lane.b32.xlu0 %v2736_v3, %s3962_s23  ;;  %v861_v19 = vadd.f32 %v851_v7, %v835_v25  ;;  %v1092_v3 = vmul.f32 %v5661_v6, %v6711_v51 }
 0x456   :  { %v881_v9 = vpop.permute.xlu1 %880  ;;  %v923_v25 = vmul.f32 %v5611_v46, %v5357_v30  ;;  %v863_v24 = vadd.f32 %v855_v2, %v837_v29  ;;  %v2764_v2 = vmul.f32 %v3831_v26, %v5676_v36  ;;  %v5732_v29 = vstv %s3622_s22 }
 0x457   :  { %v1084_v45 = vadd.f32 %v5264_v44, %v1058_v10  ;;  %v1056_v14 = vadd.f32 %v5237_v34, %v1030_v39  ;;  %v5682_v59 = vpop.permute.xlu0 %1584  ;;  %v887_v8 = vadd.f32 %v877_v22, %v861_v19  ;;  %v3833_v34 = vld [vmem:[#allocation2 + $0x54] sm:$0xff] }
 0x458   :  { %2720 = vrot.lane.b32.xlu1 %v2711_v47, %s3961_s26  ;;  %v2713_v7 = vmul.f32 %v3833_v34, %v5609_v58  ;;  %v889_v22 = vadd.f32 %v881_v9, %v863_v24  ;;  %v2801_v9 = vstv %s5687_s20  ;;  %v2739_v51 = vmul.f32 %v3833_v34, %v5636_v56 }
 0x459   :  { %v1098_v17 = vadd.f32 %v1094_v0, %v1084_v45  ;;  %v1082_v27 = vadd.f32 %v5256_v1, %v1056_v14  ;;  %2748 = vrot.lane.b32.xlu0 %v2738_v12, %s3962_s23 }
 0x45a   :  { %v903_v44 = vpop.permute.xlu1 %902 }
 0x45b   :  { %v1124_v10 = vadd.f32 %v5283_v38, %v1098_v17  ;;  %v1096_v39 = vadd.f32 %v1092_v3, %v1082_v27  ;;  %v913_v47 = vadd.f32 %v903_v44, %v887_v8  ;;  %v5698_v55 = vpop.permute.xlu0 %1620  ;;  %v2737_v38 = vmul.f32 %v5670_v43, %v5636_v56  ;;  %v6713_v17 = vld [vmem:[#allocation135_spill] sm:$0xff] }
 0x45c   :  { %2724 = vrot.lane.b32.xlu1 %v2713_v7, %s3961_s26  ;;  %v1264_v27 = vmul.f32 %v5732_v29, %v6713_v17  ;;  %v6714_v7 = vld [vmem:[#allocation133_spill] sm:$0xff]  ;;  %v6718_v17 = vld [vmem:[#allocation155_spill] sm:$0xff] }
 0x45d   :  { %v1150_v1 = vadd.f32 %v5303_v21, %v1124_v10  ;;  %v1122_v58 = vadd.f32 %v5275_v37, %v1096_v39  ;;  %2770 = vrot.lane.b32.xlu0 %v2762_v11, %s3963_s28  ;;  %v5704_v54 = vadd.f32 %v923_v25, %v913_v47  ;;  %v925_v37 = vmul.f32 %v5611_v46, %v5370_v53  ;;  %v5716_v21 = vld [vmem:[#allocation2 + $0x35] sm:$0xff] }
 0x45e   :  { %v907_v30 = vpop.permute.xlu1 %906  ;;  %v2802_v23 = vmul.f32 %v2801_v9, %v5716_v21  ;;  %v1262_v11 = vmul.f32 %v5732_v29, %v6714_v7 }
 0x45f   :  { %v1176_v12 = vadd.f32 %v5322_v49, %v1150_v1  ;;  %v1148_v0 = vadd.f32 %v5292_v57, %v1122_v58  ;;  %v915_v45 = vadd.f32 %v907_v30, %v889_v22  ;;  %v5711_v14 = vpop.permute.xlu0 %1624  ;;  %v5763_v22 = vld [vmem:[#allocation2 + $0x3d] sm:$0xff] }
 0x460   :  { %2746 = vrot.lane.b32.xlu1 %v2737_v38, %s3962_s23 }
 0x461   :  { %v1202_v19 = vadd.f32 %v5343_v40, %v1176_v12  ;;  %v1174_v26 = vadd.f32 %v5311_v31, %v1148_v0  ;;  %2774 = vrot.lane.b32.xlu0 %v2764_v2, %s3963_s28  ;;  %v5722_v49 = vadd.f32 %v925_v37, %v915_v45  ;;  %v5735_v31 = vld [vmem:[#allocation2 + $0x4d] sm:$0xff]  ;;  %v5777_v12 = vld [vmem:[#allocation2 + $0x55] sm:$0xff]  ;;  %v5783_v45 = vstv %s3629_s25 }
 0x462   :  { %v5724_v57 = vpop.permute.xlu1 %942 }
 0x463   :  { %v1200_v53 = vadd.f32 %v5330_v33, %v1174_v26  ;;  %v1228_v46 = vadd.f32 %v5366_v35, %v1202_v19  ;;  %v5729_v3 = vpop.permute.xlu0 %1646  ;;  %v2763_v35 = vmul.f32 %v5670_v43, %v5676_v36  ;;  %v6715_v19 = vld [vmem:[#allocation157_spill] sm:$0xff] }
 0x464   :  { %2750 = vrot.lane.b32.xlu1 %v2739_v51, %s3962_s23  ;;  %v1434_v26 = vmul.f32 %v5783_v45, %v6715_v19  ;;  %v6716_v51 = vld [vmem:[#allocation187_spill] sm:$0xff] }
 0x465   :  { %v1254_v40 = vadd.f32 %v5388_v62, %v1228_v46  ;;  %v1226_v56 = vadd.f32 %v5353_v13, %v1200_v53  ;;  %2810 = vrot.lane.b32.xlu0 %v2802_v23, %s3958_s19  ;;  %v2804_v62 = vmul.f32 %v2801_v9, %v5735_v31  ;;  %v2827_v13 = vstv %s3687_s10  ;;  %v6717_v23 = vld [vmem:[#allocation192_spill] sm:$0xff] }
 0x466   :  { %v5742_v33 = vpop.permute.xlu1 %946  ;;  %v2828_v58 = vmul.f32 %v2827_v13, %v5716_v21  ;;  %v2830_v2 = vmul.f32 %v2827_v13, %v5735_v31 }
 0x467   :  { %v1268_v8 = vadd.f32 %v1264_v27, %v1254_v40  ;;  %v1252_v44 = vadd.f32 %v5378_v61, %v1226_v56  ;;  %v5749_v25 = vpop.permute.xlu0 %1650  ;;  %v2765_v61 = vmul.f32 %v3833_v34, %v5676_v36  ;;  %v1432_v27 = vmul.f32 %v5783_v45, %v6718_v17  ;;  %v6719_v56 = vld [vmem:[#allocation196_spill] sm:$0xff] }
 0x468   :  { %2772 = vrot.lane.b32.xlu1 %v2763_v35, %s3963_s28 }
 0x469   :  { %v1294_v10 = vadd.f32 %v5408_v63, %v1268_v8  ;;  %v1266_v39 = vadd.f32 %v1262_v11, %v1252_v44  ;;  %2814 = vrot.lane.b32.xlu0 %v2804_v62, %s3958_s19  ;;  %v2879_v11 = vstv %s3689_s1  ;;  %v6720_v62 = vld [vmem:[#allocation198_spill] sm:$0xff] }
 0x46a   :  { %v5755_v43 = vpop.permute.xlu1 %968 }
 0x46b   :  { %v1320_v24 = vadd.f32 %v5428_v28, %v1294_v10  ;;  %v1292_v47 = vadd.f32 %v5398_v15, %v1266_v39  ;;  %v5760_v1 = vpop.permute.xlu0 %1672  ;;  %v2803_v28 = vmul.f32 %v2801_v9, %v5763_v22  ;;  %v6721_v39 = vld [vmem:[#allocation195_spill] sm:$0xff] }
 0x46c   :  { %2776 = vrot.lane.b32.xlu1 %v2765_v61, %s3963_s28 }
 0x46d   :  { %v1346_v63 = vadd.f32 %v5448_v5, %v1320_v24  ;;  %v1318_v30 = vadd.f32 %v5418_v32, %v1292_v47  ;;  %2836 = vrot.lane.b32.xlu0 %v2828_v58, %s3959_s21  ;;  %v2853_v5 = vstv %s3688_s3  ;;  %v2831_v47 = vmul.f32 %v2827_v13, %v5777_v12  ;;  %v6722_v58 = vld [vmem:[#allocation200_spill] sm:$0xff] }
 0x46e   :  { %v5769_v38 = vpop.permute.xlu1 %972  ;;  %v2856_v7 = vmul.f32 %v2853_v5, %v5735_v31  ;;  %v2857_v17 = vmul.f32 %v2853_v5, %v5777_v12 }
 0x46f   :  { %v1372_v15 = vadd.f32 %v5470_v42, %v1346_v63  ;;  %v1344_v36 = vadd.f32 %v5438_v60, %v1318_v30  ;;  %v5774_v34 = vpop.permute.xlu0 %1676  ;;  %v2805_v60 = vmul.f32 %v2801_v9, %v5777_v12  ;;  %v2829_v9 = vmul.f32 %v2827_v13, %v5763_v22  ;;  %v6723_v30 = vld [vmem:[#allocation197_spill] sm:$0xff] }
 0x470   :  { %2812 = vrot.lane.b32.xlu1 %v2803_v28, %s3958_s19 }
 0x471   :  { %v1398_v32 = vadd.f32 %v5494_v52, %v1372_v15  ;;  %v1370_v0 = vadd.f32 %v5458_v20, %v1344_v36  ;;  %2840 = vrot.lane.b32.xlu0 %v2830_v2, %s3959_s21  ;;  %v2854_v52 = vmul.f32 %v2853_v5, %v5716_v21  ;;  %v2880_v36 = vmul.f32 %v2879_v11, %v5716_v21 }
 0x472   :  { %v5785_v42 = vpop.permute.xlu1 %994 }
 0x473   :  { %v1424_v37 = vadd.f32 %v5516_v4, %v1398_v32  ;;  %v1396_v53 = vadd.f32 %v6716_v51, %v1370_v0  ;;  %v5792_v46 = vpop.permute.xlu0 %1698  ;;  %v6724_v32 = vld [vmem:[#allocation199_spill] sm:$0xff]  ;;  %v2882_v51 = vmul.f32 %v2879_v11, %v5735_v31 }
 0x474   :  { %2816 = vrot.lane.b32.xlu1 %v2805_v60, %s3958_s19 }
 0x475   :  { %v1438_v20 = vadd.f32 %v1434_v26, %v1424_v37  ;;  %v1422_v40 = vadd.f32 %v6717_v23, %v1396_v53  ;;  %2862 = vrot.lane.b32.xlu0 %v2854_v52, %s3960_s24  ;;  %v2855_v37 = vmul.f32 %v2853_v5, %v5763_v22  ;;  %v5827_v53 = vstv %s3690_s27  ;;  %v6725_v23 = vld [vmem:[#allocation171_spill] sm:$0xff] }
 0x476   :  { %v5800_v4 = vpop.permute.xlu1 %998  ;;  %v5829_v52 = vstv %s3636_s0  ;;  %v955_v5 = vadd.f32 %v5742_v33, %v5722_v49 }
 0x477   :  { %v1464_v35 = vadd.f32 %v6719_v56, %v1438_v20  ;;  %v1436_v8 = vadd.f32 %v1432_v27, %v1422_v40  ;;  %v5804_v44 = vpop.permute.xlu0 %1702  ;;  %v1604_v40 = vmul.f32 %v5829_v52, %v6725_v23  ;;  %v2906_v27 = vmul.f32 %v5827_v53, %v5716_v21 }
 0x478   :  { %2838 = vrot.lane.b32.xlu1 %v2829_v9, %s3959_s21 }
 0x479   :  { %v1490_v10 = vadd.f32 %v6720_v62, %v1464_v35  ;;  %v1462_v61 = vadd.f32 %v6721_v39, %v1436_v8  ;;  %2866 = vrot.lane.b32.xlu0 %v2856_v7, %s3960_s24  ;;  %v2881_v62 = vmul.f32 %v2879_v11, %v5763_v22 }
 0x47a   :  { %v1021_v24 = vpop.permute.xlu1 %1020 }
 0x47b   :  { %v1516_v63 = vadd.f32 %v6722_v58, %v1490_v10  ;;  %v1488_v28 = vadd.f32 %v6723_v30, %v1462_v61  ;;  %v5814_v15 = vpop.permute.xlu0 %1724  ;;  %v5858_v10 = vstv %s5822_s29 }
 0x47c   :  { %2842 = vrot.lane.b32.xlu1 %v2831_v47, %s3959_s21 }
 0x47d   :  { %v1542_v2 = vadd.f32 %v5607_v18, %v1516_v63  ;;  %v1514_v0 = vadd.f32 %v6724_v32, %v1488_v28  ;;  %2888 = vrot.lane.b32.xlu0 %v2880_v36, %s3961_s26 }
 0x47e   :  { %v1025_v60 = vpop.permute.xlu1 %1024 }
 0x47f   :  { %v1540_v13 = vadd.f32 %v5596_v41, %v1514_v0  ;;  %v1568_v19 = vadd.f32 %v5643_v50, %v1542_v2  ;;  %v1729_v26 = vpop.permute.xlu0 %1728  ;;  %v953_v41 = vadd.f32 %v5724_v57, %v5704_v54 }
 0x480   :  { %2864 = vrot.lane.b32.xlu1 %v2855_v37, %s3960_s24 }
 0x481   :  { %v1566_v18 = vadd.f32 %v5630_v16, %v1540_v13  ;;  %v1594_v20 = vadd.f32 %v5682_v59, %v1568_v19  ;;  %2892 = vrot.lane.b32.xlu0 %v2882_v51, %s3961_s26  ;;  %v6726_v16 = vld [vmem:[#allocation169_spill] sm:$0xff]  ;;  %v979_v35 = vadd.f32 %v5755_v43, %v953_v41  ;;  %v2908_v43 = vmul.f32 %v5827_v53, %v5735_v31 }
 0x482   :  { %v1047_v50 = vpop.permute.xlu1 %1046  ;;  %v1602_v59 = vmul.f32 %v5829_v52, %v6726_v16  ;;  %v2934_v19 = vmul.f32 %v5858_v10, %v5735_v31  ;;  %v2971_v41 = vstv %s5864_s4 }
 0x483   :  { %v1592_v9 = vadd.f32 %v5659_v48, %v1566_v18  ;;  %v1608_v56 = vadd.f32 %v1604_v40, %v1594_v20  ;;  %v1751_v8 = vpop.permute.xlu0 %1750  ;;  %v1005_v7 = vadd.f32 %v5785_v42, %v979_v35  ;;  %v6729_v20 = vld [vmem:[#allocation190_spill] sm:$0xff] }
 0x484   :  { %2868 = vrot.lane.b32.xlu1 %v2857_v17, %s3960_s24  ;;  %v1095_v23 = vmul.f32 %v5661_v6, %v6729_v20  ;;  %v5895_v40 = vld [vmem:[#allocation2 + $0x36] sm:$0xff]  ;;  %v6730_v17 = vld [vmem:[#allocation183_spill] sm:$0xff] }
 0x485   :  { %v1606_v54 = vadd.f32 %v1602_v59, %v1592_v9  ;;  %v1634_v57 = vadd.f32 %v5711_v14, %v1608_v56  ;;  %2914 = vrot.lane.b32.xlu0 %v2906_v27, %s3962_s23  ;;  %v981_v14 = vadd.f32 %v5769_v38, %v955_v5  ;;  %v1031_v47 = vadd.f32 %v1021_v24, %v1005_v7  ;;  %v6727_v24 = vld [vmem:[#allocation188_spill] sm:$0xff] }
 0x486   :  { %v1051_v48 = vpop.permute.xlu1 %1050  ;;  %v2932_v38 = vmul.f32 %v5858_v10, %v5716_v21  ;;  %v1093_v30 = vmul.f32 %v5661_v6, %v6727_v24  ;;  %v2909_v59 = vmul.f32 %v5827_v53, %v5777_v12  ;;  %v2933_v7 = vmul.f32 %v5858_v10, %v5763_v22 }
 0x487   :  { %v1632_v39 = vadd.f32 %v5698_v55, %v1606_v54  ;;  %v1660_v61 = vadd.f32 %v5749_v25, %v1634_v57  ;;  %v1755_v49 = vpop.permute.xlu0 %1754  ;;  %v1007_v58 = vadd.f32 %v5800_v4, %v981_v14  ;;  %v1057_v63 = vadd.f32 %v1047_v50, %v1031_v47 }
 0x488   :  { %2890 = vrot.lane.b32.xlu1 %v2881_v62, %s3961_s26  ;;  %v2883_v25 = vmul.f32 %v2879_v11, %v5777_v12  ;;  %v5878_v4 = vstv %s5846_s2  ;;  %v2972_v54 = vmul.f32 %v2971_v41, %v5895_v40  ;;  %v2935_v14 = vmul.f32 %v5858_v10, %v5777_v12 }
 0x489   :  { %v1658_v33 = vadd.f32 %v5729_v3, %v1632_v39  ;;  %v1686_v42 = vadd.f32 %v5774_v34, %v1660_v61  ;;  %2918 = vrot.lane.b32.xlu0 %v2908_v43, %s3962_s23  ;;  %v1033_v36 = vadd.f32 %v1025_v60, %v1007_v58  ;;  %v2907_v60 = vmul.f32 %v5827_v53, %v5763_v22 }
 0x48a   :  { %v1073_v55 = vpop.permute.xlu1 %1072  ;;  %v1772_v27 = vmul.f32 %v5878_v4, %v6730_v17  ;;  %v2997_v39 = vstv %s3694_s30  ;;  %v5927_v12 = vstv %s3695_s9  ;;  %s3966_s9 = smov [#allocation10]  }
 0x48b   :  { %v1684_v28 = vadd.f32 %v5760_v1, %v1658_v33  ;;  %v1712_v3 = vadd.f32 %v5804_v44, %v1686_v42  ;;  %v1083_v34 = vadd.f32 %v1073_v55, %v1057_v63  ;;  %v1791_v2 = vpop.permute.xlu0 %1790  ;;  %v1059_v0 = vadd.f32 %v1051_v48, %v1033_v36  ;;  %v6728_v1 = vld [vmem:[#allocation185_spill] sm:$0xff]  ;;  %v5918_v33 = vld [vmem:[#allocation2 + $0x3e] sm:$0xff] }
 0x48c   :  { %2894 = vrot.lane.b32.xlu1 %v2883_v25, %s3961_s26  ;;  %v1774_v44 = vmul.f32 %v5878_v4, %v6728_v1  ;;  %v2973_v58 = vmul.f32 %v2971_v41, %v5918_v33  ;;  %v5924_v25 = vld [vmem:[#allocation2 + $0x56] sm:$0xff] }
 0x48d   :  { %v1710_v32 = vadd.f32 %v5792_v46, %v1684_v28  ;;  %v1738_v11 = vadd.f32 %v1729_v26, %v1712_v3  ;;  %2940 = vrot.lane.b32.xlu0 %v2932_v38, %s3963_s28  ;;  %v5883_v37 = vadd.f32 %v1093_v30, %v1083_v34  ;;  %v2975_v24 = vmul.f32 %v2971_v41, %v5924_v25 }
 0x48e   :  { %v1077_v13 = vpop.permute.xlu1 %1076  ;;  %v3024_v28 = vmul.f32 %v5927_v12, %v5895_v40  ;;  %v2999_v34 = vmul.f32 %v2997_v39, %v5918_v33 }
 0x48f   :  { %v1736_v51 = vadd.f32 %v5814_v15, %v1710_v32  ;;  %v1764_v46 = vadd.f32 %v1755_v49, %v1738_v11  ;;  %v1085_v18 = vadd.f32 %v1077_v13, %v1059_v0  ;;  %v1795_v26 = vpop.permute.xlu0 %1794  ;;  %v2998_v49 = vmul.f32 %v2997_v39, %v5895_v40  ;;  %v6731_v11 = vld [vmem:[#allocation127_spill] sm:$0xff] }
 0x490   :  { %2916 = vrot.lane.b32.xlu1 %v2907_v60, %s3962_s23  ;;  %v3001_v13 = vmul.f32 %v2997_v39, %v5924_v25  ;;  %v3025_v60 = vmul.f32 %v5927_v12, %v5918_v33 }
 0x491   :  { %v1762_v50 = vadd.f32 %v1751_v8, %v1736_v51  ;;  %v1778_v9 = vadd.f32 %v1774_v44, %v1764_v46  ;;  %2944 = vrot.lane.b32.xlu0 %v2934_v19, %s3963_s28  ;;  %v5901_v15 = vadd.f32 %v1095_v23, %v1085_v18  ;;  %v5907_v8 = vld [vmem:[#allocation2 + $0x4e] sm:$0xff]  ;;  %v5946_v51 = vstv %s3650_s14  ;;  %s3565_s14 = sshll.u32 %s3966_s9, 4  ;;  %s3566_s14 = int_to_ptr.vmem [resolvable:$true] %s3565_s14 }
 0x492   :  { %v1113_v16 = vpop.permute.xlu1 %1112  ;;  %v2974_v53 = vmul.f32 %v2971_v41, %v5907_v8  ;;  %v3000_v55 = vmul.f32 %v2997_v39, %v5907_v8  ;;  %v3834_v41 = vld [vmem:[#allocation2 + $0x30] sm:$0xff]  ;;  %p3925_p8 = scmp.lt.s32.totalorder %s3566_s14, %s3566_s14 }
 0x493   :  { %v1776_v6 = vadd.f32 %v1772_v27, %v1762_v50  ;;  %v1804_v56 = vadd.f32 %v1795_v26, %v1778_v9  ;;  %v1817_v35 = vpop.permute.xlu0 %1816  ;;  %v1123_v46 = vadd.f32 %v1113_v16, %v5883_v37  ;;  %v1942_v50 = vmul.f32 %v3834_v41, %v5946_v51 }
 0x494   :  { %2920 = vrot.lane.b32.xlu1 %v2909_v59, %s3962_s23 }
 0x495   :  { %v1802_v57 = vadd.f32 %v1791_v2, %v1776_v6  ;;  %2980 = vrot.lane.b32.xlu0 %v2972_v54, %s3958_s19  ;;  %v5960_v54 = vrot.slane %v6731_v11, 1 }
 0x496   :  { %v1117_v5 = vpop.permute.xlu1 %1116 }
 0x497   :  { %v1828_v48 = vadd.f32 %v1817_v35, %v1802_v57  ;;  %v1821_v62 = vpop.permute.xlu0 %1820  ;;  %v1125_v27 = vadd.f32 %v1117_v5, %v5901_v15  ;;  %v6732_v57 = vld [vmem:[#allocation19_spill] sm:$0xff] }
 0x498   :  { %v1830_v43 = vadd.f32 %v1821_v62, %v1804_v56  ;;  %2942 = vrot.lane.b32.xlu1 %v2933_v7, %s3963_s28 }
 0x499   :  { %2984 = vrot.lane.b32.xlu0 %v2974_v53, %s3958_s19 }
 0x49a   :  { %v1139_v61 = vpop.permute.xlu1 %1138 }
 0x49b   :  { %v1843_v47 = vpop.permute.xlu0 %1842  ;;  %v1149_v20 = vadd.f32 %v1139_v61, %v1123_v46 }
 0x49c   :  { %v1854_v22 = vadd.f32 %v1843_v47, %v1828_v48  ;;  %2946 = vrot.lane.b32.xlu1 %v2935_v14, %s3963_s28  ;;  %v3835_v48 = vld [vmem:[#allocation2 + $0x48] sm:$0xff] }
 0x49d   :  { %3006 = vrot.lane.b32.xlu0 %v2998_v49, %s3959_s21  ;;  %v1944_v15 = vmul.f32 %v3835_v48, %v5946_v51  ;;  %v3836_v49 = vld [vmem:[#allocation2 + $0xb] sm:$0xff] }
 0x49e   :  { %v1143_v42 = vpop.permute.xlu1 %1142 }
 0x49f   :  { %v1847_v63 = vpop.permute.xlu0 %1846  ;;  %v1151_v6 = vadd.f32 %v1143_v42, %v1125_v27 }
 0x4a0   :  { %v1856_v38 = vadd.f32 %v1847_v63, %v1830_v43  ;;  %2982 = vrot.lane.b32.xlu1 %v2973_v58, %s3958_s19  ;;  %v6733_v43 = vld [vmem:[#allocation23_spill] sm:$0xff] }
 0x4a1   :  { %3010 = vrot.lane.b32.xlu0 %v3000_v55, %s3959_s21  ;;  %v6734_v63 = vld [vmem:[#allocation27_spill] sm:$0xff] }
 0x4a2   :  { %v1165_v10 = vpop.permute.xlu1 %1164 }
 0x4a3   :  { %v1869_v30 = vpop.permute.xlu0 %1868  ;;  %v1175_v9 = vadd.f32 %v1165_v10, %v1149_v20  ;;  %v6741_v20 = vld [vmem:[#allocation128_spill] sm:$0xff] }
 0x4a4   :  { %v1880_v3 = vadd.f32 %v1869_v30, %v1854_v22  ;;  %2986 = vrot.lane.b32.xlu1 %v2975_v24, %s3958_s19  ;;  %v1263_v22 = vmul.f32 %v3836_v49, %v5732_v29  ;;  %v3839_v49 = vld [vmem:[#allocation2 + $0x49] sm:$0xff] }
 0x4a5   :  { %3032 = vrot.lane.b32.xlu0 %v3024_v28, %s3960_s24  ;;  %v6736_v28 = vld [vmem:[#allocation31_spill] sm:$0xff] }
 0x4a6   :  { %v1169_v36 = vpop.permute.xlu1 %1168 }
 0x4a7   :  { %v1873_v2 = vpop.permute.xlu0 %1872  ;;  %v1177_v62 = vadd.f32 %v1169_v36, %v1151_v6  ;;  %v6737_v36 = vld [vmem:[#allocation25_spill] sm:$0xff] }
 0x4a8   :  { %v1882_v32 = vadd.f32 %v1873_v2, %v1856_v38  ;;  %3008 = vrot.lane.b32.xlu1 %v2999_v34, %s3959_s21  ;;  %v6735_v38 = vld [vmem:[#allocation21_spill] sm:$0xff] }
 0x4a9   :  { %3424 = vrot.lane.b32.xlu0 %v6731_v11, %s3958_s19 }
 0x4aa   :  { %v1191_v0 = vpop.permute.xlu1 %1190 }
 0x4ab   :  { %v1895_v1 = vpop.permute.xlu0 %1894  ;;  %v1201_v56 = vadd.f32 %v1191_v0, %v1175_v9  ;;  %v6738_v0 = vld [vmem:[#allocation125_spill] sm:$0xff] }
 0x4ac   :  { %3012 = vrot.lane.b32.xlu1 %v3001_v13, %s3959_s21  ;;  %v1906_v18 = vadd.f32 %v1895_v1, %v1880_v3  ;;  %v3837_v1 = vld [vmem:[#allocation2 + $0x23] sm:$0xff]  ;;  %v6743_v9 = vld [vmem:[#allocation33_spill] sm:$0xff] }
 0x4ad   :  { %3438 = vrot.lane.b32.xlu0 %v6731_v11, %s3960_s24 }
 0x4ae   :  { %v1195_v44 = vpop.permute.xlu1 %1194 }
 0x4af   :  { %v1899_v19 = vpop.permute.xlu0 %1898  ;;  %v1203_v47 = vadd.f32 %v1195_v44, %v1177_v62  ;;  %v1265_v44 = vmul.f32 %v3837_v1, %v5732_v29  ;;  %v6754_v1 = vld [vmem:[#allocation141_spill] sm:$0xff] }
 0x4b0   :  { %3034 = vrot.lane.b32.xlu1 %v3025_v60, %s3960_s24  ;;  %v1908_v37 = vadd.f32 %v1899_v19, %v1882_v32  ;;  %v5983_v32 = vstv %s5957_s5  ;;  %v6739_v19 = vld [vmem:[#allocation34_spill] sm:$0xff] }
 0x4b1   :  { %3452 = vrot.lane.b32.xlu0 %v6731_v11, %s3962_s23 }
 0x4b2   :  { %v1217_v26 = vpop.permute.xlu1 %1216 }
 0x4b3   :  { %v1921_v23 = vpop.permute.xlu0 %1920  ;;  %v1227_v53 = vadd.f32 %v1217_v26, %v1201_v56  ;;  %v6745_v56 = vld [vmem:[#allocation126_spill] sm:$0xff] }
 0x4b4   :  { %v1932_v17 = vadd.f32 %v1921_v23, %v1906_v18  ;;  %3431 = vrot.lane.b32.xlu1 %v6731_v11, %s3959_s21  ;;  %v6740_v18 = vld [vmem:[#allocation29_spill] sm:$0xff] }
 0x4b5   :  { %3466 = vrot.lane.b32.xlu0 %v6731_v11, %s3965_s8 }
 0x4b6   :  { %v1946_v16 = vadd.f32 %v1942_v50, %v1932_v17  ;;  %v1221_v59 = vpop.permute.xlu1 %1220  ;;  %v3838_v50 = vld [vmem:[#allocation2 + $0x31] sm:$0xff] }
 0x4b7   :  { %v1925_v35 = vpop.permute.xlu0 %1924  ;;  %v1229_v24 = vadd.f32 %v1221_v59, %v1203_v47  ;;  %v2112_v29 = vmul.f32 %v3838_v50, %v5983_v32  ;;  %v6742_v17 = vld [vmem:[#allocation38_spill] sm:$0xff]  ;;  %v6758_v50 = vld [vmem:[#allocation139_spill] sm:$0xff] }
 0x4b8   :  { %v1972_v7 = vadd.f32 %v6732_v57, %v1946_v16  ;;  %v1934_v5 = vadd.f32 %v1925_v35, %v1908_v37  ;;  %3445 = vrot.lane.b32.xlu1 %v6731_v11, %s3961_s26  ;;  %v6744_v59 = vld [vmem:[#allocation130_spill] sm:$0xff] }
 0x4b9   :  { %3486 = vrot.lane.b32.xlu0 %v5960_v54, %s3959_s21  ;;  %s5976_s21 = sld [smem:[#allocation3 + $0x62]] }
 0x4ba   :  { %v1998_v39 = vadd.f32 %v6733_v43, %v1972_v7  ;;  %v1948_v61 = vadd.f32 %v1944_v15, %v1934_v5  ;;  %v1243_v14 = vpop.permute.xlu1 %1242  ;;  %v3026_v7 = vmul.f32 %v5927_v12, %v5907_v8  ;;  %v6746_v15 = vld [vmem:[#allocation36_spill] sm:$0xff] }
 0x4bb   :  { %v1253_v42 = vadd.f32 %v1243_v14, %v1227_v53  ;;  %v5970_v58 = vpop.permute.xlu0 %2696  ;;  %v6747_v53 = vld [vmem:[#allocation134_spill] sm:$0xff] }
 0x4bc   :  { %v2024_v55 = vadd.f32 %v6734_v63, %v1998_v39  ;;  %v1974_v10 = vadd.f32 %v6735_v38, %v1948_v61  ;;  %3459 = vrot.lane.b32.xlu1 %v6731_v11, %s3963_s28  ;;  %v6748_v39 = vld [vmem:[#allocation129_spill] sm:$0xff]  ;;  %v6749_v14 = vld [vmem:[#allocation42_spill] sm:$0xff] }
 0x4bd   :  { %v1267_v30 = vadd.f32 %v1263_v22, %v1253_v42  ;;  %3500 = vrot.lane.b32.xlu0 %v5960_v54, %s3961_s26  ;;  %v2114_v22 = vmul.f32 %v3839_v49, %v5983_v32  ;;  %v6750_v42 = vld [vmem:[#allocation40_spill] sm:$0xff]  ;;  %v6751_v38 = vld [vmem:[#allocation138_spill] sm:$0xff] }
 0x4be   :  { %v2050_v3 = vadd.f32 %v6736_v28, %v2024_v55  ;;  %v2000_v34 = vadd.f32 %v6737_v36, %v1974_v10  ;;  %v1247_v2 = vpop.permute.xlu1 %1246  ;;  %v6753_v36 = vld [vmem:[#allocation46_spill] sm:$0xff] }
 0x4bf   :  { %v1293_v13 = vadd.f32 %v6738_v0, %v1267_v30  ;;  %v1255_v11 = vadd.f32 %v1247_v2, %v1229_v24  ;;  %v5987_v60 = vpop.permute.xlu0 %2718  ;;  %v6011_v62 = vstv %s5976_s21  ;;  %v6752_v24 = vld [vmem:[#allocation131_spill] sm:$0xff]  ;;  %v3840_v0 = vld [vmem:[#allocation2 + $0xc] sm:$0xff] }
 0x4c0   :  { %v2076_v46 = vadd.f32 %v6739_v19, %v2050_v3  ;;  %v2026_v26 = vadd.f32 %v6740_v18, %v2000_v34  ;;  %3479 = vrot.lane.b32.xlu1 %v5960_v54, %s3958_s19  ;;  %s6013_s19 = sld [smem:[#allocation3 + $0x63]]  ;;  %v3050_v3 = vmul.f32 %v6011_v62, %v5895_v40 }
 0x4c1   :  { %v1319_v23 = vadd.f32 %v6741_v20, %v1293_v13  ;;  %v1269_v41 = vadd.f32 %v1265_v44, %v1255_v11  ;;  %3514 = vrot.lane.b32.xlu0 %v5960_v54, %s3963_s28  ;;  %v1433_v13 = vmul.f32 %v3840_v0, %v5783_v45  ;;  %v6755_v11 = vld [vmem:[#allocation136_spill] sm:$0xff]  ;;  %v6768_v0 = vld [vmem:[#allocation153_spill] sm:$0xff] }
 0x4c2   :  { %v2102_v27 = vadd.f32 %v6742_v17, %v2076_v46  ;;  %v2052_v37 = vadd.f32 %v6743_v9, %v2026_v26  ;;  %v5999_v16 = vpop.permute.xlu1 %2694  ;;  %v6756_v46 = vld [vmem:[#allocation50_spill] sm:$0xff]  ;;  %v6757_v26 = vld [vmem:[#allocation44_spill] sm:$0xff] }
 0x4c3   :  { %v1345_v6 = vadd.f32 %v6744_v59, %v1319_v23  ;;  %v1295_v35 = vadd.f32 %v6745_v56, %v1269_v41  ;;  %v6003_v57 = vpop.permute.xlu0 %2722  ;;  %v6759_v9 = vld [vmem:[#allocation54_spill] sm:$0xff]  ;;  %v6760_v59 = vld [vmem:[#allocation48_spill] sm:$0xff] }
 0x4c4   :  { %v2116_v48 = vadd.f32 %v2112_v29, %v2102_v27  ;;  %v2078_v5 = vadd.f32 %v6746_v15, %v2052_v37  ;;  %3493 = vrot.lane.b32.xlu1 %v5960_v54, %s3960_s24  ;;  %v3052_v27 = vmul.f32 %v6011_v62, %v5907_v8  ;;  %v3841_v15 = vld [vmem:[#allocation2 + $0x24] sm:$0xff] }
 0x4c5   :  { %v1371_v43 = vadd.f32 %v6747_v53, %v1345_v6  ;;  %v1321_v61 = vadd.f32 %v6748_v39, %v1295_v35  ;;  %3036 = vrot.lane.b32.xlu0 %v3026_v7, %s3960_s24  ;;  %v6057_v35 = vstv %s6015_s15  ;;  %v6761_v7 = vld [vmem:[#allocation145_spill] sm:$0xff]  ;;  %v6762_v53 = vld [vmem:[#allocation143_spill] sm:$0xff]  ;;  %v6763_v39 = vld [vmem:[#allocation58_spill] sm:$0xff] }
 0x4c6   :  { %v2142_v47 = vadd.f32 %v6749_v14, %v2116_v48  ;;  %v2104_v63 = vadd.f32 %v6750_v42, %v2078_v5  ;;  %v6023_v55 = vpop.permute.xlu1 %2698  ;;  %v6052_v56 = vstv %s6013_s19  ;;  %v1435_v5 = vmul.f32 %v3841_v15, %v5783_v45  ;;  %v6764_v14 = vld [vmem:[#allocation52_spill] sm:$0xff]  ;;  %v6765_v42 = vld [vmem:[#allocation149_spill] sm:$0xff] }
 0x4c7   :  { %v1397_v10 = vadd.f32 %v6751_v38, %v1371_v43  ;;  %v1347_v30 = vadd.f32 %v6752_v24, %v1321_v61  ;;  %v6027_v28 = vpop.permute.xlu0 %2744  ;;  %v3076_v45 = vmul.f32 %v6052_v56, %v5895_v40  ;;  %v3842_v24 = vld [vmem:[#allocation2 + $0x32] sm:$0xff]  ;;  %v6099_v15 = vstv %s6054_s16 }
 0x4c8   :  { %v2168_v34 = vadd.f32 %v6753_v36, %v2142_v47  ;;  %v2118_v2 = vadd.f32 %v2114_v22, %v2104_v63  ;;  %3507 = vrot.lane.b32.xlu1 %v5960_v54, %s3962_s23  ;;  %v3027_v22 = vmul.f32 %v5927_v12, %v5924_v25  ;;  %v6769_v12 = vld [vmem:[#allocation147_spill] sm:$0xff] }
 0x4c9   :  { %v1423_v44 = vadd.f32 %v6754_v1, %v1397_v10  ;;  %v1373_v19 = vadd.f32 %v6755_v11, %v1347_v30  ;;  %3058 = vrot.lane.b32.xlu0 %v3050_v3, %s3961_s26  ;;  %v2282_v30 = vmul.f32 %v3842_v24, %v6057_v35  ;;  %v6766_v3 = vld [vmem:[#allocation62_spill] sm:$0xff]  ;;  %v6770_v11 = vld [vmem:[#allocation60_spill] sm:$0xff] }
 0x4ca   :  { %v2194_v18 = vadd.f32 %v6756_v46, %v2168_v34  ;;  %v2144_v20 = vadd.f32 %v6757_v26, %v2118_v2  ;;  %v6040_v23 = vpop.permute.xlu1 %2720  ;;  %v6767_v34 = vld [vmem:[#allocation56_spill] sm:$0xff] }
 0x4cb   :  { %v1437_v41 = vadd.f32 %v1433_v13, %v1423_v44  ;;  %v1399_v29 = vadd.f32 %v6758_v50, %v1373_v19  ;;  %v6043_v17 = vpop.permute.xlu0 %2748  ;;  %v6771_v26 = vld [vmem:[#allocation156_spill] sm:$0xff] }
 0x4cc   :  { %v2220_v37 = vadd.f32 %v6759_v9, %v2194_v18  ;;  %v2170_v6 = vadd.f32 %v6760_v59, %v2144_v20  ;;  %3521 = vrot.lane.b32.xlu1 %v5960_v54, %s3965_s8  ;;  %v3051_v18 = vmul.f32 %v6011_v62, %v5918_v33  ;;  %v3843_v9 = vld [vmem:[#allocation2 + $0x4a] sm:$0xff]  ;;  %v6773_v59 = vld [vmem:[#allocation66_spill] sm:$0xff]  ;;  %s3920_s8 = scalar_lea.vmem %s3566_s14, 4096 }
 0x4cd   :  { %v1463_v48 = vadd.f32 %v6761_v7, %v1437_v41  ;;  %v1425_v43 = vadd.f32 %v6762_v53, %v1399_v29  ;;  %3062 = vrot.lane.b32.xlu0 %v3052_v27, %s3961_s26  ;;  %v6772_v41 = vld [vmem:[#allocation151_spill] sm:$0xff]  ;;  %v3078_v27 = vmul.f32 %v6052_v56, %v5907_v8  ;;  %v6774_v7 = vld [vmem:[#allocation64_spill] sm:$0xff]  ;;  %p3921_p7 = scmp.ne.s32.totalorder %s3566_s14, %s3920_s8  ;;  %p3926_p9 = scmp.lt.s32.totalorder %s3920_s8, %s3920_s8 }
 0x4ce   :  { %v2246_v61 = vadd.f32 %v6763_v39, %v2220_v37  ;;  %v2196_v47 = vadd.f32 %v6764_v14, %v2170_v6  ;;  %v6065_v49 = vpop.permute.xlu1 %2724  ;;  %v2284_v37 = vmul.f32 %v3843_v9, %v6057_v35  ;;  %v6777_v14 = vld [vmem:[#allocation70_spill] sm:$0xff] }
 0x4cf   :  { %v1489_v63 = vadd.f32 %v6765_v42, %v1463_v48  ;;  %v1439_v38 = vadd.f32 %v1435_v5, %v1425_v43  ;;  %v6070_v10 = vpop.permute.xlu0 %2770  ;;  %v6775_v5 = vld [vmem:[#allocation159_spill] sm:$0xff]  ;;  %v6776_v43 = vld [vmem:[#allocation154_spill] sm:$0xff]  ;;  %v3053_v42 = vmul.f32 %v6011_v62, %v5924_v25  ;;  %v6782_v62 = vld [vmem:[#allocation160_spill] sm:$0xff]  ;;  %p3927_p10 = por %p3926_p9, %p3925_p8 }
 0x4d0   :  { %v2272_v36 = vadd.f32 %v6766_v3, %v2246_v61  ;;  %v2222_v2 = vadd.f32 %v6767_v34, %v2196_v47  ;;  %3038 = vrot.lane.b32.xlu1 %v3027_v22, %s3960_s24  ;;  %v3102_v34 = vmul.f32 %v6099_v15, %v5895_v40  ;;  %s6156_s24 = sld [smem:[#allocation3 + $0x50]] }
 0x4d1   :  { %v1515_v13 = vadd.f32 %v6768_v0, %v1489_v63  ;;  %v1465_v1 = vadd.f32 %v6769_v12, %v1439_v38  ;;  %3084 = vrot.lane.b32.xlu0 %v3076_v45, %s3962_s23  ;;  %v3844_v63 = vld [vmem:[#allocation2 + $0xd] sm:$0xff]  ;;  %p3928_p11 = pnand %p3927_p10, %p3921_p7 }
 0x4d2   :  { %v2286_v44 = vadd.f32 %v2282_v30, %v2272_v36  ;;  %v2248_v19 = vadd.f32 %v6770_v11, %v2222_v2  ;;  %v6084_v46 = vpop.permute.xlu1 %2746  ;;  %v1603_v38 = vmul.f32 %v3844_v63, %v5829_v52  ;;  %v6778_v45 = vld [vmem:[#allocation161_spill] sm:$0xff]  ;;  %v6779_v30 = vld [vmem:[#allocation158_spill] sm:$0xff]  ;;  %v6780_v2 = vld [vmem:[#allocation68_spill] sm:$0xff] }
 0x4d3   :  { %v1541_v20 = vadd.f32 %v6771_v26, %v1515_v13  ;;  %v1491_v50 = vadd.f32 %v6772_v41, %v1465_v1  ;;  %v6090_v29 = vpop.permute.xlu0 %2774  ;;  %v6781_v13 = vld [vmem:[#allocation74_spill] sm:$0xff]  ;;  %v6783_v11 = vld [vmem:[#allocation72_spill] sm:$0xff] }
 0x4d4   :  { %v2312_v6 = vadd.f32 %v6773_v59, %v2286_v44  ;;  %v2274_v48 = vadd.f32 %v6774_v7, %v2248_v19  ;;  %3060 = vrot.lane.b32.xlu1 %v3051_v18, %s3961_s26  ;;  %v6123_v18 = vstv %s6082_s7  ;;  %v6784_v26 = vld [vmem:[#allocation78_spill] sm:$0xff] }
 0x4d5   :  { %v1567_v53 = vadd.f32 %v6775_v5, %v1541_v20  ;;  %v1517_v39 = vadd.f32 %v6776_v43, %v1491_v50  ;;  %3088 = vrot.lane.b32.xlu0 %v3078_v27, %s3962_s23  ;;  %v3077_v50 = vmul.f32 %v6052_v56, %v5918_v33  ;;  %v3845_v27 = vld [vmem:[#allocation2 + $0x25] sm:$0xff]  ;;  %v3104_v5 = vmul.f32 %v6099_v15, %v5907_v8 }
 0x4d6   :  { %v2288_v61 = vadd.f32 %v2284_v37, %v2274_v48  ;;  %v2338_v47 = vadd.f32 %v6777_v14, %v2312_v6  ;;  %v6105_v22 = vpop.permute.xlu1 %2750  ;;  %v1605_v9 = vmul.f32 %v3845_v27, %v5829_v52  ;;  %v6785_v37 = vld [vmem:[#allocation163_spill] sm:$0xff]  ;;  %v6786_v6 = vld [vmem:[#allocation162_spill] sm:$0xff]  ;;  %v6789_v14 = vld [vmem:[#allocation165_spill] sm:$0xff] }
 0x4d7   :  { %v1593_v24 = vadd.f32 %v6778_v45, %v1567_v53  ;;  %v1543_v3 = vadd.f32 %v6779_v30, %v1517_v39  ;;  %v6112_v36 = vpop.permute.xlu0 %2810  ;;  %v6787_v53 = vld [vmem:[#allocation76_spill] sm:$0xff]  ;;  %v6788_v39 = vld [vmem:[#allocation82_spill] sm:$0xff] }
 0x4d8   :  { %v2314_v0 = vadd.f32 %v6780_v2, %v2288_v61  ;;  %v2364_v12 = vadd.f32 %v6781_v13, %v2338_v47  ;;  %3064 = vrot.lane.b32.xlu1 %v3053_v42, %s3961_s26  ;;  %v6790_v52 = vld [vmem:[#allocation80_spill] sm:$0xff]  ;;  %v6792_v2 = vld [vmem:[#allocation167_spill] sm:$0xff]  ;;  %s3685_s26 = sld [smem:[#allocation3 + $0x57]] }
 0x4d9   :  { %v1607_v1 = vadd.f32 %v1603_v38, %v1593_v24  ;;  %v1569_v44 = vadd.f32 %v6782_v62, %v1543_v3  ;;  %3110 = vrot.lane.b32.xlu0 %v3102_v34, %s3963_s28  ;;  %v6791_v38 = vld [vmem:[#allocation86_spill] sm:$0xff]  ;;  %v3079_v34 = vmul.f32 %v6052_v56, %v5924_v25  ;;  %v6793_v13 = vld [vmem:[#allocation164_spill] sm:$0xff] }
 0x4da   :  { %v2340_v19 = vadd.f32 %v6783_v11, %v2314_v0  ;;  %v2390_v20 = vadd.f32 %v6784_v26, %v2364_v12  ;;  %v6126_v41 = vpop.permute.xlu1 %2772  ;;  %v3846_v24 = vld [vmem:[#allocation2 + $0x33] sm:$0xff]  ;;  %v6794_v62 = vld [vmem:[#allocation84_spill] sm:$0xff] }
 0x4db   :  { %v1633_v59 = vadd.f32 %v6785_v37, %v1607_v1  ;;  %v1595_v7 = vadd.f32 %v6786_v6, %v1569_v44  ;;  %v6133_v48 = vpop.permute.xlu0 %2814  ;;  %v2452_v30 = vmul.f32 %v3846_v24, %v6123_v18  ;;  %v6797_v27 = vld [vmem:[#allocation88_spill] sm:$0xff] }
 0x4dc   :  { %v2366_v43 = vadd.f32 %v6787_v53, %v2340_v19  ;;  %v2416_v61 = vadd.f32 %v6788_v39, %v2390_v20  ;;  %3086 = vrot.lane.b32.xlu1 %v3077_v50, %s3962_s23  ;;  %v6795_v19 = vld [vmem:[#allocation170_spill] sm:$0xff]  ;;  %v3847_v56 = vld [vmem:[#allocation2 + $0x4b] sm:$0xff] }
 0x4dd   :  { %v1659_v47 = vadd.f32 %v6789_v14, %v1633_v59  ;;  %v1609_v42 = vadd.f32 %v1605_v9, %v1595_v7  ;;  %3114 = vrot.lane.b32.xlu0 %v3104_v5, %s3963_s28  ;;  %v6796_v20 = vld [vmem:[#allocation166_spill] sm:$0xff]  ;;  %v2454_v37 = vmul.f32 %v3847_v56, %v6123_v18  ;;  %v3103_v5 = vmul.f32 %v6099_v15, %v5918_v33  ;;  %v6799_v53 = vld [vmem:[#allocation173_spill] sm:$0xff]  ;;  %v6800_v39 = vld [vmem:[#allocation168_spill] sm:$0xff] }
 0x4de   :  { %v2392_v63 = vadd.f32 %v6790_v52, %v2366_v43  ;;  %v2442_v45 = vadd.f32 %v6791_v38, %v2416_v61  ;;  %v6145_v3 = vpop.permute.xlu1 %2776  ;;  %v6798_v59 = vld [vmem:[#allocation90_spill] sm:$0xff] }
 0x4df   :  { %v1685_v0 = vadd.f32 %v6792_v2, %v1659_v47  ;;  %v1635_v12 = vadd.f32 %v6793_v13, %v1609_v42  ;;  %v6151_v1 = vpop.permute.xlu0 %2836  ;;  %v6801_v42 = vld [vmem:[#allocation94_spill] sm:$0xff]  ;;  %v6804_v2 = vld [vmem:[#allocation92_spill] sm:$0xff] }
 0x4e0   :  { %v2418_v44 = vadd.f32 %v6794_v62, %v2392_v63  ;;  %v2456_v11 = vadd.f32 %v2452_v30, %v2442_v45  ;;  %3090 = vrot.lane.b32.xlu1 %v3079_v34, %s3962_s23  ;;  %v3848_v63 = vld [vmem:[#allocation2 + $0xe] sm:$0xff]  ;;  %v6802_v45 = vld [vmem:[#allocation175_spill] sm:$0xff]  ;;  %v6805_v13 = vld [vmem:[#allocation98_spill] sm:$0xff]  ;;  %s3692_s23 = sld [smem:[#allocation3 + $0x5e]] }
 0x4e1   :  { %v1711_v26 = vadd.f32 %v6795_v19, %v1685_v0  ;;  %v1661_v50 = vadd.f32 %v6796_v20, %v1635_v12  ;;  %v1773_v38 = vmul.f32 %v3848_v63, %v5878_v4  ;;  %v6803_v30 = vld [vmem:[#allocation172_spill] sm:$0xff]  ;;  %v6806_v19 = vld [vmem:[#allocation174_spill] sm:$0xff]  ;;  %v6813_v63 = vld [vmem:[#allocation179_spill] sm:$0xff] }
 0x4e2   :  { %v2444_v9 = vadd.f32 %v6797_v27, %v2418_v44  ;;  %v2482_v6 = vadd.f32 %v6798_v59, %v2456_v11  ;;  %v6162_v7 = vpop.permute.xlu1 %2812  ;;  %v3105_v44 = vmul.f32 %v6099_v15, %v5924_v25 }
 0x4e3   :  { %v1737_v43 = vadd.f32 %v6799_v53, %v1711_v26  ;;  %v1687_v61 = vadd.f32 %v6800_v39, %v1661_v50  ;;  %v6168_v14 = vpop.permute.xlu0 %2840  ;;  %v6807_v50 = vld [vmem:[#allocation96_spill] sm:$0xff]  ;;  %v6190_v53 = vstv %s6156_s24 }
 0x4e4   :  { %v2458_v47 = vadd.f32 %v2454_v37, %v2444_v9  ;;  %v2508_v52 = vadd.f32 %v6801_v42, %v2482_v6  ;;  %3112 = vrot.lane.b32.xlu1 %v3103_v5, %s3963_s28  ;;  %v6808_v9 = vld [vmem:[#allocation102_spill] sm:$0xff]  ;;  %v3849_v37 = vld [vmem:[#allocation2 + $0x26] sm:$0xff]  ;;  %v6809_v6 = vld [vmem:[#allocation177_spill] sm:$0xff] }
 0x4e5   :  { %v1763_v24 = vadd.f32 %v6802_v45, %v1737_v43  ;;  %v1713_v34 = vadd.f32 %v6803_v30, %v1687_v61  ;;  %v1775_v59 = vmul.f32 %v3849_v37, %v5878_v4  ;;  %v6810_v43 = vld [vmem:[#allocation176_spill] sm:$0xff]  ;;  %v6815_v4 = vld [vmem:[#allocation110_spill] sm:$0xff] }
 0x4e6   :  { %v2484_v0 = vadd.f32 %v6804_v2, %v2458_v47  ;;  %v2534_v12 = vadd.f32 %v6805_v13, %v2508_v52  ;;  %v6177_v62 = vpop.permute.xlu1 %2816  ;;  %v6811_v39 = vld [vmem:[#allocation100_spill] sm:$0xff]  ;;  %v6812_v47 = vld [vmem:[#allocation106_spill] sm:$0xff] }
 0x4e7   :  { %v1777_v11 = vadd.f32 %v1773_v38, %v1763_v24  ;;  %v1739_v26 = vadd.f32 %v6806_v19, %v1713_v34  ;;  %v6182_v20 = vpop.permute.xlu0 %2862  ;;  %v6814_v30 = vld [vmem:[#allocation104_spill] sm:$0xff] }
 0x4e8   :  { %v2510_v27 = vadd.f32 %v6807_v50, %v2484_v0  ;;  %v2560_v56 = vadd.f32 %v6808_v9, %v2534_v12  ;;  %3116 = vrot.lane.b32.xlu1 %v3105_v44, %s3963_s28  ;;  %v3850_v0 = vld [vmem:[#allocation2 + $0x34] sm:$0xff]  ;;  %s6392_s28 = spop %3755 }
 0x4e9   :  { %v1803_v5 = vadd.f32 %v6809_v6, %v1777_v11  ;;  %v1765_v15 = vadd.f32 %v6810_v43, %v1739_v26  ;;  %v2622_v13 = vmul.f32 %v3850_v0, %v6190_v53  ;;  %v6816_v12 = vld [vmem:[#allocation181_spill] sm:$0xff]  ;;  %v6817_v11 = vld [vmem:[#allocation178_spill] sm:$0xff]  ;;  %v6818_v26 = vld [vmem:[#allocation108_spill] sm:$0xff] }
 0x4ea   :  { %v2536_v61 = vadd.f32 %v6811_v39, %v2510_v27  ;;  %v2586_v42 = vadd.f32 %v6812_v47, %v2560_v56  ;;  %v6195_v52 = vpop.permute.xlu1 %2838  ;;  %v6819_v56 = vld [vmem:[#allocation184_spill] sm:$0xff]  ;;  %v6822_v47 = vld [vmem:[#allocation114_spill] sm:$0xff] }
 0x4eb   :  { %v1829_v38 = vadd.f32 %v6813_v63, %v1803_v5  ;;  %v1779_v45 = vadd.f32 %v1775_v59, %v1765_v15  ;;  %v6198_v24 = vpop.permute.xlu0 %2866  ;;  %v6820_v59 = vld [vmem:[#allocation180_spill] sm:$0xff]  ;;  %v6823_v63 = vld [vmem:[#allocation189_spill] sm:$0xff] }
 0x4ec   :  { %v2562_v34 = vadd.f32 %v6814_v30, %v2536_v61  ;;  %v2612_v2 = vadd.f32 %v6815_v4, %v2586_v42  ;;  %v6821_v43 = vld [vmem:[#allocation112_spill] sm:$0xff]  ;;  %v6825_v4 = vld [vmem:[#allocation118_spill] sm:$0xff] }
 0x4ed   :  { %v1855_v44 = vadd.f32 %v6816_v12, %v1829_v38  ;;  %v1805_v19 = vadd.f32 %v6817_v11, %v1779_v45  ;;  %v3851_v39 = vld [vmem:[#allocation2 + $0x4c] sm:$0xff]  ;;  %v6824_v45 = vld [vmem:[#allocation182_spill] sm:$0xff] }
 0x4ee   :  { %v2588_v50 = vadd.f32 %v6818_v26, %v2562_v34  ;;  %v2626_v27 = vadd.f32 %v2622_v13, %v2612_v2  ;;  %v6206_v9 = vpop.permute.xlu1 %2842  ;;  %v2624_v61 = vmul.f32 %v3851_v39, %v6190_v53  ;;  %v3852_v13 = vld [vmem:[#allocation2 + $0x38] sm:$0xff]  ;;  %v6830_v39 = vld [vmem:[#allocation191_spill] sm:$0xff] }
 0x4ef   :  { %v1881_v37 = vadd.f32 %v6819_v56, %v1855_v44  ;;  %v1831_v6 = vadd.f32 %v6820_v59, %v1805_v19  ;;  %v6210_v5 = vpop.permute.xlu0 %2888  ;;  %v1943_v12 = vmul.f32 %v3852_v13, %v5946_v51  ;;  %v6826_v44 = vld [vmem:[#allocation193_spill] sm:$0xff]  ;;  %v6827_v19 = vld [vmem:[#allocation186_spill] sm:$0xff]  ;;  %v6828_v56 = vld [vmem:[#allocation116_spill] sm:$0xff] }
 0x4f0   :  { %v2614_v15 = vadd.f32 %v6821_v43, %v2588_v50  ;;  %v2652_v42 = vadd.f32 %v6822_v47, %v2626_v27  ;;  %v6829_v27 = vld [vmem:[#allocation122_spill] sm:$0xff] }
 0x4f1   :  { %v1907_v38 = vadd.f32 %v6823_v63, %v1881_v37  ;;  %v1857_v30 = vadd.f32 %v6824_v45, %v1831_v6  ;;  %v3853_v63 = vld [vmem:[#allocation2 + $0x50] sm:$0xff] }
 0x4f2   :  { %v2628_v34 = vadd.f32 %v2624_v61, %v2614_v15  ;;  %v2678_v2 = vadd.f32 %v6825_v4, %v2652_v42  ;;  %v6218_v0 = vpop.permute.xlu1 %2864  ;;  %v6831_v15 = vld [vmem:[#allocation120_spill] sm:$0xff]  ;;  %v1945_v45 = vmul.f32 %v3853_v63, %v5946_v51 }
 0x4f3   :  { %v1933_v11 = vadd.f32 %v6826_v44, %v1907_v38  ;;  %v1883_v26 = vadd.f32 %v6827_v19, %v1857_v30  ;;  %v2893_v50 = vpop.permute.xlu0 %2892  ;;  %v6832_v38 = vld [vmem:[#allocation194_spill] sm:$0xff]  ;;  %v6233_v44 = vstv %s3685_s26 }
 0x4f4   :  { %v2654_v59 = vadd.f32 %v6828_v56, %v2628_v34  ;;  %v2704_v43 = vadd.f32 %v6829_v27, %v2678_v2  ;;  %v6833_v30 = vld [vmem:[#allocation18_spill] sm:$0xff]  ;;  %v2792_v51 = vmul.f32 %v6233_v44, %v5716_v21  ;;  %v2794_v21 = vmul.f32 %v6233_v44, %v5735_v31 }
 0x4f5   :  { %v1947_v37 = vadd.f32 %v1943_v12, %v1933_v11  ;;  %v1909_v6 = vadd.f32 %v6830_v39, %v1883_v26  ;;  %v6834_v19 = vld [vmem:[#allocation22_spill] sm:$0xff] }
 0x4f6   :  { %v2680_v61 = vadd.f32 %v6831_v15, %v2654_v59  ;;  %v2730_v47 = vadd.f32 %v5987_v60, %v2704_v43  ;;  %v6228_v42 = vpop.permute.xlu1 %2868  ;;  %v6835_v27 = vld [vmem:[#allocation26_spill] sm:$0xff] }
 0x4f7   :  { %v1935_v4 = vadd.f32 %v6832_v38, %v1909_v6  ;;  %v1973_v13 = vadd.f32 %v6833_v30, %v1947_v37  ;;  %v2915_v34 = vpop.permute.xlu0 %2914  ;;  %v6836_v37 = vld [vmem:[#allocation20_spill] sm:$0xff]  ;;  %v6837_v15 = vld [vmem:[#allocation30_spill] sm:$0xff]  ;;  %v6839_v38 = vld [vmem:[#allocation35_spill] sm:$0xff] }
 0x4f8   :  { %v2706_v2 = vadd.f32 %v5970_v58, %v2680_v61  ;;  %v2756_v12 = vadd.f32 %v6027_v28, %v2730_v47  ;;  %v6838_v47 = vld [vmem:[#allocation24_spill] sm:$0xff] }
 0x4f9   :  { %v1949_v11 = vadd.f32 %v1945_v45, %v1935_v4  ;;  %v1999_v26 = vadd.f32 %v6834_v19, %v1973_v13  ;;  %v6840_v30 = vld [vmem:[#allocation28_spill] sm:$0xff] }
 0x4fa   :  { %v2732_v60 = vadd.f32 %v6003_v57, %v2706_v2  ;;  %v2782_v56 = vadd.f32 %v6070_v10, %v2756_v12  ;;  %v6242_v59 = vpop.permute.xlu1 %2890 }
 0x4fb   :  { %v2025_v43 = vadd.f32 %v6835_v27, %v1999_v26  ;;  %v1975_v39 = vadd.f32 %v6836_v37, %v1949_v11  ;;  %v2919_v6 = vpop.permute.xlu0 %2918  ;;  %v3854_v11 = vld [vmem:[#allocation2 + $0x39] sm:$0xff] }
 0x4fc   :  { %v2758_v58 = vadd.f32 %v6043_v17, %v2732_v60  ;;  %v2796_v28 = vadd.f32 %v2792_v51, %v2782_v56  ;;  %v2113_v19 = vmul.f32 %v3854_v11, %v5983_v32  ;;  %v6841_v26 = vld [vmem:[#allocation39_spill] sm:$0xff]  ;;  %v6842_v60 = vld [vmem:[#allocation32_spill] sm:$0xff]  ;;  %v6848_v11 = vld [vmem:[#allocation45_spill] sm:$0xff] }
 0x4fd   :  { %v2051_v61 = vadd.f32 %v6837_v15, %v2025_v43  ;;  %v2001_v63 = vadd.f32 %v6838_v47, %v1975_v39  ;;  %v6843_v43 = vld [vmem:[#allocation37_spill] sm:$0xff] }
 0x4fe   :  { %v2784_v57 = vadd.f32 %v6090_v29, %v2758_v58  ;;  %v2822_v10 = vadd.f32 %v6112_v36, %v2796_v28  ;;  %v6253_v45 = vpop.permute.xlu1 %2894  ;;  %v3855_v28 = vld [vmem:[#allocation2 + $0x51] sm:$0xff] }
 0x4ff   :  { %v2077_v4 = vadd.f32 %v6839_v38, %v2051_v61  ;;  %v2027_v13 = vadd.f32 %v6840_v30, %v2001_v63  ;;  %v2941_v17 = vpop.permute.xlu0 %2940  ;;  %v2115_v15 = vmul.f32 %v3855_v28, %v5983_v32  ;;  %v6844_v61 = vld [vmem:[#allocation43_spill] sm:$0xff]  ;;  %v6845_v63 = vld [vmem:[#allocation41_spill] sm:$0xff] }
 0x500   :  { %v2798_v2 = vadd.f32 %v2794_v21, %v2784_v57  ;;  %v2848_v12 = vadd.f32 %v6151_v1, %v2822_v10  ;;  %v6846_v38 = vld [vmem:[#allocation47_spill] sm:$0xff] }
 0x501   :  { %v2103_v29 = vadd.f32 %v6841_v26, %v2077_v4  ;;  %v2053_v36 = vadd.f32 %v6842_v60, %v2027_v13 }
 0x502   :  { %v2824_v56 = vadd.f32 %v6133_v48, %v2798_v2  ;;  %v2874_v31 = vadd.f32 %v6182_v20, %v2848_v12  ;;  %v6263_v51 = vpop.permute.xlu1 %2916  ;;  %v6271_v48 = vstv %s3692_s23  ;;  %v6847_v2 = vld [vmem:[#allocation51_spill] sm:$0xff] }
 0x503   :  { %v2117_v27 = vadd.f32 %v2113_v19, %v2103_v29  ;;  %v2079_v37 = vadd.f32 %v6843_v43, %v2053_v36  ;;  %v2945_v39 = vpop.permute.xlu0 %2944  ;;  %v2962_v32 = vmul.f32 %v6271_v48, %v5895_v40  ;;  %v6850_v36 = vld [vmem:[#allocation49_spill] sm:$0xff]  ;;  %v6851_v40 = vld [vmem:[#allocation59_spill] sm:$0xff] }
 0x504   :  { %v2850_v58 = vadd.f32 %v6168_v14, %v2824_v56  ;;  %v2900_v1 = vadd.f32 %v6210_v5, %v2874_v31  ;;  %v6852_v43 = vld [vmem:[#allocation53_spill] sm:$0xff] }
 0x505   :  { %v2143_v47 = vadd.f32 %v6844_v61, %v2117_v27  ;;  %v2105_v57 = vadd.f32 %v6845_v63, %v2079_v37 }
 0x506   :  { %v2876_v20 = vadd.f32 %v6198_v24, %v2850_v58  ;;  %v2926_v10 = vadd.f32 %v2915_v34, %v2900_v1  ;;  %v6274_v21 = vpop.permute.xlu1 %2920  ;;  %v6849_v34 = vld [vmem:[#allocation55_spill] sm:$0xff] }
 0x507   :  { %v2169_v4 = vadd.f32 %v6846_v38, %v2143_v47  ;;  %v2119_v30 = vadd.f32 %v2115_v15, %v2105_v57  ;;  %v6277_v14 = vpop.permute.xlu0 %2980  ;;  %v3856_v1 = vld [vmem:[#allocation2 + $0x3a] sm:$0xff]  ;;  %v6854_v47 = vld [vmem:[#allocation57_spill] sm:$0xff] }
 0x508   :  { %v2902_v5 = vadd.f32 %v2893_v50, %v2876_v20  ;;  %v2952_v13 = vadd.f32 %v2941_v17, %v2926_v10  ;;  %v2964_v17 = vmul.f32 %v6271_v48, %v5907_v8  ;;  %v2283_v28 = vmul.f32 %v3856_v1, %v6057_v35  ;;  %v6853_v15 = vld [vmem:[#allocation63_spill] sm:$0xff]  ;;  %v6855_v20 = vld [vmem:[#allocation61_spill] sm:$0xff] }
 0x509   :  { %v2195_v12 = vadd.f32 %v6847_v2, %v2169_v4  ;;  %v2145_v19 = vadd.f32 %v6848_v11, %v2119_v30  ;;  %v3857_v38 = vld [vmem:[#allocation2 + $0x52] sm:$0xff]  ;;  %v6856_v30 = vld [vmem:[#allocation67_spill] sm:$0xff] }
 0x50a   :  { %v2928_v26 = vadd.f32 %v2919_v6, %v2902_v5  ;;  %v6283_v29 = vadd.f32 %v2962_v32, %v2952_v13  ;;  %v6285_v24 = vpop.permute.xlu1 %2942  ;;  %v2285_v4 = vmul.f32 %v3857_v38, %v6057_v35  ;;  %v6857_v13 = vld [vmem:[#allocation65_spill] sm:$0xff] }
 0x50b   :  { %v2221_v60 = vadd.f32 %v6849_v34, %v2195_v12  ;;  %v2171_v56 = vadd.f32 %v6850_v36, %v2145_v19  ;;  %v6289_v31 = vpop.permute.xlu0 %2984  ;;  %v6858_v12 = vld [vmem:[#allocation71_spill] sm:$0xff]  ;;  %v6860_v36 = vld [vmem:[#allocation69_spill] sm:$0xff] }
 0x50c   :  { %v2954_v50 = vadd.f32 %v2945_v39, %v2928_v26  ;;  %v6859_v34 = vld [vmem:[#allocation75_spill] sm:$0xff]  ;;  %v6862_v35 = vld [vmem:[#allocation73_spill] sm:$0xff] }
 0x50d   :  { %v2247_v27 = vadd.f32 %v6851_v40, %v2221_v60  ;;  %v2197_v37 = vadd.f32 %v6852_v43, %v2171_v56 }
 0x50e   :  { %v6295_v58 = vadd.f32 %v2964_v17, %v2954_v50  ;;  %v6297_v6 = vpop.permute.xlu1 %2946  ;;  %v6861_v17 = vld [vmem:[#allocation79_spill] sm:$0xff] }
 0x50f   :  { %v2273_v61 = vadd.f32 %v6853_v15, %v2247_v27  ;;  %v2223_v63 = vadd.f32 %v6854_v47, %v2197_v37  ;;  %v6302_v57 = vpop.permute.xlu0 %3006  ;;  %v6863_v37 = vld [vmem:[#allocation83_spill] sm:$0xff] }
 0x510   :  { %v6865_v47 = vld [vmem:[#allocation87_spill] sm:$0xff] }
 0x511   :  { %v2287_v39 = vadd.f32 %v2283_v28, %v2273_v61  ;;  %v2249_v8 = vadd.f32 %v6855_v20, %v2223_v63  ;;  %v6864_v28 = vld [vmem:[#allocation77_spill] sm:$0xff] }
 0x512   :  { %v6305_v10 = vpop.permute.xlu1 %2982 }
 0x513   :  { %v2313_v5 = vadd.f32 %v6856_v30, %v2287_v39  ;;  %v2275_v32 = vadd.f32 %v6857_v13, %v2249_v8  ;;  %v6310_v2 = vpop.permute.xlu0 %3010  ;;  %v3858_v39 = vld [vmem:[#allocation2 + $0x3b] sm:$0xff]  ;;  %v6866_v8 = vld [vmem:[#allocation81_spill] sm:$0xff] }
 0x514   :  { %v2453_v20 = vmul.f32 %v3858_v39, %v6123_v18  ;;  %v6874_v39 = vld [vmem:[#allocation97_spill] sm:$0xff] }
 0x515   :  { %v2339_v11 = vadd.f32 %v6858_v12, %v2313_v5  ;;  %v2289_v19 = vadd.f32 %v2285_v4, %v2275_v32  ;;  %v6867_v5 = vld [vmem:[#allocation85_spill] sm:$0xff]  ;;  %v6868_v12 = vld [vmem:[#allocation91_spill] sm:$0xff] }
 0x516   :  { %v6313_v26 = vpop.permute.xlu1 %2986 }
 0x517   :  { %v2365_v60 = vadd.f32 %v6859_v34, %v2339_v11  ;;  %v2315_v56 = vadd.f32 %v6860_v36, %v2289_v19  ;;  %v6317_v50 = vpop.permute.xlu0 %3032  ;;  %v3859_v19 = vld [vmem:[#allocation2 + $0x53] sm:$0xff] }
 0x518   :  { %v2455_v34 = vmul.f32 %v3859_v19, %v6123_v18  ;;  %v6875_v18 = vld [vmem:[#allocation107_spill] sm:$0xff] }
 0x519   :  { %v2391_v40 = vadd.f32 %v6861_v17, %v2365_v60  ;;  %v2341_v27 = vadd.f32 %v6862_v35, %v2315_v56  ;;  %v6869_v60 = vld [vmem:[#allocation89_spill] sm:$0xff]  ;;  %v6870_v17 = vld [vmem:[#allocation95_spill] sm:$0xff] }
 0x51a   :  { %v6321_v43 = vpop.permute.xlu1 %3008  ;;  %v3860_v19 = vld [vmem:[#allocation2 + $0x3c] sm:$0xff] }
 0x51b   :  { %v2417_v1 = vadd.f32 %v6863_v37, %v2391_v40  ;;  %v2367_v15 = vadd.f32 %v6864_v28, %v2341_v27  ;;  %v3425_v61 = vpop.permute.xlu0 %3424  ;;  %v6871_v37 = vld [vmem:[#allocation99_spill] sm:$0xff]  ;;  %v6872_v28 = vld [vmem:[#allocation93_spill] sm:$0xff] }
 0x51c   :  { %3757 = vpush %v3425_v61 }
 0x51d   :  { %v2443_v63 = vadd.f32 %v6865_v47, %v2417_v1  ;;  %v2393_v38 = vadd.f32 %v6866_v8, %v2367_v15  ;;  %v6873_v47 = vld [vmem:[#allocation103_spill] sm:$0xff] }
 0x51e   :  { %v6328_v4 = vpop.permute.xlu1 %3012 }
 0x51f   :  { %v2457_v30 = vadd.f32 %v2453_v20, %v2443_v63  ;;  %v2419_v13 = vadd.f32 %v6867_v5, %v2393_v38  ;;  %v3439_v32 = vpop.permute.xlu0 %3438 }
 0x521   :  { %v2483_v11 = vadd.f32 %v6868_v12, %v2457_v30  ;;  %v2445_v36 = vadd.f32 %v6869_v60, %v2419_v13  ;;  %v6876_v30 = vld [vmem:[#allocation101_spill] sm:$0xff]  ;;  %v6877_v12 = vld [vmem:[#allocation111_spill] sm:$0xff] }
 0x522   :  { %v6334_v56 = vpop.permute.xlu1 %3034  ;;  %v6878_v60 = vld [vmem:[#allocation105_spill] sm:$0xff] }
 0x523   :  { %v2509_v40 = vadd.f32 %v6870_v17, %v2483_v11  ;;  %v2459_v35 = vadd.f32 %v2455_v34, %v2445_v36  ;;  %v3453_v27 = vpop.permute.xlu0 %3452  ;;  %v2623_v34 = vmul.f32 %v3860_v19, %v6190_v53 }
 0x525   :  { %v2535_v1 = vadd.f32 %v6871_v37, %v2509_v40  ;;  %v2485_v15 = vadd.f32 %v6872_v28, %v2459_v35  ;;  %v6879_v35 = vld [vmem:[#allocation109_spill] sm:$0xff] }
 0x526   :  { %v3432_v61 = vpop.permute.xlu1 %3431 }
 0x527   :  { %v2561_v63 = vadd.f32 %v6873_v47, %v2535_v1  ;;  %v2511_v20 = vadd.f32 %v6874_v39, %v2485_v15  ;;  %v3467_v8 = vpop.permute.xlu0 %3466  ;;  %3759 = vpush %v3432_v61  ;;  %v3861_v15 = vld [vmem:[#allocation2 + $0x54] sm:$0xff] }
 0x528   :  { %3761 = vpush %v3439_v32  ;;  %v6880_v32 = vld [vmem:[#allocation115_spill] sm:$0xff]  ;;  %v2625_v61 = vmul.f32 %v3861_v15, %v6190_v53  ;;  %v6881_v47 = vld [vmem:[#allocation113_spill] sm:$0xff] }
 0x529   :  { %v2587_v38 = vadd.f32 %v6875_v18, %v2561_v63  ;;  %v2537_v5 = vadd.f32 %v6876_v30, %v2511_v20  ;;  %v6882_v20 = vld [vmem:[#allocation119_spill] sm:$0xff] }
 0x52a   :  { %v3446_v13 = vpop.permute.xlu1 %3445 }
 0x52b   :  { %v2613_v11 = vadd.f32 %v6877_v12, %v2587_v38  ;;  %v2563_v36 = vadd.f32 %v6878_v60, %v2537_v5  ;;  %v3487_v17 = vpop.permute.xlu0 %3486  ;;  %3763 = vpush %v3446_v13  ;;  %v6883_v5 = vld [vmem:[#allocation117_spill] sm:$0xff] }
 0x52c   :  { %3765 = vpush %v3453_v27 }
 0x52d   :  { %v2627_v40 = vadd.f32 %v2623_v34, %v2613_v11  ;;  %v2589_v37 = vadd.f32 %v6879_v35, %v2563_v36  ;;  %v6884_v11 = vld [vmem:[#allocation121_spill] sm:$0xff] }
 0x52e   :  { %v3460_v1 = vpop.permute.xlu1 %3459 }
 0x52f   :  { %v2653_v28 = vadd.f32 %v6880_v32, %v2627_v40  ;;  %v2615_v63 = vadd.f32 %v6881_v47, %v2589_v37  ;;  %v3501_v39 = vpop.permute.xlu0 %3500  ;;  %3767 = vpush %v3460_v1  ;;  %v3862_v40 = vld [vmem:[#allocation2 + $0x3d] sm:$0xff]  ;;  %v3863_v32 = vld [vmem:[#allocation2 + $0x55] sm:$0xff] }
 0x530   :  { %3769 = vpush %v3467_v8  ;;  %v2793_v35 = vmul.f32 %v3862_v40, %v6233_v44 }
 0x531   :  { %v2679_v18 = vadd.f32 %v6882_v20, %v2653_v28  ;;  %v2629_v38 = vadd.f32 %v2625_v61, %v2615_v63  ;;  %3771 = vpush %v5960_v54  ;;  %v2795_v28 = vmul.f32 %v3863_v32, %v6233_v44  ;;  %v2992_v63 = vadd.f32 %v6277_v14, %v6283_v29 }
 0x532   :  { %v3480_v27 = vpop.permute.xlu1 %3479  ;;  %v3420_v32 = vstv %s6392_s28 }
 0x533   :  { %v2705_v30 = vadd.f32 %v5999_v16, %v2679_v18  ;;  %v2655_v13 = vadd.f32 %v6883_v5, %v2629_v38  ;;  %v3515_v12 = vpop.permute.xlu0 %3514  ;;  %3773 = vpush %v3480_v27  ;;  %v3018_v44 = vadd.f32 %v6302_v57, %v2992_v63 }
 0x534   :  { %3775 = vpush %v3487_v17 }
 0x535   :  { %v2681_v53 = vadd.f32 %v6884_v11, %v2655_v13  ;;  %v2731_v19 = vadd.f32 %v6040_v23, %v2705_v30 }
 0x536   :  { %v3494_v34 = vpop.permute.xlu1 %3493 }
 0x537   :  { %v2707_v8 = vadd.f32 %v6023_v55, %v2681_v53  ;;  %v2757_v60 = vadd.f32 %v6084_v46, %v2731_v19  ;;  %v3037_v36 = vpop.permute.xlu0 %3036  ;;  %3777 = vpush %v3494_v34 }
 0x538   :  { %3779 = vpush %v3501_v39 }
 0x539   :  { %v2733_v54 = vadd.f32 %v6065_v49, %v2707_v8  ;;  %v2783_v16 = vadd.f32 %v6126_v41, %v2757_v60 }
 0x53a   :  { %v3508_v17 = vpop.permute.xlu1 %3507 }
 0x53b   :  { %v2759_v37 = vadd.f32 %v6105_v22, %v2733_v54  ;;  %v2797_v1 = vadd.f32 %v2793_v35, %v2783_v16  ;;  %v3059_v23 = vpop.permute.xlu0 %3058  ;;  %3781 = vpush %v3508_v17 }
 0x53c   :  { %3783 = vpush %v3515_v12 }
 0x53d   :  { %v2785_v55 = vadd.f32 %v6145_v3, %v2759_v37  ;;  %v2823_v46 = vadd.f32 %v6162_v7, %v2797_v1 }
 0x53e   :  { %v3522_v49 = vpop.permute.xlu1 %3521 }
 0x53f   :  { %v2799_v15 = vadd.f32 %v2795_v28, %v2785_v55  ;;  %v2849_v41 = vadd.f32 %v6195_v52, %v2823_v46  ;;  %v3063_v61 = vpop.permute.xlu0 %3062  ;;  %3785 = vpush %v3522_v49 }
 0x541   :  { %v2825_v47 = vadd.f32 %v6177_v62, %v2799_v15  ;;  %v2875_v22 = vadd.f32 %v6218_v0, %v2849_v41  ;;  %v2994_v62 = vadd.f32 %v6289_v31, %v6295_v58  ;;  %v3044_v0 = vadd.f32 %v6317_v50, %v3018_v44 }
 0x542   :  { %v3039_v39 = vpop.permute.xlu1 %3038 }
 0x543   :  { %v2851_v3 = vadd.f32 %v6206_v9, %v2825_v47  ;;  %v2901_v7 = vadd.f32 %v6242_v59, %v2875_v22  ;;  %v3085_v20 = vpop.permute.xlu0 %3084  ;;  %v2963_v9 = vmul.f32 %v6271_v48, %v5918_v33  ;;  %v3020_v57 = vadd.f32 %v6310_v2, %v2994_v62 }
 0x544   :  { %v3070_v27 = vadd.f32 %v3059_v23, %v3044_v0 }
 0x545   :  { %v2877_v18 = vadd.f32 %v6228_v42, %v2851_v3  ;;  %v2927_v52 = vadd.f32 %v6263_v51, %v2901_v7  ;;  %v3046_v30 = vadd.f32 %v3037_v36, %v3020_v57 }
 0x546   :  { %v3061_v38 = vpop.permute.xlu1 %3060  ;;  %v3096_v5 = vadd.f32 %v3085_v20, %v3070_v27 }
 0x547   :  { %v2903_v14 = vadd.f32 %v6253_v45, %v2877_v18  ;;  %v2953_v29 = vadd.f32 %v6285_v24, %v2927_v52  ;;  %v3089_v59 = vpop.permute.xlu0 %3088  ;;  %v2965_v45 = vmul.f32 %v6271_v48, %v5924_v25  ;;  %v3072_v13 = vadd.f32 %v3063_v61, %v3046_v30 }
 0x549   :  { %v2929_v42 = vadd.f32 %v6274_v21, %v2903_v14  ;;  %v2967_v51 = vadd.f32 %v2963_v9, %v2953_v29  ;;  %v3098_v11 = vadd.f32 %v3089_v59, %v3072_v13 }
 0x54a   :  { %v3065_v31 = vpop.permute.xlu1 %3064 }
 0x54b   :  { %v2955_v58 = vadd.f32 %v6297_v6, %v2929_v42  ;;  %v2993_v50 = vadd.f32 %v6305_v10, %v2967_v51  ;;  %v3111_v24 = vpop.permute.xlu0 %3110 }
 0x54c   :  { %v3122_v33 = vadd.f32 %v3111_v24, %v3096_v5 }
 0x54d   :  { %v2969_v12 = vadd.f32 %v2965_v45, %v2955_v58  ;;  %v3019_v2 = vadd.f32 %v6321_v43, %v2993_v50  ;;  %s6394_s17 = spop %3757 }
 0x54e   :  { %v3699_v53 = vmul.f32 -1.442695, %v3122_v33  ;;  %v3087_v21 = vpop.permute.xlu1 %3086  ;;  %v3427_v28 = vstv %s6394_s17 }
 0x54f   :  { %v2995_v19 = vadd.f32 %v6313_v26, %v2969_v12  ;;  %v3045_v34 = vadd.f32 %v6334_v56, %v3019_v2  ;;  %v3115_v8 = vpop.permute.xlu0 %3114 }
 0x550   :  { %3810 = vpow2.f32 %v3699_v53  ;;  %v3124_v6 = vadd.f32 %v3115_v8, %v3098_v11 }
 0x551   :  { %v3021_v10 = vadd.f32 %v6328_v4, %v2995_v19  ;;  %v3071_v60 = vadd.f32 %v3061_v38, %v3045_v34 }
 0x552   :  { %v3701_v25 = vmul.f32 -1.442695, %v3124_v6  ;;  %v3091_v48 = vpop.permute.xlu1 %3090 }
 0x553   :  { %v3047_v36 = vadd.f32 %v3039_v39, %v3021_v10  ;;  %v3097_v16 = vadd.f32 %v3087_v21, %v3071_v60 }
 0x554   :  { %3812 = vpow2.f32 %v3701_v25 }
 0x555   :  { %v3073_v54 = vadd.f32 %v3065_v31, %v3047_v36 }
 0x556   :  { %v3113_v43 = vpop.permute.xlu1 %3112 }
 0x557   :  { %v3123_v40 = vadd.f32 %v3113_v43, %v3097_v16  ;;  %v3099_v26 = vadd.f32 %v3091_v48, %v3073_v54 }
 0x558   :  { %s6396_s18 = spop %3759 }
 0x559   :  { %v3700_v56 = vmul.f32 -1.442695, %v3123_v40  ;;  %s6398_s6 = spop %3761  ;;  %v3434_v15 = vstv %s6396_s18 }
 0x55a   :  { %v3811_v35 = vpop.eup %3810  ;;  %v3117_v17 = vpop.permute.xlu1 %3116  ;;  %v3441_v41 = vstv %s6398_s6 }
 0x55b   :  { %v3138_v4 = vadd.f32 1.0, %v3811_v35  ;;  %3814 = vpow2.f32 %v3700_v56  ;;  %v3125_v37 = vadd.f32 %v3117_v17, %v3099_v26 }
 0x55c   :  { %s6400_s20 = spop %3763 }
 0x55d   :  { %3816 = vrcp.f32 %v3138_v4  ;;  %v3702_v1 = vmul.f32 -1.442695, %v3125_v37  ;;  %s6402_s22 = spop %3765  ;;  %v3448_v47 = vstv %s6400_s20 }
 0x55e   :  { %v3813_v23 = vpop.eup %3812  ;;  %v3455_v22 = vstv %s6402_s22 }
 0x55f   :  { %v3140_v55 = vadd.f32 1.0, %v3813_v23  ;;  %3818 = vpow2.f32 %v3702_v1 }
 0x560   :  { %s6404_s10 = spop %3767 }
 0x561   :  { %3820 = vrcp.f32 %v3140_v55  ;;  %s6406_s3 = spop %3769  ;;  %v3462_v63 = vstv %s6404_s10 }
 0x562   :  { %s6408_s25 = spop %3771  ;;  %v3469_v39 = vstv %s6406_s3 }
 0x563   :  { %v3475_v29 = vstv %s6408_s25 }
 0x564   :  { %s6411_s1 = spop %3773 }
 0x565   :  { %v3815_v46 = vpop.eup %3814  ;;  %s6420_s27 = spop %3775  ;;  %v3482_v59 = vstv %s6411_s1 }
 0x566   :  { %v3139_v49 = vadd.f32 1.0, %v3815_v46  ;;  %v3489_v57 = vstv %s6420_s27 }
 0x567   :  { %v3817_v61 = vpop.eup %3816 }
 0x568   :  { %v3422_v3 = vmul.f32 %v3817_v61, %v3420_v32  ;;  %v3429_v7 = vmul.f32 %v3817_v61, %v3427_v28  ;;  %3822 = vrcp.f32 %v3139_v49  ;;  %v3436_v20 = vmul.f32 %v3817_v61, %v3434_v15  ;;  %s6422_s0 = spop %3777 }
 0x569   :  { %v3819_v44 = vpop.eup %3818  ;;  %v3443_v18 = vmul.f32 %v3817_v61, %v3441_v41  ;;  %v3450_v52 = vmul.f32 %v3817_v61, %v3448_v47  ;;  %v3457_v62 = vmul.f32 %v3817_v61, %v3455_v22  ;;  %v3464_v0 = vmul.f32 %v3817_v61, %v3462_v63  ;;  %s6424_s29 = spop %3779 }
 0x56a   :  { %3528 = vst.msk [vmem:[#allocation10] sm:$0xff] %vm299_vm3, %v3422_v3  ;;  %3530 = vst.msk [vmem:[#allocation10 + $0x10] sm:$0xff] %vm299_vm3, %v3429_v7  ;;  %v3141_v38 = vadd.f32 1.0, %v3819_v44  ;;  %v3471_v14 = vmul.f32 %v3817_v61, %v3469_v39  ;;  %v3496_v27 = vstv %s6422_s0  ;;  %v3503_v42 = vstv %s6424_s29 }
 0x56b   :  { %3532 = vst.msk [vmem:[#allocation10 + $0x20] sm:$0xff] %vm299_vm3, %v3436_v20  ;;  %v3821_v9 = vpop.eup %3820  ;;  %3534 = vst.msk [vmem:[#allocation10 + $0x30] sm:$0xff] %vm299_vm3, %v3443_v18 }
 0x56c   :  { %3536 = vst.msk [vmem:[#allocation10 + $0x40] sm:$0xff] %vm299_vm3, %v3450_v52  ;;  %3538 = vst.msk [vmem:[#allocation10 + $0x50] sm:$0xff] %vm299_vm3, %v3457_v62  ;;  %3824 = vrcp.f32 %v3141_v38  ;;  %v3477_v51 = vmul.f32 %v3821_v9, %v3475_v29  ;;  %v3484_v30 = vmul.f32 %v3821_v9, %v3482_v59  ;;  %v3491_v5 = vmul.f32 %v3821_v9, %v3489_v57  ;;  %s6439_s2 = spop %3781 }
 0x56d   :  { %3540 = vst.msk [vmem:[#allocation10 + $0x60] sm:$0xff] %vm299_vm3, %v3464_v0  ;;  %3542 = vst.msk [vmem:[#allocation10 + $0x70] sm:$0xff] %vm299_vm3, %v3471_v14  ;;  %v3498_v31 = vmul.f32 %v3821_v9, %v3496_v27  ;;  %v3505_v58 = vmul.f32 %v3821_v9, %v3503_v42  ;;  %v3510_v50 = vstv %s6439_s2  ;;  %s6442_s4 = spop %3783 }
 0x56e   :  { %3544 = vst.msk [vmem:[#allocation10 + $0x80] sm:$0xff] %vm299_vm3, %v3477_v51  ;;  %3546 = vst.msk [vmem:[#allocation10 + $0x90] sm:$0xff] %vm299_vm3, %v3484_v30  ;;  %v3512_v45 = vmul.f32 %v3821_v9, %v3510_v50  ;;  %v3517_v24 = vstv %s6442_s4 }
 0x56f   :  { %3548 = vst.msk [vmem:[#allocation10 + $0xa0] sm:$0xff] %vm299_vm3, %v3491_v5  ;;  %3550 = vst.msk [vmem:[#allocation10 + $0xb0] sm:$0xff] %vm299_vm3, %v3498_v31  ;;  %v3519_v13 = vmul.f32 %v3821_v9, %v3517_v24 }
 0x570   :  { %3552 = vst.msk [vmem:[#allocation10 + $0xc0] sm:$0xff] %vm299_vm3, %v3505_v58  ;;  %3554 = vst.msk [vmem:[#allocation10 + $0xd0] sm:$0xff] %vm299_vm3, %v3512_v45  ;;  %s6451_s30 = spop %3785 }
 0x571   :  { %3556 = vst.msk [vmem:[#allocation10 + $0xe0] sm:$0xff] %vm299_vm3, %v3519_v13  ;;  %v3524_v33 = vstv %s6451_s30 }
 0x572   :  { %v3823_v12 = vpop.eup %3822  ;;  %v3526_v2 = vmul.f32 %v3821_v9, %v3524_v33 }
 0x573   :  { %v3423_v11 = vmul.f32 %v3823_v12, %v3420_v32  ;;  %v3430_v53 = vmul.f32 %v3823_v12, %v3427_v28  ;;  %v3437_v21 = vmul.f32 %v3823_v12, %v3434_v15  ;;  %v3444_v19 = vmul.f32 %v3823_v12, %v3441_v41 }
 0x574   :  { %v3451_v34 = vmul.f32 %v3823_v12, %v3448_v47  ;;  %v3458_v8 = vmul.f32 %v3823_v12, %v3455_v22  ;;  %v3465_v6 = vmul.f32 %v3823_v12, %v3462_v63  ;;  %v3472_v10 = vmul.f32 %v3823_v12, %v3469_v39  ;;  %3558 = vst.msk [vmem:[#allocation10 + $0xf0] sm:$0xff] %vm299_vm3, %v3526_v2 }
 0x575   :  { %3529 = vst.msk [vmem:[#allocation10 + $0x8] sm:$0xff] %vm299_vm3, %v3423_v11  ;;  %3531 = vst.msk [vmem:[#allocation10 + $0x18] sm:$0xff] %vm299_vm3, %v3430_v53 }
 0x576   :  { %3533 = vst.msk [vmem:[#allocation10 + $0x28] sm:$0xff] %vm299_vm3, %v3437_v21  ;;  %3535 = vst.msk [vmem:[#allocation10 + $0x38] sm:$0xff] %vm299_vm3, %v3444_v19  ;;  %v3825_v60 = vpop.eup %3824 }
 0x577   :  { %3537 = vst.msk [vmem:[#allocation10 + $0x48] sm:$0xff] %vm299_vm3, %v3451_v34  ;;  %3539 = vst.msk [vmem:[#allocation10 + $0x58] sm:$0xff] %vm299_vm3, %v3458_v8  ;;  %v3478_v25 = vmul.f32 %v3825_v60, %v3475_v29  ;;  %v3485_v48 = vmul.f32 %v3825_v60, %v3482_v59  ;;  %v3492_v36 = vmul.f32 %v3825_v60, %v3489_v57 }
 0x578   :  { %3541 = vst.msk [vmem:[#allocation10 + $0x68] sm:$0xff] %vm299_vm3, %v3465_v6  ;;  %3543 = vst.msk [vmem:[#allocation10 + $0x78] sm:$0xff] %vm299_vm3, %v3472_v10  ;;  %v3499_v54 = vmul.f32 %v3825_v60, %v3496_v27  ;;  %v3506_v16 = vmul.f32 %v3825_v60, %v3503_v42  ;;  %v3513_v43 = vmul.f32 %v3825_v60, %v3510_v50 }
 0x579   :  { %v3520_v40 = vmul.f32 %v3825_v60, %v3517_v24  ;;  %v3527_v26 = vmul.f32 %v3825_v60, %v3524_v33  ;;  %3545 = vst.msk [vmem:[#allocation10 + $0x88] sm:$0xff] %vm299_vm3, %v3478_v25  ;;  %3547 = vst.msk [vmem:[#allocation10 + $0x98] sm:$0xff] %vm299_vm3, %v3485_v48 }
 0x57a   :  { %3549 = vst.msk [vmem:[#allocation10 + $0xa8] sm:$0xff] %vm299_vm3, %v3492_v36  ;;  %3551 = vst.msk [vmem:[#allocation10 + $0xb8] sm:$0xff] %vm299_vm3, %v3499_v54 }
 0x57b   :  { %3553 = vst.msk [vmem:[#allocation10 + $0xc8] sm:$0xff] %vm299_vm3, %v3506_v16  ;;  %3555 = vst.msk [vmem:[#allocation10 + $0xd8] sm:$0xff] %vm299_vm3, %v3513_v43 }
 0x57c   :  { %3557 = vst.msk [vmem:[#allocation10 + $0xe8] sm:$0xff] %vm299_vm3, %v3520_v40  ;;  %3559 = vst.msk [vmem:[#allocation10 + $0xf8] sm:$0xff] %vm299_vm3, %v3527_v26 }
 0x57d   :  { %3931 = shalt.err (!%p3928_p11)
}
 0x57e   :  { %s3932_s19 = scalar_lea.hbm %s6498_s11, 4096 }
 0x57f   :  { %p3933_p12 = scmp.ne.s32.totalorder %s6498_s11, %s3932_s19  ;;  %p3936_p13 = scmp.lt.u32.totalorder %s3932_s19, %s6498_s11 }
 0x581   :  { %p3938_p0 = pnand %p3936_p13, %p3933_p12 }
 0x583   :  { %3941 = shalt.err (!%p3938_p0)
}
 0x584   :  { %3571 = dma.vmem_to_hbm [thread:$0]  %s3566_s14, 4096, %s6498_s11, [#allocation5], %s3952_s12, %s3952_s12, %s3953_s13  }
 0x585   :  { %3948 = dma.done.wait [#allocation5], 4096  }
 0x586   :  { %3949 = vsyncadd [#allocation5], 4294963200 }
 0x587   :  { %3575 = vsyncpa [#allocation4], 1 }
 0x588   :  { %3576 = vsyncpa [#allocation9], 1 }
 0x589   :  { %3577 = vsyncpa [#allocation5], 1 }
 0x58a   :  { %3578 = vsyncpa [#allocation6], 1 }

</bundles_post_ra>
